<compile_context>
chip_gen: v5e
topology: v5e:2x2
jax: 0.10.0
libtpu: 0.0.40
codegen_flags: <defaults>
</compile_context>

<pallas_src>
import jax
import jax.numpy as jnp
import numpy as np
from jax.experimental import pallas as pl
from jax.experimental.pallas import tpu as pltpu


def bottleneck_kernel(x_ref, w1_ref, b1_ref, w2_ref, b2_ref, w3_ref, b3_ref,
                      o_ref, halo_ref):
    # x_ref   : (1, H*W, Cin) f32   -- one image, channels on lanes
    # w1_ref  : (Cin, P)      f32
    # b1_ref  : (1, P)        f32
    # w2_ref  : (K2, P)       f32   -- tap-major (ky,kx,cin) rows, zero-padded to K2
    # b2_ref  : (1, P)        f32
    # w3_ref  : (P, Cout)     f32
    # b3_ref  : (1, Cout)     f32
    # o_ref   : (1, H*W, Cout) f32
    # halo_ref: (H+2, W+2, P) f32 VMEM scratch (zero-haloed spike map, pad=1)
    Hp2, Wp2, P = halo_ref.shape
    H, W = Hp2 - 2, Wp2 - 2
    HW = H * W
    K2 = w2_ref.shape[0]

    # ---- conv1x1 #1 + IF spike (one (HW, Cin) x (Cin, P) MXU matmul) ----
    h1 = jnp.dot(x_ref[0], w1_ref[...],
                 preferred_element_type=jnp.float32) + b1_ref[...]
    s1 = (h1 >= 1.0).astype(jnp.float32)                    # exact 0/1, (HW, P)

    # ---- zero-haloed spike map for the 3x3 conv (padding = 1) ----
    # Tiny scratch; re-zeroed each step (safe under megacore "parallel"),
    # interior written exactly once.
    halo_ref[...] = jnp.zeros_like(halo_ref)
    halo_ref[1:H + 1, 1:W + 1, :] = s1.reshape(H, W, P)

    # ---- im2col LHS built in registers: 9 static window reads, concatenated
    #      on the lane axis and zero-padded 9P -> K2 (lane-dense MXU operand).
    taps = [halo_ref[dy:dy + H, dx:dx + W, :].reshape(HW, P)
            for dy in range(3) for dx in range(3)]
    if K2 > 9 * P:
        taps.append(jnp.zeros((HW, K2 - 9 * P), jnp.float32))
    lhs = jnp.concatenate(taps, axis=-1)                     # (HW, K2)

    # ---- conv3x3 + IF: one (HW, K2) x (K2, P) MXU matmul ----
    h2 = jnp.dot(lhs, w2_ref[...],
                 preferred_element_type=jnp.float32) + b2_ref[...]
    s2 = (h2 >= 1.0).astype(jnp.float32)                     # (HW, P)

    # ---- conv1x1 #3 + IF ----
    h3 = jnp.dot(s2, w3_ref[...],
                 preferred_element_type=jnp.float32) + b3_ref[...]
    s3 = (h3 >= 1.0).astype(jnp.float32)                     # (HW, Cout)

    # ---- residual add (downsample=None -> identity).  Re-read x from VMEM
    #      instead of holding the first load live across all three matmuls.
    o_ref[0] = s3 + x_ref[0]


def bottleneck_forward_nhwc(x_nhwc, params):
    """Core entry point: NHWC activations (no layout transposes needed)."""
    w1, b1, w2, b2, w3, b3 = params          # w2 in HWIO: (3, 3, P, P)
    N, H, W, Cin = x_nhwc.shape
    P = w1.shape[1]
    Cout = w3.shape[1]
    assert Cout == Cin, "identity residual requires inplanes == planes * expansion"
    HW = H * W
    K2 = ((9 * P + 127) // 128) * 128        # lane-dense contraction dim for conv2

    x_rows = x_nhwc.reshape(N, HW, Cin).astype(jnp.float32)

    # Kernel-facing weight layouts (all f32; see header about precision).
    w1f = w1.astype(jnp.float32)
    w2mat = w2.reshape(9 * P, P).astype(jnp.float32)         # (ky,kx,cin)-major rows
    w2p = jnp.pad(w2mat, ((0, K2 - 9 * P), (0, 0)))          # zero rows -> K2
    w3f = w3.astype(jnp.float32)
    b1f = b1.astype(jnp.float32)
    b2f = b2.astype(jnp.float32)
    b3f = b3.astype(jnp.float32)

    flops = 2 * N * HW * (Cin * P + K2 * P + P * Cout)
    bytes_accessed = 4 * (N * HW * (Cin + Cout)
                          + Cin * P + K2 * P + P * Cout + 2 * P + Cout)

    grid_spec = pltpu.PrefetchScalarGridSpec(
        num_scalar_prefetch=0,
        grid=(N,),
        in_specs=[
            pl.BlockSpec((1, HW, Cin), lambda i: (i, 0, 0)),   # x: tiled per image
            pl.BlockSpec((Cin, P), lambda i: (0, 0)),          # weights: broadcast
            pl.BlockSpec((1, P), lambda i: (0, 0)),
            pl.BlockSpec((K2, P), lambda i: (0, 0)),
            pl.BlockSpec((1, P), lambda i: (0, 0)),
            pl.BlockSpec((P, Cout), lambda i: (0, 0)),
            pl.BlockSpec((1, Cout), lambda i: (0, 0)),
        ],
        out_specs=pl.BlockSpec((1, HW, Cout), lambda i: (i, 0, 0)),
        scratch_shapes=[pltpu.VMEM((H + 2, W + 2, P), jnp.float32)],
    )

    out_rows = pl.pallas_call(
        bottleneck_kernel,
        out_shape=jax.ShapeDtypeStruct((N, HW, Cout), jnp.float32),
        grid_spec=grid_spec,
        compiler_params=pltpu.CompilerParams(
            dimension_semantics=("parallel",),
            vmem_limit_bytes=32 * 1024 * 1024,
        ),
        cost_estimate=pl.CostEstimate(
            flops=flops, transcendentals=0, bytes_accessed=bytes_accessed),
    )(x_rows, w1f, b1f, w2p, b2f, w3f, b3f)

    return out_rows.reshape(N, H, W, Cout)


def bottleneck_forward(x_nchw, params):
    """PyTorch-layout (NCHW) wrapper; the transposes are layout plumbing only."""
    x_nhwc = jnp.transpose(x_nchw, (0, 2, 3, 1))
    out = bottleneck_forward_nhwc(x_nhwc, params)
    return jnp.transpose(out, (0, 3, 1, 2))


def bottleneck_ref(x_nchw, params):
    """Pure-JAX f32 reference of the module forward."""
    w1, b1, w2, b2, w3, b3 = params
    x = jnp.transpose(x_nchw, (0, 2, 3, 1)).astype(jnp.float32)

    def spike(v):
        return (v >= 1.0).astype(jnp.float32)

    h1 = jnp.einsum('nhwc,cp->nhwp', x, w1,
                    preferred_element_type=jnp.float32) + b1[0]
    s1 = spike(h1)
    h2 = jax.lax.conv_general_dilated(
        s1, w2, window_strides=(1, 1), padding='SAME',
        dimension_numbers=('NHWC', 'HWIO', 'NHWC'),
        preferred_element_type=jnp.float32) + b2[0]
    s2 = spike(h2)
    h3 = jnp.einsum('nhwp,pc->nhwc', s2, w3,
                    preferred_element_type=jnp.float32) + b3[0]
    s3 = spike(h3)
    return jnp.transpose(s3 + x, (0, 3, 1, 2))


if __name__ == "__main__":
    # Bottleneck(inplanes=32, planes=8): expansion 4 -> output channels = 32.
    planes = 8
    inplanes = planes * 4
    N, H, W = 2, 16, 16

    key = jax.random.PRNGKey(0)
    ks = jax.random.split(key, 7)

    # Snap all data to a 1/32 grid: every product / f32 accumulation (and any
    # bf16-pass MXU strategy) is then exact, so kernel and reference agree
    # bit-for-bit and the hard spike thresholds are numerically stable.
    def q(v):
        return jnp.round(v * 32.0) / 32.0

    w1 = q(jax.random.normal(ks[0], (inplanes, planes), jnp.float32) * 0.3)
    b1 = q(jax.random.normal(ks[1], (1, planes), jnp.float32) * 0.2)
    w2 = q(jax.random.normal(ks[2], (3, 3, planes, planes), jnp.float32) * 0.3)
    b2 = q(jax.random.normal(ks[3], (1, planes), jnp.float32) * 0.2)
    w3 = q(jax.random.normal(ks[4], (planes, inplanes), jnp.float32) * 0.6)
    b3 = q(jax.random.normal(ks[5], (1, inplanes), jnp.float32) * 0.2)
    params = (w1, b1, w2, b2, w3, b3)

    x = q(jax.random.normal(ks[6], (N, inplanes, H, W), jnp.float32) * 0.5)

    out = jax.block_until_ready(bottleneck_forward(x, params))
    ref = bottleneck_ref(x, params)

    assert out.shape == (N, inplanes, H, W)
    np.testing.assert_allclose(np.asarray(out), np.asarray(ref),
                               rtol=0.0, atol=1e-5)

    print("KERNEL_OK")
</pallas_src>

<mosaic_0001>
module attributes {stable_mosaic.version = 11 : i64} {
  func.func @bottleneck_kernel(%arg0: i32, %arg1: memref<1x256x32xf32, #tpu.memory_space<vmem>>, %arg2: memref<32x8xf32, #tpu.memory_space<vmem>>, %arg3: memref<1x8xf32, #tpu.memory_space<vmem>>, %arg4: memref<128x8xf32, #tpu.memory_space<vmem>>, %arg5: memref<1x8xf32, #tpu.memory_space<vmem>>, %arg6: memref<8x32xf32, #tpu.memory_space<vmem>>, %arg7: memref<1x32xf32, #tpu.memory_space<vmem>>, %arg8: memref<1x256x32xf32, #tpu.memory_space<vmem>>, %arg9: memref<18x18x8xf32, #tpu.memory_space<vmem>>) attributes {dimension_semantics = [#tpu.dimension_semantics<parallel>], iteration_bounds = array<i64: 2>, scalar_prefetch = 0 : i64, scratch_operands = 1 : i64, tpu.core_type = #tpu.core_type<tc>, window_params = [{transform_indices = @transform_0, window_bounds = array<i64: 1, 256, 32>}, {pipeline_mode = #tpu.pipeline_mode<synchronous>, transform_indices = @transform_1, window_bounds = array<i64: 32, 8>}, {pipeline_mode = #tpu.pipeline_mode<synchronous>, transform_indices = @transform_2, window_bounds = array<i64: 1, 8>}, {pipeline_mode = #tpu.pipeline_mode<synchronous>, transform_indices = @transform_3, window_bounds = array<i64: 128, 8>}, {pipeline_mode = #tpu.pipeline_mode<synchronous>, transform_indices = @transform_4, window_bounds = array<i64: 1, 8>}, {pipeline_mode = #tpu.pipeline_mode<synchronous>, transform_indices = @transform_5, window_bounds = array<i64: 8, 32>}, {pipeline_mode = #tpu.pipeline_mode<synchronous>, transform_indices = @transform_6, window_bounds = array<i64: 1, 32>}, {transform_indices = @transform_7, window_bounds = array<i64: 1, 256, 32>}]} {
    %c0 = arith.constant 0 : index
    %c0_0 = arith.constant 0 : index
    %c0_1 = arith.constant 0 : index
    %0 = vector.load %arg1[%c0, %c0_0, %c0_1] : memref<1x256x32xf32, #tpu.memory_space<vmem>>, vector<1x256x32xf32>
    %1 = vector.shape_cast %0 : vector<1x256x32xf32> to vector<256x32xf32>
    %c0_2 = arith.constant 0 : index
    %c0_3 = arith.constant 0 : index
    %2 = vector.load %arg2[%c0_2, %c0_3] : memref<32x8xf32, #tpu.memory_space<vmem>>, vector<32x8xf32>
    %cst = arith.constant dense<0.000000e+00> : vector<256x8xf32>
    %3 = tpu.matmul %1, %2, %cst {dimension_numbers = #tpu.dot_dimension_numbers<[1], [0], [0], [1], [0, 0, 1, 1], [], []>} : vector<256x32xf32>, vector<32x8xf32>, vector<256x8xf32> -> vector<256x8xf32>
    %c0_4 = arith.constant 0 : index
    %c0_5 = arith.constant 0 : index
    %4 = vector.load %arg3[%c0_4, %c0_5] : memref<1x8xf32, #tpu.memory_space<vmem>>, vector<1x8xf32>
    %5 = vector.broadcast %4 : vector<1x8xf32> to vector<256x8xf32>
    %6 = arith.addf %3, %5 : vector<256x8xf32>
    %cst_6 = arith.constant 1.000000e+00 : f32
    %7 = vector.broadcast %cst_6 : f32 to vector<256x8xf32>
    %8 = arith.cmpf oge, %6, %7 : vector<256x8xf32>
    %9 = arith.extui %8 : vector<256x8xi1> to vector<256x8xi32>
    %10 = arith.sitofp %9 : vector<256x8xi32> to vector<256x8xf32>
    %cst_7 = arith.constant 0.000000e+00 : f32
    %11 = vector.broadcast %cst_7 : f32 to vector<18x18x8xf32>
    %c0_8 = arith.constant 0 : index
    %c0_9 = arith.constant 0 : index
    %c0_10 = arith.constant 0 : index
    %12 = vector.load %arg9[%c0_8, %c0_9, %c0_10] : memref<18x18x8xf32, #tpu.memory_space<vmem>>, vector<18x18x8xf32>
    tpu.vector_store %arg9[%c0_8, %c0_9, %c0_10], %11 {strides = array<i32>} : memref<18x18x8xf32, #tpu.memory_space<vmem>>, vector<18x18x8xf32>,
    %13 = vector.shape_cast %10 : vector<256x8xf32> to vector<16x16x8xf32>
    %c1 = arith.constant 1 : index
    %c1_11 = arith.constant 1 : index
    %c0_12 = arith.constant 0 : index
    %14 = vector.load %arg9[%c1, %c1_11, %c0_12] : memref<18x18x8xf32, #tpu.memory_space<vmem>>, vector<16x16x8xf32>
    tpu.vector_store %arg9[%c1, %c1_11, %c0_12], %13 {strides = array<i32>} : memref<18x18x8xf32, #tpu.memory_space<vmem>>, vector<16x16x8xf32>,
    %c0_13 = arith.constant 0 : index
    %c0_14 = arith.constant 0 : index
    %c0_15 = arith.constant 0 : index
    %15 = vector.load %arg9[%c0_13, %c0_14, %c0_15] : memref<18x18x8xf32, #tpu.memory_space<vmem>>, vector<16x16x8xf32>
    %16 = vector.shape_cast %15 : vector<16x16x8xf32> to vector<256x8xf32>
    %c0_16 = arith.constant 0 : index
    %c1_17 = arith.constant 1 : index
    %c0_18 = arith.constant 0 : index
    %17 = vector.load %arg9[%c0_16, %c1_17, %c0_18] : memref<18x18x8xf32, #tpu.memory_space<vmem>>, vector<16x16x8xf32>
    %18 = vector.shape_cast %17 : vector<16x16x8xf32> to vector<256x8xf32>
    %c0_19 = arith.constant 0 : index
    %c2 = arith.constant 2 : index
    %c0_20 = arith.constant 0 : index
    %19 = vector.load %arg9[%c0_19, %c2, %c0_20] : memref<18x18x8xf32, #tpu.memory_space<vmem>>, vector<16x16x8xf32>
    %20 = vector.shape_cast %19 : vector<16x16x8xf32> to vector<256x8xf32>
    %c1_21 = arith.constant 1 : index
    %c0_22 = arith.constant 0 : index
    %c0_23 = arith.constant 0 : index
    %21 = vector.load %arg9[%c1_21, %c0_22, %c0_23] : memref<18x18x8xf32, #tpu.memory_space<vmem>>, vector<16x16x8xf32>
    %22 = vector.shape_cast %21 : vector<16x16x8xf32> to vector<256x8xf32>
    %c1_24 = arith.constant 1 : index
    %c1_25 = arith.constant 1 : index
    %c0_26 = arith.constant 0 : index
    %23 = vector.load %arg9[%c1_24, %c1_25, %c0_26] : memref<18x18x8xf32, #tpu.memory_space<vmem>>, vector<16x16x8xf32>
    %24 = vector.shape_cast %23 : vector<16x16x8xf32> to vector<256x8xf32>
    %c1_27 = arith.constant 1 : index
    %c2_28 = arith.constant 2 : index
    %c0_29 = arith.constant 0 : index
    %25 = vector.load %arg9[%c1_27, %c2_28, %c0_29] : memref<18x18x8xf32, #tpu.memory_space<vmem>>, vector<16x16x8xf32>
    %26 = vector.shape_cast %25 : vector<16x16x8xf32> to vector<256x8xf32>
    %c2_30 = arith.constant 2 : index
    %c0_31 = arith.constant 0 : index
    %c0_32 = arith.constant 0 : index
    %27 = vector.load %arg9[%c2_30, %c0_31, %c0_32] : memref<18x18x8xf32, #tpu.memory_space<vmem>>, vector<16x16x8xf32>
    %28 = vector.shape_cast %27 : vector<16x16x8xf32> to vector<256x8xf32>
    %c2_33 = arith.constant 2 : index
    %c1_34 = arith.constant 1 : index
    %c0_35 = arith.constant 0 : index
    %29 = vector.load %arg9[%c2_33, %c1_34, %c0_35] : memref<18x18x8xf32, #tpu.memory_space<vmem>>, vector<16x16x8xf32>
    %30 = vector.shape_cast %29 : vector<16x16x8xf32> to vector<256x8xf32>
    %c2_36 = arith.constant 2 : index
    %c2_37 = arith.constant 2 : index
    %c0_38 = arith.constant 0 : index
    %31 = vector.load %arg9[%c2_36, %c2_37, %c0_38] : memref<18x18x8xf32, #tpu.memory_space<vmem>>, vector<16x16x8xf32>
    %32 = vector.shape_cast %31 : vector<16x16x8xf32> to vector<256x8xf32>
    %cst_39 = arith.constant 0.000000e+00 : f32
    %33 = vector.broadcast %cst_39 : f32 to vector<256x56xf32>
    %34 = tpu.concatenate %16, %18, %20, %22, %24, %26, %28, %30, %32, %33 in 1 : vector<256x8xf32>, vector<256x8xf32>, vector<256x8xf32>, vector<256x8xf32>, vector<256x8xf32>, vector<256x8xf32>, vector<256x8xf32>, vector<256x8xf32>, vector<256x8xf32>, vector<256x56xf32> -> vector<256x128xf32>
    %c0_40 = arith.constant 0 : index
    %c0_41 = arith.constant 0 : index
    %35 = vector.load %arg4[%c0_40, %c0_41] : memref<128x8xf32, #tpu.memory_space<vmem>>, vector<128x8xf32>
    %cst_42 = arith.constant dense<0.000000e+00> : vector<256x8xf32>
    %36 = tpu.matmul %34, %35, %cst_42 {dimension_numbers = #tpu.dot_dimension_numbers<[1], [0], [0], [1], [0, 0, 1, 1], [], []>} : vector<256x128xf32>, vector<128x8xf32>, vector<256x8xf32> -> vector<256x8xf32>
    %c0_43 = arith.constant 0 : index
    %c0_44 = arith.constant 0 : index
    %37 = vector.load %arg5[%c0_43, %c0_44] : memref<1x8xf32, #tpu.memory_space<vmem>>, vector<1x8xf32>
    %38 = vector.broadcast %37 : vector<1x8xf32> to vector<256x8xf32>
    %39 = arith.addf %36, %38 : vector<256x8xf32>
    %cst_45 = arith.constant 1.000000e+00 : f32
    %40 = vector.broadcast %cst_45 : f32 to vector<256x8xf32>
    %41 = arith.cmpf oge, %39, %40 : vector<256x8xf32>
    %42 = arith.extui %41 : vector<256x8xi1> to vector<256x8xi32>
    %43 = arith.sitofp %42 : vector<256x8xi32> to vector<256x8xf32>
    %c0_46 = arith.constant 0 : index
    %c0_47 = arith.constant 0 : index
    %44 = vector.load %arg6[%c0_46, %c0_47] : memref<8x32xf32, #tpu.memory_space<vmem>>, vector<8x32xf32>
    %cst_48 = arith.constant dense<0.000000e+00> : vector<256x32xf32>
    %45 = tpu.matmul %43, %44, %cst_48 {dimension_numbers = #tpu.dot_dimension_numbers<[1], [0], [0], [1], [0, 0, 1, 1], [], []>} : vector<256x8xf32>, vector<8x32xf32>, vector<256x32xf32> -> vector<256x32xf32>
    %c0_49 = arith.constant 0 : index
    %c0_50 = arith.constant 0 : index
    %46 = vector.load %arg7[%c0_49, %c0_50] : memref<1x32xf32, #tpu.memory_space<vmem>>, vector<1x32xf32>
    %47 = vector.broadcast %46 : vector<1x32xf32> to vector<256x32xf32>
    %48 = arith.addf %45, %47 : vector<256x32xf32>
    %cst_51 = arith.constant 1.000000e+00 : f32
    %49 = vector.broadcast %cst_51 : f32 to vector<256x32xf32>
    %50 = arith.cmpf oge, %48, %49 : vector<256x32xf32>
    %51 = arith.extui %50 : vector<256x32xi1> to vector<256x32xi32>
    %52 = arith.sitofp %51 : vector<256x32xi32> to vector<256x32xf32>
    %c0_52 = arith.constant 0 : index
    %c0_53 = arith.constant 0 : index
    %c0_54 = arith.constant 0 : index
    %53 = vector.load %arg1[%c0_52, %c0_53, %c0_54] : memref<1x256x32xf32, #tpu.memory_space<vmem>>, vector<1x256x32xf32>
    %54 = vector.shape_cast %53 : vector<1x256x32xf32> to vector<256x32xf32>
    %55 = arith.addf %52, %54 : vector<256x32xf32>
    %c0_55 = arith.constant 0 : index
    %c0_56 = arith.constant 0 : index
    %c0_57 = arith.constant 0 : index
    %56 = vector.load %arg8[%c0_55, %c0_56, %c0_57] : memref<1x256x32xf32, #tpu.memory_space<vmem>>, vector<1x256x32xf32>
    %57 = vector.shape_cast %56 : vector<1x256x32xf32> to vector<256x32xf32>
    %58 = vector.shape_cast %55 : vector<256x32xf32> to vector<1x256x32xf32>
    tpu.vector_store %arg8[%c0_55, %c0_56, %c0_57], %58 {strides = array<i32>} : memref<1x256x32xf32, #tpu.memory_space<vmem>>, vector<1x256x32xf32>,
    return
  }
  func.func @transform_0(%arg0: i32) -> (i32, i32, i32) {
    %c0_i32 = arith.constant 0 : i32
    %c0_i32_0 = arith.constant 0 : i32
    %c0_i32_1 = arith.constant 0 : i32
    return %arg0, %c0_i32, %c0_i32_0 : i32, i32, i32
  }
  func.func @transform_1(%arg0: i32) -> (i32, i32) {
    %c0_i32 = arith.constant 0 : i32
    %c0_i32_0 = arith.constant 0 : i32
    %c0_i32_1 = arith.constant 0 : i32
    return %c0_i32, %c0_i32_0 : i32, i32
  }
  func.func @transform_2(%arg0: i32) -> (i32, i32) {
    %c0_i32 = arith.constant 0 : i32
    %c0_i32_0 = arith.constant 0 : i32
    %c0_i32_1 = arith.constant 0 : i32
    return %c0_i32, %c0_i32_0 : i32, i32
  }
  func.func @transform_3(%arg0: i32) -> (i32, i32) {
    %c0_i32 = arith.constant 0 : i32
    %c0_i32_0 = arith.constant 0 : i32
    %c0_i32_1 = arith.constant 0 : i32
    return %c0_i32, %c0_i32_0 : i32, i32
  }
  func.func @transform_4(%arg0: i32) -> (i32, i32) {
    %c0_i32 = arith.constant 0 : i32
    %c0_i32_0 = arith.constant 0 : i32
    %c0_i32_1 = arith.constant 0 : i32
    return %c0_i32, %c0_i32_0 : i32, i32
  }
  func.func @transform_5(%arg0: i32) -> (i32, i32) {
    %c0_i32 = arith.constant 0 : i32
    %c0_i32_0 = arith.constant 0 : i32
    %c0_i32_1 = arith.constant 0 : i32
    return %c0_i32, %c0_i32_0 : i32, i32
  }
  func.func @transform_6(%arg0: i32) -> (i32, i32) {
    %c0_i32 = arith.constant 0 : i32
    %c0_i32_0 = arith.constant 0 : i32
    %c0_i32_1 = arith.constant 0 : i32
    return %c0_i32, %c0_i32_0 : i32, i32
  }
  func.func @transform_7(%arg0: i32) -> (i32, i32, i32) {
    %c0_i32 = arith.constant 0 : i32
    %c0_i32_0 = arith.constant 0 : i32
    %c0_i32_1 = arith.constant 0 : i32
    return %arg0, %c0_i32, %c0_i32_0 : i32, i32, i32
  }
}

</mosaic_0001>

<bundles_post_ra>
// kernel: tpu_custom_call.1
= control target key start
LH: loop header
LB: loop body
LE: loop exit
PB: predicated region body
PF: predicated region fallthrough
CT: control target
= control target key end

     0   :  { %s3322_s24 = smov 0   ;;  %s5218_s0 = inlined_call_operand.vmem [shape: f32[2,256,32], index: 0, kind: input, shape index: {}]   ;;  %s5219_s1 = inlined_call_operand.vmem [shape: f32[32,8], index: 1, kind: input, shape index: {}]   ;;  %s5220_s2 = inlined_call_operand.vmem [shape: f32[1,8], index: 2, kind: input, shape index: {}]   ;;  %s5221_s3 = inlined_call_operand.vmem [shape: f32[128,8], index: 3, kind: input, shape index: {}]   ;;  %s5222_s4 = inlined_call_operand.vmem [shape: f32[1,8], index: 4, kind: input, shape index: {}]   ;;  %s5223_s5 = inlined_call_operand.vmem [shape: f32[8,32], index: 5, kind: input, shape index: {}]   ;;  %s5224_s6 = inlined_call_operand.vmem [shape: f32[1,32], index: 6, kind: input, shape index: {}]   ;;  %s5225_s7 = inlined_call_operand.vmem [shape: f32[2,256,32], index: 7, kind: output, shape index: {}]  }
   0x1 LB: > { %s3012_s25 = sadd.s32 4294967295, %s3271_s24   ;;  %p3016_p0 = scmp.ge.s32.totalorder %s3271_s24, 1  ;;  %s3271_s24 = sphi %s3322_s24, %s17_s24  }
   0x2   : > { %p237_p1 = scmp.lt.s32.totalorder %s3271_s24, 3 }
   0x4   : > { %p238_p2 = pnand %p3016_p0, %p237_p1 }
   0x6   : > { %241 = sbr.rel (%p238_p2) target bundleno = 1223 (0x4c7), region = 48 }
   0xb   : > { %v314_v0 = vld [vmem:[%s5219_s1 + $0x18] sm:$0xff]  ;;  %v313_v1 = vld [vmem:[%s5219_s1 + $0x10] sm:$0xff]  ;;  %p269_p3 = scmp.lt.s32.totalorder %s3012_s25, 1  ;;  %v312_v2 = vld [vmem:[%s5219_s1 + $0x8] sm:$0xff]  ;;  %vm319_vm0 = vcmask 261120   ;;  %vm625_vm1 = vcmask 64512  }
   0xc   : > { %428 = vmatpush.msra.mxu0 %v314_v0  ;;  %3217 = vmatpush.msra.mxu3 %v314_v0  ;;  %v311_v3 = vld [vmem:[%s5219_s1] sm:$0xff]  ;;  %v5226_v20 = vmov 0.0   ;;  %s3274_s15 = smov 8   ;;  %s3275_s16 = smov 16   ;;  %vm628_vm2 = vcmask 58368  }
   0xd   : > { %s5320_s25 = smov (!%p269_p3, %s3012_s25), 1  ;;  %626 = vst.msk [vmem:[#allocation2] sm:$0xff] %vm625_vm1, %v5226_v20  ;;  %v3483_v28 = vld [vmem:[%s5220_s2] ss:$0 sm:$0xff]  ;;  %s3276_s19 = smov 32  }
   0xe   : > { %429 = vmatpush.msra.mxu0 %v313_v1  ;;  %3218 = vmatpush.msra.mxu3 %v313_v1  ;;  %s3215_s11 = sshll.u32 %s5320_s25, 8  ;;  %627 = vst.msk [vmem:[#allocation2 + $0x8] sm:$0xff] %vm625_vm1, %v5226_v20  ;;  %s3277_s20 = smov 24  }
   0xf   : > { %s3350_s14 = scalar_lea.vmem %s5218_s0, %s3215_s11  ;;  %630 = vst.msk [vmem:[#allocation2 + $0x18] sm:$0xff] %vm625_vm1, %v5226_v20  ;;  %s3278_s21 = smov 40  }
  0x10   : > { %430 = vmatpush.msra.mxu0 %v312_v2  ;;  %3219 = vmatpush.msra.mxu3 %v312_v2  ;;  %v279_v4 = vld [vmem:[%s3350_s14] sm:$0xff]  ;;  %v304_v5 = vld [vmem:[%s3350_s14 + $0xc8] sm:$0xff]  ;;  %v305_v7 = vld [vmem:[%s3350_s14 + $0xd0] sm:$0xff]  ;;  %631 = vst.msk [vmem:[#allocation2 + $0x20] sm:$0xff] %vm625_vm1, %v5226_v20  ;;  %s3279_s22 = smov 56   ;;  %s3280_s23 = smov 48  }
  0x11   : > { %v280_v6 = vld [vmem:[%s3350_s14 + $0x8] sm:$0xff]  ;;  %v281_v8 = vld [vmem:[%s3350_s14 + $0x10] sm:$0xff]  ;;  %v306_v9 = vld [vmem:[%s3350_s14 + $0xd8] sm:$0xff]  ;;  %633 = vst.msk [vmem:[#allocation2 + $0x30] sm:$0xff] %vm625_vm1, %v5226_v20  ;;  %s3281_s26 = smov 64   ;;  %s4437_s9 = scalar_lea.vmem %s5225_s7, %s3215_s11 }
  0x12   : > { %431 = vmatpush.msra.mxu0 %v311_v3  ;;  %3220 = vmatpush.msra.mxu3 %v311_v3  ;;  %v282_v10 = vld [vmem:[%s3350_s14 + $0x18] sm:$0xff]  ;;  %v283_v11 = vld [vmem:[%s3350_s14 + $0x20] sm:$0xff]  ;;  %v284_v12 = vld [vmem:[%s3350_s14 + $0x28] sm:$0xff]  ;;  %634 = vst.msk [vmem:[#allocation2 + $0x38] sm:$0xff] %vm625_vm1, %v5226_v20 }
  0x13   : > { %3021 = vmatmul.msk.f32.vlgmr.msra.gmra.mxu0 %vm319_vm0, %v279_v4  ;;  %3046 = vmatmul.msk.f32.vlgmr.msra.gmra.mxu3 %vm319_vm0, %v304_v5  ;;  %v307_v13 = vld [vmem:[%s3350_s14 + $0xe0] sm:$0xff]  ;;  %v285_v14 = vld [vmem:[%s3350_s14 + $0x30] sm:$0xff]  ;;  %v308_v15 = vld [vmem:[%s3350_s14 + $0xe8] sm:$0xff]  ;;  %636 = vst.msk [vmem:[#allocation2 + $0x48] sm:$0xff] %vm625_vm1, %v5226_v20 }
  0x14   : > { %v286_v16 = vld [vmem:[%s3350_s14 + $0x38] sm:$0xff]  ;;  %v287_v17 = vld [vmem:[%s3350_s14 + $0x40] sm:$0xff]  ;;  %v288_v18 = vld [vmem:[%s3350_s14 + $0x48] sm:$0xff]  ;;  %637 = vst.msk [vmem:[#allocation2 + $0x50] sm:$0xff] %vm625_vm1, %v5226_v20 }
  0x15   : > { %v289_v19 = vld [vmem:[%s3350_s14 + $0x50] sm:$0xff]  ;;  %v290_v21 = vld [vmem:[%s3350_s14 + $0x58] sm:$0xff]  ;;  %v746_v22 = vld [vmem:[#allocation2 + $0x1] sm:$0xff]  ;;  %639 = vst.msk [vmem:[#allocation2 + $0x60] sm:$0xff] %vm625_vm1, %v5226_v20 }
  0x16   : > { %1035 = vrot.lane.b32.xlu0 %v746_v22, %s3274_s15  ;;  %640 = vst.msk [vmem:[#allocation2 + $0x68] sm:$0xff] %vm625_vm1, %v5226_v20  ;;  %v291_v23 = vld [vmem:[%s3350_s14 + $0x60] sm:$0xff]  ;;  %v292_v25 = vld [vmem:[%s3350_s14 + $0x68] sm:$0xff]  ;;  %v293_v26 = vld [vmem:[%s3350_s14 + $0x70] sm:$0xff] }
  0x17   : > { %642 = vst.msk [vmem:[#allocation2 + $0x78] sm:$0xff] %vm625_vm1, %v5226_v20  ;;  %v778_v24 = vld [vmem:[#allocation2 + $0x2] sm:$0xff]  ;;  %v294_v27 = vld [vmem:[%s3350_s14 + $0x78] sm:$0xff]  ;;  %v297_v46 = vld [vmem:[%s3350_s14 + $0x90] sm:$0xff] }
  0x18   : > { %643 = vst.msk [vmem:[#allocation2 + $0x80] sm:$0xff] %vm625_vm1, %v5226_v20  ;;  %1163 = vrot.lane.b32.xlu2 %v778_v24, %s3275_s16  ;;  %v295_v31 = vld [vmem:[%s3350_s14 + $0x80] sm:$0xff]  ;;  %v296_v38 = vld [vmem:[%s3350_s14 + $0x88] sm:$0xff]  ;;  %v298_v56 = vld [vmem:[%s3350_s14 + $0x98] sm:$0xff] }
  0x19   : > { %645 = vst.msk [vmem:[#allocation2 + $0x90] sm:$0xff] %vm625_vm1, %v5226_v20  ;;  %v299_v0 = vld [vmem:[%s3350_s14 + $0xa0] sm:$0xff] }
  0x1a   : > { %646 = vst.msk [vmem:[#allocation2 + $0x98] sm:$0xff] %vm625_vm1, %v5226_v20 }
  0x1b   : > { %3022 = vmatmul.msk.f32.gmra.mxu0 %vm319_vm0, %v280_v6  ;;  %3047 = vmatmul.msk.f32.gmra.mxu3 %vm319_vm0, %v305_v7  ;;  %648 = vst.msk [vmem:[#allocation2 + $0xa8] sm:$0xff] %vm625_vm1, %v5226_v20  ;;  %v300_v6 = vld [vmem:[%s3350_s14 + $0xa8] sm:$0xff] }
  0x1c   : > { %649 = vst.msk [vmem:[#allocation2 + $0xb0] sm:$0xff] %vm625_vm1, %v5226_v20 }
  0x1d   : > { %651 = vst.msk [vmem:[#allocation2 + $0xc0] sm:$0xff] %vm625_vm1, %v5226_v20 }
  0x1e   : > { %652 = vst.msk [vmem:[#allocation2 + $0xc8] sm:$0xff] %vm625_vm1, %v5226_v20 }
  0x1f   : > { %654 = vst.msk [vmem:[#allocation2 + $0xd8] sm:$0xff] %vm625_vm1, %v5226_v20 }
  0x20   : > { %655 = vst.msk [vmem:[#allocation2 + $0xe0] sm:$0xff] %vm625_vm1, %v5226_v20 }
  0x21   : > { %657 = vst.msk [vmem:[#allocation2 + $0xf0] sm:$0xff] %vm625_vm1, %v5226_v20 }
  0x22   : > { %658 = vst.msk [vmem:[#allocation2 + $0xf8] sm:$0xff] %vm625_vm1, %v5226_v20 }
  0x23   : > { %3023 = vmatmul.msk.f32.gmra.mxu0 %vm319_vm0, %v281_v8  ;;  %3048 = vmatmul.msk.f32.gmra.mxu3 %vm319_vm0, %v306_v9  ;;  %660 = vst.msk [vmem:[#allocation2 + $0x108] sm:$0xff] %vm625_vm1, %v5226_v20 }
  0x24   : > { %661 = vst.msk [vmem:[#allocation2 + $0x110] sm:$0xff] %vm625_vm1, %v5226_v20 }
  0x25   : > { %663 = vst.msk [vmem:[#allocation2 + $0x120] sm:$0xff] %vm625_vm1, %v5226_v20 }
  0x26   : > { %664 = vst.msk [vmem:[#allocation2 + $0x128] sm:$0xff] %vm625_vm1, %v5226_v20 }
  0x27   : > { %666 = vst.msk [vmem:[#allocation2 + $0x138] sm:$0xff] %vm625_vm1, %v5226_v20 }
  0x28   : > { %667 = vst.msk [vmem:[#allocation2 + $0x140] sm:$0xff] %vm625_vm1, %v5226_v20 }
  0x29   : > { %669 = vst.msk [vmem:[#allocation2 + $0x150] sm:$0xff] %vm625_vm1, %v5226_v20 }
  0x2a   : > { %670 = vst.msk [vmem:[#allocation2 + $0x158] sm:$0xff] %vm625_vm1, %v5226_v20 }
  0x2b   : > { %3024 = vmatmul.msk.f32.gmra.mxu0 %vm319_vm0, %v282_v10  ;;  %3049 = vmatmul.msk.f32.gmra.mxu3 %vm319_vm0, %v307_v13  ;;  %672 = vst.msk [vmem:[#allocation2 + $0x168] sm:$0xff] %vm625_vm1, %v5226_v20  ;;  %v301_v13 = vld [vmem:[%s3350_s14 + $0xb0] sm:$0xff] }
  0x2c   : > { %673 = vst.msk [vmem:[#allocation2 + $0x170] sm:$0xff] %vm625_vm1, %v5226_v20 }
  0x2d   : > { %675 = vst.msk [vmem:[#allocation2 + $0x180] sm:$0xff] %vm625_vm1, %v5226_v20 }
  0x2e   : > { %676 = vst.msk [vmem:[#allocation2 + $0x188] sm:$0xff] %vm625_vm1, %v5226_v20 }
  0x2f   : > { %678 = vst.msk [vmem:[#allocation2 + $0x198] sm:$0xff] %vm625_vm1, %v5226_v20 }
  0x30   : > { %679 = vst.msk [vmem:[#allocation2 + $0x1a0] sm:$0xff] %vm625_vm1, %v5226_v20 }
  0x31   : > { %629 = vst.msk [vmem:[#allocation2 + $0x10] sm:$0x3] %vm628_vm2, %v5226_v20 }
  0x32   : > { %632 = vst.msk [vmem:[#allocation2 + $0x28] sm:$0x3] %vm628_vm2, %v5226_v20 }
  0x33   : > { %3025 = vmatmul.msk.f32.gmra.mxu0 %vm319_vm0, %v283_v11  ;;  %3050 = vmatmul.msk.f32.gmra.mxu3 %vm319_vm0, %v308_v15  ;;  %635 = vst.msk [vmem:[#allocation2 + $0x40] sm:$0x3] %vm628_vm2, %v5226_v20 }
  0x34   : > { %638 = vst.msk [vmem:[#allocation2 + $0x58] sm:$0x3] %vm628_vm2, %v5226_v20 }
  0x35   : > { %641 = vst.msk [vmem:[#allocation2 + $0x70] sm:$0x3] %vm628_vm2, %v5226_v20 }
  0x36   : > { %644 = vst.msk [vmem:[#allocation2 + $0x88] sm:$0x3] %vm628_vm2, %v5226_v20 }
  0x37   : > { %647 = vst.msk [vmem:[#allocation2 + $0xa0] sm:$0x3] %vm628_vm2, %v5226_v20 }
  0x38   : > { %v747_v29 = vld [vmem:[#allocation2 + $0x9] sm:$0xff]  ;;  %650 = vst.msk [vmem:[#allocation2 + $0xb8] sm:$0x3] %vm628_vm2, %v5226_v20 }
  0x39   : > { %1037 = vrot.lane.b32.xlu0 %v747_v29, %s3274_s15  ;;  %653 = vst.msk [vmem:[#allocation2 + $0xd0] sm:$0x3] %vm628_vm2, %v5226_v20  ;;  %v779_v34 = vld [vmem:[#allocation2 + $0xa] sm:$0xff] }
  0x3a   : > { %656 = vst.msk [vmem:[#allocation2 + $0xe8] sm:$0x3] %vm628_vm2, %v5226_v20 }
  0x3b   : > { %3026 = vmatmul.msk.f32.gmra.mxu0 %vm319_vm0, %v284_v12  ;;  %659 = vst.msk [vmem:[#allocation2 + $0x100] sm:$0x3] %vm628_vm2, %v5226_v20 }
  0x3c   : > { %662 = vst.msk [vmem:[#allocation2 + $0x118] sm:$0x3] %vm628_vm2, %v5226_v20 }
  0x3d   : > { %665 = vst.msk [vmem:[#allocation2 + $0x130] sm:$0x3] %vm628_vm2, %v5226_v20 }
  0x3e   : > { %668 = vst.msk [vmem:[#allocation2 + $0x148] sm:$0x3] %vm628_vm2, %v5226_v20 }
  0x3f   : > { %671 = vst.msk [vmem:[#allocation2 + $0x160] sm:$0x3] %vm628_vm2, %v5226_v20 }
  0x40   : > { %674 = vst.msk [vmem:[#allocation2 + $0x178] sm:$0x3] %vm628_vm2, %v5226_v20 }
  0x41   : > { %1165 = vrot.lane.b32.xlu0 %v779_v34, %s3275_s16  ;;  %677 = vst.msk [vmem:[#allocation2 + $0x190] sm:$0x3] %vm628_vm2, %v5226_v20 }
  0x42   : > { %680 = vst.msk [vmem:[#allocation2 + $0x1a8] sm:$0x3] %vm628_vm2, %v5226_v20 }
  0x43   : > { %3027 = vmatmul.msk.f32.gmra.mxu0 %vm319_vm0, %v285_v14 }
  0x4b   : > { %3028 = vmatmul.msk.f32.gmra.mxu0 %vm319_vm0, %v286_v16 }
  0x53   : > { %3029 = vmatmul.msk.f32.gmra.mxu0 %vm319_vm0, %v287_v17 }
  0x5b   : > { %3030 = vmatmul.msk.f32.gmra.mxu0 %vm319_vm0, %v288_v18 }
  0x63   : > { %3031 = vmatmul.msk.f32.gmra.mxu0 %vm319_vm0, %v289_v19 }
  0x6b   : > { %3032 = vmatmul.msk.f32.gmra.mxu0 %vm319_vm0, %v290_v21  ;;  %v302_v21 = vld [vmem:[%s3350_s14 + $0xb8] sm:$0xff] }
  0x73   : > { %3033 = vmatmul.msk.f32.gmra.mxu0 %vm319_vm0, %v291_v23 }
  0x7b   : > { %3034 = vmatmul.msk.f32.gmra.mxu0 %vm319_vm0, %v292_v25 }
  0x83   : > { %3035 = vmatmul.msk.f32.gmra.mxu0 %vm319_vm0, %v293_v26 }
  0x8b   : > { %3036 = vmatmul.msk.f32.gmra.mxu0 %vm319_vm0, %v294_v27 }
  0x90   : > { %v433_v30 = vpop.f32.mrf.mxu0 }
  0x91   : > { %v434_v32 = vadd.f32 %v3483_v28, %v433_v30  ;;  %v303_v30 = vld [vmem:[%s3350_s14 + $0xc0] sm:$0xff] }
  0x93   : > { %vm529_vm3 = vcmp.ge.f32.partialorder %v434_v32, 1.0  ;;  %3037 = vmatmul.msk.f32.gmra.mxu0 %vm319_vm0, %v295_v31 }
  0x94   : > { %v3053_v33 = vsel %vm529_vm3, 1.0, %v5226_v20 }
  0x95   : > { %682 = vst.msk [vmem:[#allocation2 + $0x19] sm:$0xff] %vm625_vm1, %v3053_v33 }
  0x96   : > { %v508_v35 = vpop.f32.mrf.mxu3 }
  0x97   : > { %v509_v36 = vadd.f32 %v3483_v28, %v508_v35 }
  0x98   : > { %v436_v37 = vpop.f32.mrf.mxu0 }
  0x99   : > { %vm554_vm4 = vcmp.ge.f32.partialorder %v509_v36, 1.0  ;;  %v437_v39 = vadd.f32 %v3483_v28, %v436_v37 }
  0x9a   : > { %v3078_v40 = vsel %vm554_vm4, 1.0, %v5226_v20 }
  0x9b   : > { %707 = vst.msk [vmem:[#allocation2 + $0x141] sm:$0xff] %vm625_vm1, %v3078_v40  ;;  %vm530_vm5 = vcmp.ge.f32.partialorder %v437_v39, 1.0  ;;  %3038 = vmatmul.msk.f32.gmra.mxu0 %vm319_vm0, %v296_v38 }
  0x9c   : > { %v3054_v41 = vsel %vm530_vm5, 1.0, %v5226_v20  ;;  %v842_v42 = vld [vmem:[#allocation2 + $0x19] sm:$0xff] }
  0x9d   : > { %683 = vst.msk [vmem:[#allocation2 + $0x21] sm:$0xff] %vm625_vm1, %v3054_v41  ;;  %1419 = vrot.lane.b32.xlu2 %v842_v42, %s3276_s19  ;;  %1039 = vrot.lane.b32.xlu1 %v842_v42, %s3274_s15  ;;  %v3534_v52 = vld [vmem:[#allocation2 + $0x18] sm:$0xff] }
  0x9e   : > { %v511_v43 = vpop.f32.mrf.mxu3 }
  0x9f   : > { %v512_v44 = vadd.f32 %v3483_v28, %v511_v43 }
  0xa0   : > { %v439_v45 = vpop.f32.mrf.mxu0 }
  0xa1   : > { %v440_v47 = vadd.f32 %v3483_v28, %v439_v45  ;;  %vm555_vm6 = vcmp.ge.f32.partialorder %v512_v44, 1.0 }
  0xa2   : > { %v773_v48 = vld [vmem:[#allocation2 + $0x141] sm:$0xff]  ;;  %v3079_v50 = vsel %vm555_vm6, 1.0, %v5226_v20 }
  0xa3   : > { %v805_v49 = vld [vmem:[#allocation2 + $0x142] sm:$0xff]  ;;  %vm531_vm7 = vcmp.ge.f32.partialorder %v440_v47, 1.0  ;;  %1089 = vrot.lane.b32.xlu0 %v773_v48, %s3274_s15  ;;  %3039 = vmatmul.msk.f32.gmra.mxu0 %vm319_vm0, %v297_v46  ;;  %708 = vst.msk [vmem:[#allocation2 + $0x151] sm:$0xff] %vm625_vm1, %v3079_v50  ;;  %v3630_v48 = vpop.permute.xlu2 %1163 }
  0xa4   : > { %v3055_v51 = vsel %vm531_vm7, 1.0, %v5226_v20  ;;  %v874_v58 = vld [vmem:[#allocation2 + $0x1a] sm:$0xff]  ;;  %v781_v59 = vld [vmem:[#allocation2 + $0x22] sm:$0xff] }
  0xa5   : > { %684 = vst.msk [vmem:[#allocation2 + $0x31] sm:$0xff] %vm625_vm1, %v3055_v51  ;;  %1217 = vrot.lane.b32.xlu2 %v805_v49, %s3275_s16  ;;  %1291 = vrot.lane.b32.xlu1 %v3534_v52, %s3277_s20  ;;  %v749_v60 = vld [vmem:[#allocation2 + $0x21] sm:$0xff] }
  0xa6   : > { %v514_v53 = vpop.f32.mrf.mxu3  ;;  %v3559_v4 = vld [vmem:[#allocation2 + $0x20] sm:$0xff] }
  0xa7   : > { %v515_v54 = vadd.f32 %v3483_v28, %v514_v53 }
  0xa8   : > { %v442_v55 = vpop.f32.mrf.mxu0 }
  0xa9   : > { %v443_v57 = vadd.f32 %v3483_v28, %v442_v55  ;;  %vm556_vm8 = vcmp.ge.f32.partialorder %v515_v54, 1.0 }
  0xaa   : > { %v3080_v61 = vsel %vm556_vm8, 1.0, %v5226_v20  ;;  %v774_v16 = vld [vmem:[#allocation2 + $0x151] sm:$0xff] }
  0xab   : > { %vm532_vm9 = vcmp.ge.f32.partialorder %v443_v57, 1.0  ;;  %3040 = vmatmul.msk.f32.gmra.mxu0 %vm319_vm0, %v298_v56  ;;  %1547 = vrot.lane.b32.xlu0 %v874_v58, %s3278_s21  ;;  %709 = vst.msk [vmem:[#allocation2 + $0x159] sm:$0xff] %vm625_vm1, %v3080_v61  ;;  %v3644_v56 = vpop.permute.xlu0 %1035 }
  0xac   : > { %v3056_v62 = vsel %vm532_vm9, 1.0, %v5226_v20  ;;  %v3552_v1 = vld [vmem:[#allocation2 + $0x30] sm:$0xff] }
  0xad   : > { %685 = vst.msk [vmem:[#allocation2 + $0x39] sm:$0xff] %vm625_vm1, %v3056_v62  ;;  %1169 = vrot.lane.b32.xlu2 %v781_v59, %s3275_s16  ;;  %1041 = vrot.lane.b32.xlu1 %v749_v60, %s3274_s15  ;;  %v844_v7 = vld [vmem:[#allocation2 + $0x31] sm:$0xff] }
  0xae   : > { %v517_v10 = vpop.f32.mrf.mxu3 }
  0xaf   : > { %v518_v11 = vadd.f32 %v3483_v28, %v517_v10 }
  0xb0   : > { %v445_v63 = vpop.f32.mrf.mxu0 }
  0xb1   : > { %v446_v2 = vadd.f32 %v3483_v28, %v445_v63  ;;  %vm557_vm12 = vcmp.ge.f32.partialorder %v518_v11, 1.0 }
  0xb2   : > { %v806_v14 = vld [vmem:[#allocation2 + $0x152] sm:$0xff]  ;;  %v3081_v17 = vsel %vm557_vm12, 1.0, %v5226_v20  ;;  %v807_v34 = vld [vmem:[#allocation2 + $0x15a] sm:$0xff] }
  0xb3   : > { %vm533_vm10 = vcmp.ge.f32.partialorder %v446_v2, 1.0  ;;  %3041 = vmatmul.msk.f32.gmra.mxu0 %vm319_vm0, %v299_v0  ;;  %1295 = vrot.lane.b32.xlu0 %v3552_v1, %s3277_s20  ;;  %710 = vst.msk [vmem:[#allocation2 + $0x169] sm:$0xff] %vm625_vm1, %v3081_v17  ;;  %v775_v33 = vld [vmem:[#allocation2 + $0x159] sm:$0xff]  ;;  %v3656_v0 = vpop.permute.xlu0 %1037 }
  0xb4   : > { %v3057_v3 = vsel %vm533_vm10, 1.0, %v5226_v20  ;;  %v3586_v23 = vld [vmem:[#allocation2 + $0x32] sm:$0xff]  ;;  %v783_v40 = vld [vmem:[#allocation2 + $0x3a] sm:$0xff] }
  0xb5   : > { %686 = vst.msk [vmem:[#allocation2 + $0x49] sm:$0xff] %vm625_vm1, %v3057_v3  ;;  %1293 = vrot.lane.b32.xlu2 %v3559_v4, %s3277_s20  ;;  %1167 = vrot.lane.b32.xlu1 %v874_v58, %s3275_s16  ;;  %v3609_v37 = vld [vmem:[#allocation2 + $0x38] sm:$0xff]  ;;  %v2334_v17 = vld [vmem:[%s5221_s3 + $0x60] sm:$0xff] }
  0xb6   : > { %v520_v24 = vpop.f32.mrf.mxu3  ;;  %v751_v39 = vld [vmem:[#allocation2 + $0x39] sm:$0xff] }
  0xb7   : > { %v521_v26 = vadd.f32 %v3483_v28, %v520_v24 }
  0xb8   : > { %v448_v5 = vpop.f32.mrf.mxu0 }
  0xb9   : > { %v449_v8 = vadd.f32 %v3483_v28, %v448_v5  ;;  %vm558_vm15 = vcmp.ge.f32.partialorder %v521_v26, 1.0 }
  0xba   : > { %v3082_v27 = vsel %vm558_vm15, 1.0, %v5226_v20  ;;  %v776_v45 = vld [vmem:[#allocation2 + $0x169] sm:$0xff]  ;;  %vm2059_vm15 = vcmask 130048  }
  0xbb   : > { %vm534_vm11 = vcmp.ge.f32.partialorder %v449_v8, 1.0  ;;  %3042 = vmatmul.msk.f32.gmra.mxu0 %vm319_vm0, %v300_v6  ;;  %1423 = vrot.lane.b32.xlu0 %v844_v7, %s3276_s19  ;;  %711 = vst.msk [vmem:[#allocation2 + $0x171] sm:$0xff] %vm625_vm1, %v3082_v27  ;;  %v2331_v27 = vld [vmem:[%s5221_s3 + $0x48] sm:$0xff] }
  0xbc   : > { %v3058_v9 = vsel %vm534_vm11, 1.0, %v5226_v20  ;;  %v752_v50 = vld [vmem:[#allocation2 + $0x49] sm:$0xff] }
  0xbd   : > { %687 = vst.msk [vmem:[#allocation2 + $0x51] sm:$0xff] %vm625_vm1, %v3058_v9  ;;  %1549 = vrot.lane.b32.xlu2 %v781_v59, %s3278_s21  ;;  %1421 = vrot.lane.b32.xlu1 %v749_v60, %s3276_s19  ;;  %v3633_v53 = vld [vmem:[#allocation2 + $0x48] sm:$0xff]  ;;  %v2337_v9 = vld [vmem:[%s5221_s3 + $0x78] sm:$0xff] }
  0xbe   : > { %2342 = vmatpush.msra.mxu1 %v2337_v9  ;;  %3221 = vmatpush.msrb.mxu3 %v2337_v9 }
  0xc0   : > { %v451_v12 = vpop.f32.mrf.mxu0 }
  0xc1   : > { %v452_v15 = vadd.f32 %v3483_v28, %v451_v12  ;;  %v2336_v12 = vld [vmem:[%s5221_s3 + $0x70] sm:$0xff] }
  0xc2   : > { %v809_v62 = vld [vmem:[#allocation2 + $0x172] sm:$0xff]  ;;  %v808_v5 = vld [vmem:[#allocation2 + $0x16a] sm:$0xff]  ;;  %2343 = vmatpush.msra.mxu1 %v2336_v12  ;;  %3222 = vmatpush.msrb.mxu3 %v2336_v12 }
  0xc3   : > { %vm535_vm13 = vcmp.ge.f32.partialorder %v452_v15, 1.0  ;;  %3043 = vmatmul.msk.f32.gmra.mxu0 %vm319_vm0, %v301_v13  ;;  %1219 = vrot.lane.b32.xlu0 %v806_v14, %s3275_s16  ;;  %v777_v2 = vld [vmem:[#allocation2 + $0x171] sm:$0xff]  ;;  %v3678_v13 = vpop.permute.xlu0 %1165 }
  0xc4   : > { %v3059_v18 = vsel %vm535_vm13, 1.0, %v5226_v20  ;;  %v3665_v8 = vld [vmem:[#allocation2 + $0x52] sm:$0xff]  ;;  %v784_v15 = vld [vmem:[#allocation2 + $0x4a] sm:$0xff] }
  0xc5   : > { %688 = vst.msk [vmem:[#allocation2 + $0x61] sm:$0xff] %vm625_vm1, %v3059_v18  ;;  %1043 = vrot.lane.b32.xlu2 %v844_v7, %s3274_s15  ;;  %1091 = vrot.lane.b32.xlu1 %v774_v16, %s3274_s15  ;;  %v3671_v11 = vld [vmem:[#allocation2 + $0x51] sm:$0xff]  ;;  %v2335_v16 = vld [vmem:[%s5221_s3 + $0x68] sm:$0xff] }
  0xc6   : > { %2344 = vmatpush.msra.mxu1 %v2335_v16  ;;  %3223 = vmatpush.msrb.mxu3 %v2335_v16  ;;  %v3699_v24 = vld [vmem:[#allocation2 + $0x50] sm:$0xff] }
  0xc8   : > { %v454_v19 = vpop.f32.mrf.mxu0  ;;  %2345 = vmatpush.msra.mxu1 %v2334_v17  ;;  %3224 = vmatpush.msrb.mxu3 %v2334_v17 }
  0xc9   : > { %v455_v22 = vadd.f32 %v3483_v28, %v454_v19 }
  0xcb   : > { %vm536_vm14 = vcmp.ge.f32.partialorder %v455_v22, 1.0  ;;  %3044 = vmatmul.msk.f32.gmra.mxu0 %vm319_vm0, %v302_v21  ;;  %1171 = vrot.lane.b32.xlu0 %v3586_v23, %s3275_s16  ;;  %v2333_v22 = vld [vmem:[%s5221_s3 + $0x58] sm:$0xff] }
  0xcc   : > { %v3060_v25 = vsel %vm536_vm14, 1.0, %v5226_v20  ;;  %2346 = vmatpush.msra.mxu1 %v2333_v22  ;;  %3225 = vmatpush.msrb.mxu3 %v2333_v22 }
  0xcd   : > { %689 = vst.msk [vmem:[#allocation2 + $0x69] sm:$0xff] %vm625_vm1, %v3060_v25  ;;  %1803 = vrot.lane.b32.xlu2 %v844_v7, %s3279_s22  ;;  %1675 = vrot.lane.b32.xlu1 %v3552_v1, %s3280_s23  ;;  %v2332_v25 = vld [vmem:[%s5221_s3 + $0x50] sm:$0xff] }
  0xce   : > { %2347 = vmatpush.msra.mxu1 %v2332_v25  ;;  %3226 = vmatpush.msrb.mxu3 %v2332_v25 }
  0xd0   : > { %v457_v29 = vpop.f32.mrf.mxu0  ;;  %2348 = vmatpush.msra.mxu1 %v2331_v27  ;;  %3227 = vmatpush.msrb.mxu3 %v2331_v27 }
  0xd1   : > { %v458_v31 = vadd.f32 %v3483_v28, %v457_v29 }
  0xd3   : > { %vm537_vm2 = vcmp.ge.f32.partialorder %v458_v31, 1.0  ;;  %3045 = vmatmul.msk.f32.gmra.mxu0 %vm319_vm0, %v303_v30  ;;  %1931 = vrot.lane.b32.xlu0 %v3586_v23, %s3281_s26  ;;  %v2330_v30 = vld [vmem:[%s5221_s3 + $0x40] sm:$0xff] }
  0xd4   : > { %v3061_v32 = vsel %vm537_vm2, 1.0, %v5226_v20  ;;  %2349 = vmatpush.msra.mxu1 %v2330_v30  ;;  %3228 = vmatpush.msrb.mxu3 %v2330_v30  ;;  %v755_v9 = vld [vmem:[#allocation2 + $0x69] sm:$0xff] }
  0xd5   : > { %690 = vst.msk [vmem:[#allocation2 + $0x79] sm:$0xff] %vm625_vm1, %v3061_v32  ;;  %1093 = vrot.lane.b32.xlu2 %v775_v33, %s3274_s15  ;;  %1221 = vrot.lane.b32.xlu1 %v807_v34, %s3275_s16  ;;  %v2329_v34 = vld [vmem:[%s5221_s3 + $0x38] sm:$0xff]  ;;  %v3813_v27 = vld [vmem:[#allocation2 + $0x68] sm:$0xff] }
  0xd6   : > { %2350 = vmatpush.msra.mxu1 %v2329_v34  ;;  %3229 = vmatpush.msrb.mxu3 %v2329_v34  ;;  %v786_v30 = vld [vmem:[#allocation2 + $0x62] sm:$0xff] }
  0xd8   : > { %v460_v35 = vpop.f32.mrf.mxu0 }
  0xd9   : > { %v461_v36 = vadd.f32 %v3483_v28, %v460_v35 }
  0xdb   : > { %vm538_vm3 = vcmp.ge.f32.partialorder %v461_v36, 1.0  ;;  %1677 = vrot.lane.b32.xlu0 %v3609_v37, %s3280_s23  ;;  %v2328_v36 = vld [vmem:[%s5221_s3 + $0x30] sm:$0xff] }
  0xdc   : > { %v3062_v38 = vsel %vm538_vm3, 1.0, %v5226_v20  ;;  %2351 = vmatpush.msra.mxu1 %v2328_v36  ;;  %3230 = vmatpush.msrb.mxu3 %v2328_v36  ;;  %vm2092_vm3 = vcmask 195584  }
  0xdd   : > { %691 = vst.msk [vmem:[#allocation2 + $0x81] sm:$0xff] %vm625_vm1, %v3062_v38  ;;  %1045 = vrot.lane.b32.xlu2 %v751_v39, %s3274_s15  ;;  %1173 = vrot.lane.b32.xlu1 %v783_v40, %s3275_s16 }
  0xe0   : > { %v463_v41 = vpop.f32.mrf.mxu0 }
  0xe1   : > { %v464_v42 = vadd.f32 %v3483_v28, %v463_v41  ;;  %v2326_v41 = vld [vmem:[%s5221_s3 + $0x20] sm:$0xff] }
  0xe3   : > { %vm539_vm4 = vcmp.ge.f32.partialorder %v464_v42, 1.0  ;;  %1553 = vrot.lane.b32.xlu0 %v783_v40, %s3278_s21 }
  0xe4   : > { %v3063_v43 = vsel %vm539_vm4, 1.0, %v5226_v20  ;;  %vm2157_vm4 = vcmask 326656  }
  0xe5   : > { %692 = vst.msk [vmem:[#allocation2 + $0x91] sm:$0xff] %vm625_vm1, %v3063_v43  ;;  %1933 = vrot.lane.b32.xlu2 %v783_v40, %s3281_s26  ;;  %1297 = vrot.lane.b32.xlu1 %v3609_v37, %s3277_s20 }
  0xe8   : > { %v466_v44 = vpop.f32.mrf.mxu0 }
  0xe9   : > { %v467_v46 = vadd.f32 %v3483_v28, %v466_v44 }
  0xeb   : > { %vm540_vm5 = vcmp.ge.f32.partialorder %v467_v46, 1.0  ;;  %1095 = vrot.lane.b32.xlu0 %v776_v45, %s3274_s15  ;;  %v2325_v45 = vld [vmem:[%s5221_s3 + $0x18] sm:$0xff] }
  0xec   : > { %v3064_v47 = vsel %vm540_vm5, 1.0, %v5226_v20  ;;  %vm2190_vm5 = vcmask 392192  }
  0xed   : > { %693 = vst.msk [vmem:[#allocation2 + $0x99] sm:$0xff] %vm625_vm1, %v3064_v47  ;;  %1425 = vrot.lane.b32.xlu2 %v751_v39, %s3276_s19  ;;  %1805 = vrot.lane.b32.xlu1 %v751_v39, %s3279_s22  ;;  %v2327_v39 = vld [vmem:[%s5221_s3 + $0x28] sm:$0xff] }
  0xee   : > { %2352 = vmatpush.msra.mxu1 %v2327_v39  ;;  %3231 = vmatpush.msrb.mxu3 %v2327_v39  ;;  %v754_v47 = vld [vmem:[#allocation2 + $0x61] sm:$0xff] }
  0xf0   : > { %v469_v49 = vpop.f32.mrf.mxu0  ;;  %2353 = vmatpush.msra.mxu1 %v2326_v41  ;;  %3232 = vmatpush.msrb.mxu3 %v2326_v41 }
  0xf1   : > { %v470_v51 = vadd.f32 %v3483_v28, %v469_v49  ;;  %v2324_v49 = vld [vmem:[%s5221_s3 + $0x10] sm:$0xff] }
  0xf2   : > { %2354 = vmatpush.msra.mxu1 %v2325_v45  ;;  %3233 = vmatpush.msrb.mxu3 %v2325_v45 }
  0xf3   : > { %vm541_vm6 = vcmp.ge.f32.partialorder %v470_v51, 1.0  ;;  %1047 = vrot.lane.b32.xlu0 %v752_v50, %s3274_s15  ;;  %v2323_v51 = vld [vmem:[%s5221_s3 + $0x8] sm:$0xff] }
  0xf4   : > { %v3065_v54 = vsel %vm541_vm6, 1.0, %v5226_v20  ;;  %2355 = vmatpush.msra.mxu1 %v2324_v49  ;;  %3234 = vmatpush.msrb.mxu3 %v2324_v49  ;;  %vm2223_vm6 = vcmask 457728   ;;  %v3845_v49 = vld [vmem:[#allocation2 + $0x78] sm:$0xff] }
  0xf5   : > { %694 = vst.msk [vmem:[#allocation2 + $0xa9] sm:$0xff] %vm625_vm1, %v3065_v54  ;;  %1299 = vrot.lane.b32.xlu2 %v3633_v53, %s3277_s20  ;;  %1551 = vrot.lane.b32.xlu1 %v3586_v23, %s3278_s21 }
  0xf6   : > { %2356 = vmatpush.msra.mxu1 %v2323_v51  ;;  %3235 = vmatpush.msrb.mxu3 %v2323_v51  ;;  %5246 = vst [vmem:[#allocation9_spill] sm:$0xff] %v3845_v49 }
  0xf7   : > { %v3642_v55 = vpop.permute.xlu2 %1419 }
  0xf8   : > { %v472_v57 = vpop.f32.mrf.mxu0 }
  0xf9   : > { %v473_v58 = vadd.f32 %v3483_v28, %v472_v57  ;;  %v2322_v57 = vld [vmem:[%s5221_s3] sm:$0xff] }
  0xfa   : > { %2357 = vmatpush.msra.mxu1 %v2322_v57  ;;  %3236 = vmatpush.msrb.mxu3 %v2322_v57 }
  0xfb   : > { %vm542_vm7 = vcmp.ge.f32.partialorder %v473_v58, 1.0  ;;  %1807 = vrot.lane.b32.xlu0 %v752_v50, %s3279_s22 }
  0xfc   : > { %v3066_v59 = vsel %vm542_vm7, 1.0, %v5226_v20 }
  0xfd   : > { %695 = vst.msk [vmem:[#allocation2 + $0xb1] sm:$0xff] %vm625_vm1, %v3066_v59  ;;  %1679 = vrot.lane.b32.xlu2 %v3633_v53, %s3280_s23  ;;  %1427 = vrot.lane.b32.xlu1 %v752_v50, %s3276_s19 }
  0xff   : > { %v3653_v60 = vpop.permute.xlu2 %1217 }
 0x100   : > { %5240 = vst [vmem:[#allocation3_spill] sm:$0xff] %v3653_v60  ;;  %v475_v61 = vpop.f32.mrf.mxu0 }
 0x101   : > { %v476_v63 = vadd.f32 %v3483_v28, %v475_v61 }
 0x103   : > { %vm543_vm8 = vcmp.ge.f32.partialorder %v476_v63, 1.0  ;;  %1225 = vrot.lane.b32.xlu0 %v809_v62, %s3275_s16  ;;  %v3775_v62 = vld [vmem:[#allocation2 + $0x60] sm:$0xff] }
 0x104   : > { %v3067_v3 = vsel %vm543_vm8, 1.0, %v5226_v20  ;;  %vm2256_vm8 = vcmask 523264  }
 0x105   : > { %696 = vst.msk [vmem:[#allocation2 + $0xc1] sm:$0xff] %vm625_vm1, %v3067_v3  ;;  %1223 = vrot.lane.b32.xlu2 %v808_v5, %s3275_s16  ;;  %1097 = vrot.lane.b32.xlu1 %v777_v2, %s3274_s15 }
 0x107   : > { %v3663_v6 = vpop.permute.xlu2 %1169 }
 0x108   : > { %v478_v7 = vpop.f32.mrf.mxu0 }
 0x109   : > { %v479_v10 = vadd.f32 %v3483_v28, %v478_v7 }
 0x10b   : > { %vm544_vm9 = vcmp.ge.f32.partialorder %v479_v10, 1.0  ;;  %1177 = vrot.lane.b32.xlu0 %v3665_v8, %s3275_s16 }
 0x10c   : > { %v3068_v14 = vsel %vm544_vm9, 1.0, %v5226_v20  ;;  %vm2289_vm9 = vcmask 588800  }
 0x10d   : > { %697 = vst.msk [vmem:[#allocation2 + $0xc9] sm:$0xff] %vm625_vm1, %v3068_v14  ;;  %1175 = vrot.lane.b32.xlu2 %v784_v15, %s3275_s16  ;;  %1049 = vrot.lane.b32.xlu1 %v3671_v11, %s3274_s15 }
 0x10f   : > { %v3691_v18 = vpop.permute.xlu2 %1293  ;;  %v3693_v19 = vpop.permute.xlu1 %1039 }
 0x110   : > { %v481_v21 = vpop.f32.mrf.mxu0 }
 0x111   : > { %v482_v23 = vadd.f32 %v3483_v28, %v481_v21 }
 0x113   : > { %vm545_vm10 = vcmp.ge.f32.partialorder %v482_v23, 1.0  ;;  %1301 = vrot.lane.b32.xlu0 %v3699_v24, %s3277_s20 }
 0x114   : > { %v3069_v26 = vsel %vm545_vm10, 1.0, %v5226_v20 }
 0x115   : > { %698 = vst.msk [vmem:[#allocation2 + $0xd9] sm:$0xff] %vm625_vm1, %v3069_v26  ;;  %v3711_v29 = vpop.permute.xlu0 %1089  ;;  %1809 = vrot.lane.b32.xlu2 %v3671_v11, %s3279_s22  ;;  %1935 = vrot.lane.b32.xlu1 %v784_v15, %s3281_s26 }
 0x116   : > { %5241 = vst [vmem:[#allocation4_spill] sm:$0xff] %v3711_v29 }
 0x117   : > { %v3719_v31 = vpop.permute.xlu2 %1549  ;;  %v3721_v32 = vpop.permute.xlu1 %1291 }
 0x118   : > { %v484_v33 = vpop.f32.mrf.mxu0 }
 0x119   : > { %v485_v35 = vadd.f32 %v3483_v28, %v484_v33 }
 0x11b   : > { %vm546_vm11 = vcmp.ge.f32.partialorder %v485_v35, 1.0  ;;  %1937 = vrot.lane.b32.xlu0 %v3665_v8, %s3281_s26 }
 0x11c   : > { %v3070_v38 = vsel %vm546_vm11, 1.0, %v5226_v20 }
 0x11d   : > { %699 = vst.msk [vmem:[#allocation2 + $0xe1] sm:$0xff] %vm625_vm1, %v3070_v38  ;;  %v3737_v40 = vpop.permute.xlu0 %1547  ;;  %1555 = vrot.lane.b32.xlu2 %v784_v15, %s3278_s21  ;;  %1681 = vrot.lane.b32.xlu1 %v3699_v24, %s3280_s23  ;;  %v714_v15 = vld [vmem:[#allocation2] sm:$0xff] }
 0x11e   : > { %v2027_v22 = vsel %vm625_vm1, %v714_v15, %v3644_v56 }
 0x11f   : > { %v3745_v42 = vpop.permute.xlu2 %1043  ;;  %v3747_v43 = vpop.permute.xlu1 %1041  ;;  %v2060_v25 = vsel %vm2059_vm15, %v2027_v22, %v3630_v48 }
 0x120   : > { %v487_v44 = vpop.f32.mrf.mxu0  ;;  %v2093_v33 = vsel %vm2092_vm3, %v2060_v25, %v3721_v32 }
 0x121   : > { %v488_v46 = vadd.f32 %v3483_v28, %v487_v44  ;;  %v2125_v35 = vsel %vm319_vm0, %v2093_v33, %v3642_v55  ;;  %v3900_v33 = vld [vmem:[#allocation2 + $0x91] sm:$0xff] }
 0x122   : > { %v2158_v32 = vsel %vm2157_vm4, %v2125_v35, %v3737_v40  ;;  %v3907_v35 = vld [vmem:[#allocation2 + $0x81] sm:$0xff] }
 0x123   : > { %vm547_vm12 = vcmp.ge.f32.partialorder %v488_v46, 1.0  ;;  %1429 = vrot.lane.b32.xlu0 %v3671_v11, %s3276_s19  ;;  %v3792_v11 = vld [vmem:[#allocation2 + $0x6a] sm:$0xff] }
 0x124   : > { %v3071_v50 = vsel %vm547_vm12, 1.0, %v5226_v20 }
 0x125   : > { %700 = vst.msk [vmem:[#allocation2 + $0xf1] sm:$0xff] %vm625_vm1, %v3071_v50  ;;  %v3763_v54 = vpop.permute.xlu0 %1295  ;;  %1051 = vrot.lane.b32.xlu2 %v754_v47, %s3274_s15  ;;  %1557 = vrot.lane.b32.xlu1 %v3665_v8, %s3278_s21 }
 0x127   : > { %v3771_v58 = vpop.permute.xlu2 %1803  ;;  %v3773_v59 = vpop.permute.xlu1 %1167 }
 0x128   : > { %v490_v61 = vpop.f32.mrf.mxu0 }
 0x129   : > { %v491_v63 = vadd.f32 %v3483_v28, %v490_v61 }
 0x12b   : > { %vm548_vm13 = vcmp.ge.f32.partialorder %v491_v63, 1.0  ;;  %1683 = vrot.lane.b32.xlu0 %v3775_v62, %s3280_s23 }
 0x12c   : > { %v3072_v2 = vsel %vm548_vm13, 1.0, %v5226_v20 }
 0x12d   : > { %701 = vst.msk [vmem:[#allocation2 + $0xf9] sm:$0xff] %vm625_vm1, %v3072_v2  ;;  %v3782_v3 = vpop.permute.xlu0 %1423  ;;  %1431 = vrot.lane.b32.xlu2 %v754_v47, %s3276_s19  ;;  %1303 = vrot.lane.b32.xlu1 %v3775_v62, %s3277_s20  ;;  %v3859_v2 = vld [vmem:[#allocation2 + $0x7a] sm:$0xff] }
 0x12f   : > { %v3787_v5 = vpop.permute.xlu2 %1093  ;;  %v3789_v7 = vpop.permute.xlu1 %1421 }
 0x130   : > { %5242 = vst [vmem:[#allocation5_spill] sm:$0xff] %v3787_v5  ;;  %v493_v8 = vpop.f32.mrf.mxu0  ;;  %v4070_v5 = vld [vmem:[#allocation2 + $0xda] sm:$0xff] }
 0x131   : > { %v494_v10 = vadd.f32 %v3483_v28, %v493_v8  ;;  %v715_v8 = vld [vmem:[#allocation2 + $0x8] sm:$0xff] }
 0x132   : > { %v2028_v15 = vsel %vm625_vm1, %v715_v8, %v3656_v0 }
 0x133   : > { %vm549_vm14 = vcmp.ge.f32.partialorder %v494_v10, 1.0  ;;  %1053 = vrot.lane.b32.xlu0 %v755_v9, %s3274_s15 }
 0x134   : > { %v3073_v12 = vsel %vm549_vm14, 1.0, %v5226_v20 }
 0x135   : > { %702 = vst.msk [vmem:[#allocation2 + $0x109] sm:$0xff] %vm625_vm1, %v3073_v12  ;;  %v3797_v14 = vpop.permute.xlu0 %1219  ;;  %1181 = vrot.lane.b32.xlu2 %v3792_v11, %s3275_s16  ;;  %1811 = vrot.lane.b32.xlu1 %v754_v47, %s3279_s22  ;;  %v3862_v12 = vld [vmem:[#allocation2 + $0x79] sm:$0xff] }
 0x136   : > { %5243 = vst [vmem:[#allocation6_spill] sm:$0xff] %v3797_v14 }
 0x137   : > { %v3802_v16 = vpop.permute.xlu2 %1045  ;;  %v3804_v17 = vpop.permute.xlu1 %1091 }
 0x138   : > { %5244 = vst [vmem:[#allocation7_spill] sm:$0xff] %v3804_v17  ;;  %v496_v21 = vpop.f32.mrf.mxu0 }
 0x139   : > { %v497_v23 = vadd.f32 %v3483_v28, %v496_v21 }
 0x13b   : > { %vm550_vm2 = vcmp.ge.f32.partialorder %v497_v23, 1.0  ;;  %1813 = vrot.lane.b32.xlu0 %v755_v9, %s3279_s22 }
 0x13c   : > { %v3074_v26 = vsel %vm550_vm2, 1.0, %v5226_v20 }
 0x13d   : > { %703 = vst.msk [vmem:[#allocation2 + $0x111] sm:$0xff] %vm625_vm1, %v3074_v26  ;;  %v3818_v56 = vpop.permute.xlu0 %1171  ;;  %1305 = vrot.lane.b32.xlu2 %v3813_v27, %s3277_s20  ;;  %1179 = vrot.lane.b32.xlu1 %v786_v30, %s3275_s16 }
 0x13f   : > { %v3823_v34 = vpop.permute.xlu2 %1933  ;;  %v1676_v48 = vpop.permute.xlu1 %1675 }
 0x140   : > { %v499_v36 = vpop.f32.mrf.mxu0  ;;  %v2191_v39 = vsel %vm2190_vm5, %v2158_v32, %v1676_v48 }
 0x141   : > { %v500_v38 = vadd.f32 %v3483_v28, %v499_v36  ;;  %v2224_v55 = vsel %vm2223_vm6, %v2191_v39, %v3771_v58  ;;  %v3921_v39 = vld [vmem:[#allocation2 + $0x90] sm:$0xff] }
 0x143   : > { %vm551_vm7 = vcmp.ge.f32.partialorder %v500_v38, 1.0  ;;  %1559 = vrot.lane.b32.xlu0 %v786_v30, %s3278_s21  ;;  %v3919_v38 = vld [vmem:[#allocation2 + $0x9a] sm:$0xff] }
 0x144   : > { %v3075_v41 = vsel %vm551_vm7, 1.0, %v5226_v20 }
 0x145   : > { %704 = vst.msk [vmem:[#allocation2 + $0x121] sm:$0xff] %vm625_vm1, %v3075_v41  ;;  %v1932_v44 = vpop.permute.xlu0 %1931  ;;  %1939 = vrot.lane.b32.xlu2 %v786_v30, %s3281_s26  ;;  %1941 = vrot.lane.b32.xlu1 %v3792_v11, %s3281_s26  ;;  %v3925_v41 = vld [vmem:[#allocation2 + $0x80] sm:$0xff] }
 0x146   : > { %v2257_v40 = vsel %vm2256_vm8, %v2224_v55, %v1932_v44  ;;  %5249 = vst [vmem:[#allocation12_spill] sm:$0xff] %v3925_v41 }
 0x147   : > { %v3840_v45 = vpop.permute.xlu2 %1425  ;;  %3085 = vmatmul.msk.f32.vlgmr.msra.gmra.mxu1 %vm2289_vm9, %v2257_v40  ;;  %v3843_v46 = vpop.permute.xlu1 %1221 }
 0x148   : > { %5245 = vst [vmem:[#allocation8_spill] sm:$0xff] %v3843_v46  ;;  %v502_v47 = vpop.f32.mrf.mxu0 }
 0x149   : > { %v503_v50 = vadd.f32 %v3483_v28, %v502_v47  ;;  %v3933_v47 = vld [vmem:[#allocation2 + $0x98] sm:$0xff] }
 0x14b   : > { %vm552_vm10 = vcmp.ge.f32.partialorder %v503_v50, 1.0  ;;  %1307 = vrot.lane.b32.xlu0 %v3845_v49, %s3277_s20  ;;  %v3935_v50 = vld [vmem:[#allocation2 + $0x99] sm:$0xff] }
 0x14c   : > { %v3076_v51 = vsel %vm552_vm10, 1.0, %v5226_v20 }
 0x14d   : > { %705 = vst.msk [vmem:[#allocation2 + $0x129] sm:$0xff] %vm625_vm1, %v3076_v51  ;;  %v1678_v57 = vpop.permute.xlu0 %1677  ;;  %1685 = vrot.lane.b32.xlu2 %v3813_v27, %s3280_s23  ;;  %1433 = vrot.lane.b32.xlu1 %v755_v9, %s3276_s19  ;;  %v3939_v51 = vld [vmem:[#allocation2 + $0x92] sm:$0xff] }
 0x14f   : > { %v3855_v58 = vpop.permute.xlu2 %1299  ;;  %v3857_v61 = vpop.permute.xlu1 %1173 }
 0x150   : > { %v505_v63 = vpop.f32.mrf.mxu0 }
 0x151   : > { %v506_v10 = vadd.f32 %v3483_v28, %v505_v63  ;;  %v2061_v28 = vsel %vm2059_vm15, %v2028_v15, %v3678_v13  ;;  %v3953_v15 = vld [vmem:[#allocation2 + $0xa9] sm:$0xff] }
 0x152   : > { %v2094_v0 = vsel %vm2092_vm3, %v2061_v28, %v3691_v18  ;;  %v2029_v28 = vsel %vm625_vm1, %v3534_v52, %v3693_v19 }
 0x153   : > { %vm553_vm11 = vcmp.ge.f32.partialorder %v506_v10, 1.0  ;;  %1183 = vrot.lane.b32.xlu0 %v3859_v2, %s3275_s16  ;;  %v2126_v25 = vsel %vm319_vm0, %v2094_v0, %v3789_v7  ;;  %v3951_v10 = vld [vmem:[#allocation2 + $0xb1] sm:$0xff] }
 0x154   : > { %v3077_v9 = vsel %vm553_vm11, 1.0, %v5226_v20  ;;  %v2159_v13 = vsel %vm2157_vm4, %v2126_v25, %v3719_v31  ;;  %v3909_v31 = vld [vmem:[#allocation2 + $0x82] sm:$0xff]  ;;  %v2062_v25 = vsel %vm2059_vm15, %v2029_v28, %v3773_v59  ;;  %v3985_v59 = vld [vmem:[#allocation2 + $0xaa] sm:$0xff]  ;;  %v2030_v28 = vsel %vm625_vm1, %v3559_v4, %v3747_v43 }
 0x155   : > { %706 = vst.msk [vmem:[#allocation2 + $0x139] sm:$0xff] %vm625_vm1, %v3077_v9  ;;  %v3870_v21 = vpop.permute.xlu0 %1553  ;;  %1561 = vrot.lane.b32.xlu2 %v3792_v11, %s3278_s21  ;;  %1055 = vrot.lane.b32.xlu1 %v3862_v12, %s3274_s15  ;;  %v2192_v26 = vsel %vm2190_vm5, %v2159_v13, %v1678_v57  ;;  %v3955_v9 = vld [vmem:[#allocation2 + $0xa8] sm:$0xff]  ;;  %v2095_v52 = vsel %vm2092_vm3, %v2062_v25, %v3763_v54 }
 0x156   : > { %5252 = vst [vmem:[#allocation15_spill] sm:$0xff] %v3955_v9  ;;  %v2127_v19 = vsel %vm319_vm0, %v2095_v52, %v3782_v3  ;;  %v2063_v52 = vsel %vm2059_vm15, %v2030_v28, %v3663_v6  ;;  %v4004_v43 = vld [vmem:[#allocation2 + $0xc2] sm:$0xff] }
 0x157   : > { %v3878_v22 = vpop.permute.xlu2 %1679  ;;  %v3880_v23 = vpop.permute.xlu1 %1297 }
 0x15b   : > { %1943 = vrot.lane.b32.xlu0 %v3859_v2, %s3281_s26 }
 0x15d   : > { %v3888_v11 = vpop.permute.xlu0 %1095  ;;  %1815 = vrot.lane.b32.xlu2 %v3862_v12, %s3279_s22  ;;  %1687 = vrot.lane.b32.xlu1 %v3845_v49, %s3280_s23 }
 0x15e   : > { %5247 = vst [vmem:[#allocation10_spill] sm:$0xff] %v3888_v11 }
 0x15f   : > { %v3897_v18 = vpop.permute.xlu2 %1223  ;;  %v1806_v30 = vpop.permute.xlu1 %1805 }
 0x160   : > { %5248 = vst [vmem:[#allocation11_spill] sm:$0xff] %v3897_v18  ;;  %v2225_v7 = vsel %vm2223_vm6, %v2192_v26, %v1806_v30  ;;  %v3974_v30 = vld [vmem:[#allocation2 + $0xc0] sm:$0xff] }
 0x161   : > { %v2258_v48 = vsel %vm2256_vm8, %v2225_v7, %v3823_v34  ;;  %v3980_v7 = vld [vmem:[#allocation2 + $0xb2] sm:$0xff]  ;;  %v4062_v18 = vld [vmem:[#allocation2 + $0xe1] sm:$0xff] }
 0x162   : > { %3086 = vmatmul.msk.f32.gmra.mxu1 %vm2289_vm9, %v2258_v48 }
 0x163   : > { %1059 = vrot.lane.b32.xlu0 %v3900_v33, %s3274_s15 }
 0x165   : > { %v3911_v36 = vpop.permute.xlu0 %1047  ;;  %1057 = vrot.lane.b32.xlu2 %v3907_v35, %s3274_s15  ;;  %1185 = vrot.lane.b32.xlu1 %v3909_v31, %s3275_s16 }
 0x167   : > { %v3917_v32 = vpop.permute.xlu2 %1175  ;;  %v1552_v34 = vpop.permute.xlu1 %1551 }
 0x168   : > { %v2160_v48 = vsel %vm2157_vm4, %v2127_v19, %v1552_v34  ;;  %v2096_v19 = vsel %vm2092_vm3, %v2063_v52, %v3880_v23  ;;  %v4030_v52 = vld [vmem:[#allocation2 + $0xc9] sm:$0xff] }
 0x169   : > { %v2193_v54 = vsel %vm2190_vm5, %v2160_v48, %v3878_v22  ;;  %v2128_v22 = vsel %vm319_vm0, %v2096_v19, %v3840_v45 }
 0x16a   : > { %v2161_v28 = vsel %vm2157_vm4, %v2128_v22, %v3870_v21  ;;  %v4043_v22 = vld [vmem:[#allocation2 + $0xe2] sm:$0xff] }
 0x16b   : > { %1189 = vrot.lane.b32.xlu0 %v3919_v38, %s3275_s16 }
 0x16d   : > { %v1808_v44 = vpop.permute.xlu0 %1807  ;;  %1311 = vrot.lane.b32.xlu2 %v3921_v39, %s3277_s20  ;;  %1309 = vrot.lane.b32.xlu1 %v3925_v41, %s3277_s20 }
 0x16e   : > { %v2226_v3 = vsel %vm2223_vm6, %v2193_v54, %v1808_v44  ;;  %v4015_v44 = vld [vmem:[#allocation2 + $0xb0] sm:$0xff] }
 0x16f   : > { %v1810_v55 = vpop.permute.xlu2 %1809  ;;  %v3931_v40 = vpop.permute.xlu1 %1427 }
 0x173   : > { %1313 = vrot.lane.b32.xlu0 %v3933_v47, %s3277_s20 }
 0x175   : > { %v3941_v57 = vpop.permute.xlu0 %1225  ;;  %1187 = vrot.lane.b32.xlu2 %v3939_v51, %s3275_s16  ;;  %1061 = vrot.lane.b32.xlu1 %v3935_v50, %s3274_s15 }
 0x176   : > { %5250 = vst [vmem:[#allocation13_spill] sm:$0xff] %v3941_v57  ;;  %v4009_v57 = vld [vmem:[#allocation2 + $0xc1] sm:$0xff] }
 0x177   : > { %v3947_v63 = vpop.permute.xlu2 %1555  ;;  %v3949_v8 = vpop.permute.xlu1 %1097 }
 0x178   : > { %5251 = vst [vmem:[#allocation14_spill] sm:$0xff] %v3949_v8  ;;  %v4060_v8 = vld [vmem:[#allocation2 + $0xe0] sm:$0xff] }
 0x17b   : > { %1065 = vrot.lane.b32.xlu0 %v3951_v10, %s3274_s15 }
 0x17d   : > { %v3962_v0 = vpop.permute.xlu0 %1177  ;;  %1063 = vrot.lane.b32.xlu2 %v3953_v15, %s3274_s15  ;;  %1315 = vrot.lane.b32.xlu1 %v3955_v9, %s3277_s20 }
 0x17f   : > { %v3970_v13 = vpop.permute.xlu2 %1051  ;;  %v3972_v26 = vpop.permute.xlu1 %1049 }
 0x183   : > { %1319 = vrot.lane.b32.xlu0 %v3974_v30, %s3277_s20 }
 0x185   : > { %v3990_v20 = vpop.permute.xlu0 %1301  ;;  %1193 = vrot.lane.b32.xlu2 %v3980_v7, %s3275_s16  ;;  %1191 = vrot.lane.b32.xlu1 %v3985_v59, %s3275_s16 }
 0x187   : > { %v3999_v34 = vpop.permute.xlu2 %1431  ;;  %v1936_v25 = vpop.permute.xlu1 %1935 }
 0x188   : > { %v2259_v4 = vsel %vm2256_vm8, %v2226_v3, %v1936_v25  ;;  %v4026_v3 = vld [vmem:[#allocation2 + $0xd9] sm:$0xff] }
 0x189   : > { %3087 = vmatmul.msk.f32.gmra.mxu1 %vm2289_vm9, %v2259_v4  ;;  %v4032_v4 = vld [vmem:[#allocation2 + $0xca] sm:$0xff] }
 0x18b   : > { %1195 = vrot.lane.b32.xlu0 %v4004_v43, %s3275_s16 }
 0x18d   : > { %v1938_v6 = vpop.permute.xlu0 %1937  ;;  %1317 = vrot.lane.b32.xlu2 %v4015_v44, %s3277_s20  ;;  %1067 = vrot.lane.b32.xlu1 %v4009_v57, %s3274_s15 }
 0x18f   : > { %v4021_v23 = vpop.permute.xlu2 %1181  ;;  %v1682_v48 = vpop.permute.xlu1 %1681 }
 0x190   : > { %v2194_v54 = vsel %vm2190_vm5, %v2161_v28, %v1682_v48  ;;  %v4049_v48 = vld [vmem:[#allocation2 + $0xc8] sm:$0xff] }
 0x191   : > { %v2227_v45 = vsel %vm2223_vm6, %v2194_v54, %v1810_v55 }
 0x192   : > { %v2260_v25 = vsel %vm2256_vm8, %v2227_v45, %v1938_v6  ;;  %v4045_v6 = vld [vmem:[#allocation2 + $0xd8] sm:$0xff] }
 0x193   : > { %1071 = vrot.lane.b32.xlu0 %v4026_v3, %s3274_s15  ;;  %3088 = vmatmul.msk.f32.gmra.mxu1 %vm2289_vm9, %v2260_v25  ;;  %v2031_v25 = vsel %vm625_vm1, %v3552_v1, %v3745_v42 }
 0x194   : > { %v2064_v11 = vsel %vm2059_vm15, %v2031_v25, %v3818_v56  ;;  %v4089_v25 = vld [vmem:[#allocation2 + $0xf1] sm:$0xff] }
 0x195   : > { %v1430_v19 = vpop.permute.xlu0 %1429  ;;  %1069 = vrot.lane.b32.xlu2 %v4030_v52, %s3274_s15  ;;  %1197 = vrot.lane.b32.xlu1 %v4032_v4, %s3275_s16  ;;  %v2097_v46 = vsel %vm2092_vm3, %v2064_v11, %v3855_v58  ;;  %5253 = vst [vmem:[#allocation16_spill] sm:$0xff] %v4089_v25 }
 0x196   : > { %v2129_v14 = vsel %vm319_vm0, %v2097_v46, %v3931_v40  ;;  %v2551_v46 = vld [vmem:[%s5223_s5] sm:$0xff] }
 0x197   : > { %v4041_v21 = vpop.permute.xlu2 %1305  ;;  %v1558_v55 = vpop.permute.xlu1 %1557  ;;  %v2162_v1 = vsel %vm2157_vm4, %v2129_v14, %v3947_v63  ;;  %2667 = vmatpush.msra.mxu2 %v2551_v46  ;;  %3237 = vmatpush.msra.mxu3 %v2551_v46  ;;  %v2032_v63 = vsel %vm625_vm1, %v3609_v37, %v3802_v16  ;;  %v4111_v46 = vld [vmem:[#allocation2 + $0xfa] sm:$0xff] }
 0x198   : > { %5255 = vst [vmem:[#allocation18_spill] sm:$0xff] %v4111_v46 }
 0x19b   : > { %1201 = vrot.lane.b32.xlu0 %v4043_v22, %s3275_s16 }
 0x19d   : > { %v1684_v28 = vpop.permute.xlu0 %1683  ;;  %1323 = vrot.lane.b32.xlu2 %v4045_v6, %s3277_s20  ;;  %1321 = vrot.lane.b32.xlu1 %v4049_v48, %s3277_s20 }
 0x19e   : > { %v2195_v42 = vsel %vm2190_vm5, %v2162_v1, %v1684_v28  ;;  %v2065_v1 = vsel %vm2059_vm15, %v2032_v63, %v3857_v61 }
 0x19f   : > { %v1940_v54 = vpop.permute.xlu2 %1939  ;;  %v4055_v45 = vpop.permute.xlu1 %1303 }
 0x1a3   : > { %1325 = vrot.lane.b32.xlu0 %v4060_v8, %s3277_s20 }
 0x1a5   : > { %v4074_v17 = vpop.permute.xlu0 %1053  ;;  %1199 = vrot.lane.b32.xlu2 %v4070_v5, %s3275_s16  ;;  %1073 = vrot.lane.b32.xlu1 %v4062_v18, %s3274_s15 }
 0x1a7   : > { %v1686_v56 = vpop.permute.xlu2 %1685  ;;  %v1812_v58 = vpop.permute.xlu1 %1811 }
 0x1a8   : > { %v2228_v11 = vsel %vm2223_vm6, %v2195_v42, %v1812_v58  ;;  %v4106_v42 = vld [vmem:[#allocation2 + $0xf9] sm:$0xff]  ;;  %v2098_v58 = vsel %vm2092_vm3, %v2065_v1, %v3990_v20 }
 0x1a9   : > { %v2261_v40 = vsel %vm2256_vm8, %v2228_v11, %v1940_v54  ;;  %5254 = vst [vmem:[#allocation17_spill] sm:$0xff] %v4106_v42  ;;  %v2130_v11 = vsel %vm319_vm0, %v2098_v58, %v1430_v19  ;;  %v4125_v58 = vld [vmem:[#allocation2 + $0x108] sm:$0xff] }
 0x1aa   : > { %3089 = vmatmul.msk.f32.gmra.mxu1 %vm2289_vm9, %v2261_v40  ;;  %v4113_v40 = vld [vmem:[#allocation2 + $0xf0] sm:$0xff]  ;;  %v2163_v37 = vsel %vm2157_vm4, %v2130_v11, %v1558_v55  ;;  %v4130_v55 = vld [vmem:[#allocation2 + $0xf8] sm:$0xff] }
 0x1ab   : > { %1689 = vrot.lane.b32.xlu0 %v3925_v41, %s3280_s23  ;;  %v2196_v20 = vsel %vm2190_vm5, %v2163_v37, %v1686_v56  ;;  %v4132_v11 = vld [vmem:[#allocation2 + $0xf2] sm:$0xff]  ;;  %v4144_v37 = vld [vmem:[#allocation2 + $0x10a] sm:$0xff] }
 0x1ac   : > { %5257 = vst [vmem:[#allocation20_spill] sm:$0xff] %v4144_v37 }
 0x1ad   : > { %v1814_v14 = vpop.permute.xlu0 %1813  ;;  %1075 = vrot.lane.b32.xlu2 %v4089_v25, %s3274_s15  ;;  %1817 = vrot.lane.b32.xlu1 %v3907_v35, %s3279_s22  ;;  %v4175_v25 = vld [vmem:[#allocation2 + $0x111] sm:$0xff] }
 0x1ae   : > { %v2229_v61 = vsel %vm2223_vm6, %v2196_v20, %v1814_v14  ;;  %v4149_v20 = vld [vmem:[%s5222_s4] ss:$0 sm:$0xff]  ;;  %5262 = vst [vmem:[#allocation24_spill] sm:$0xff] %v4175_v25 }
 0x1af   : > { %v4100_v28 = vpop.permute.xlu2 %1561  ;;  %v4102_v54 = vpop.permute.xlu1 %1179 }
 0x1b3   : > { %1077 = vrot.lane.b32.xlu0 %v4106_v42, %s3274_s15 }
 0x1b5   : > { %v1560_v16 = vpop.permute.xlu0 %1559  ;;  %1205 = vrot.lane.b32.xlu2 %v4111_v46, %s3275_s16  ;;  %1327 = vrot.lane.b32.xlu1 %v4113_v40, %s3277_s20  ;;  %v2033_v46 = vsel %vm625_vm1, %v3633_v53, %v3911_v36 }
 0x1b7   : > { %v1816_v19 = vpop.permute.xlu2 %1815  ;;  %v1942_v63 = vpop.permute.xlu1 %1941 }
 0x1b8   : > { %v2262_v1 = vsel %vm2256_vm8, %v2229_v61, %v1942_v63  ;;  %v4151_v61 = vld [vmem:[#allocation2 + $0x109] sm:$0xff] }
 0x1b9   : > { %3090 = vmatmul.msk.f32.gmra.mxu1 %vm2289_vm9, %v2262_v1  ;;  %5258 = vst [vmem:[#allocation21_spill] sm:$0xff] %v4151_v61 }
 0x1bb   : > { %1331 = vrot.lane.b32.xlu0 %v4125_v58, %s3277_s20 }
 0x1bd   : > { %v4134_v60 = vpop.permute.xlu0 %1307  ;;  %1329 = vrot.lane.b32.xlu2 %v4130_v55, %s3277_s20  ;;  %1203 = vrot.lane.b32.xlu1 %v4132_v11, %s3275_s16 }
 0x1bf   : > { %v4140_v56 = vpop.permute.xlu2 %1057  ;;  %v4142_v14 = vpop.permute.xlu1 %1433 }
 0x1c0   : > { %5256 = vst [vmem:[#allocation19_spill] sm:$0xff] %v4140_v56 }
 0x1c3   : > { %1207 = vrot.lane.b32.xlu0 %v4144_v37, %s3275_s16  ;;  %v5261_v37 = vmov 0.0  }
 0x1c4   : > { %v2359_v63 = vpop.f32.mrf.mxu1 }
 0x1c5   : > { %v2360_v1 = vadd.f32 %v4149_v20, %v2359_v63  ;;  %v4156_v29 = vpop.permute.xlu0 %1183  ;;  %1945 = vrot.lane.b32.xlu2 %v3909_v31, %s3281_s26  ;;  %1079 = vrot.lane.b32.xlu1 %v4151_v61, %s3274_s15  ;;  %v4170_v63 = vld [vmem:[#allocation2 + $0x121] sm:$0xff]  ;;  %v4177_v61 = vld [vmem:[#allocation2 + $0x112] sm:$0xff] }
 0x1c6   : > { %5259 = vst [vmem:[#allocation22_spill] sm:$0xff] %v4156_v29  ;;  %v2066_v29 = vsel %vm2059_vm15, %v2033_v46, %v3917_v32 }
 0x1c7   : > { %vm2455_vm12 = vcmp.ge.f32.partialorder %v2360_v1, 1.0  ;;  %v4165_v41 = vpop.permute.xlu2 %1311  ;;  %v4167_v56 = vpop.permute.xlu1 %1055  ;;  %5263 = vst [vmem:[#allocation25_spill] sm:$0xff] %v4177_v61  ;;  %v2099_v53 = vsel %vm2092_vm3, %v2066_v29, %v4055_v45  ;;  %v4193_v45 = vld [vmem:[#allocation2 + $0x12a] sm:$0xff] }
 0x1c8   : > { %5260 = vst [vmem:[#allocation23_spill] sm:$0xff] %v4165_v41  ;;  %v3117_v42 = vsel %vm2455_vm12, 1.0, %v5261_v37  ;;  %v2131_v32 = vsel %vm319_vm0, %v2099_v53, %v3999_v34  ;;  %v4202_v34 = vld [vmem:[#allocation2 + $0x110] sm:$0xff] }
 0x1c9   : > { %3149 = vmatmul.msk.f32.vlgmr.msra.gmra.mxu2 %vm625_vm1, %v3117_v42  ;;  %v2164_v42 = vsel %vm2157_vm4, %v2131_v32, %v1560_v16  ;;  %v4214_v53 = vld [vmem:[#allocation2 + $0x129] sm:$0xff] }
 0x1cb   : > { %1083 = vrot.lane.b32.xlu0 %v4170_v63, %s3274_s15 }
 0x1cd   : > { %v1944_v36 = vpop.permute.xlu0 %1943  ;;  %1081 = vrot.lane.b32.xlu2 %v4175_v25, %s3274_s15  ;;  %1209 = vrot.lane.b32.xlu1 %v4177_v61, %s3275_s16  ;;  %v4197_v25 = vld [vmem:[#allocation2 + $0x122] sm:$0xff] }
 0x1cf   : > { %v4190_v46 = vpop.permute.xlu2 %1187  ;;  %v1688_v1 = vpop.permute.xlu1 %1687 }
 0x1d0   : > { %v2197_v29 = vsel %vm2190_vm5, %v2164_v42, %v1688_v1 }
 0x1d1   : > { %v2230_v41 = vsel %vm2223_vm6, %v2197_v29, %v1816_v19  ;;  %v4229_v29 = vld [vmem:[#allocation2 + $0x139] sm:$0xff] }
 0x1d2   : > { %v2263_v49 = vsel %vm2256_vm8, %v2230_v41, %v1944_v36 }
 0x1d3   : > { %1213 = vrot.lane.b32.xlu0 %v4193_v45, %s3275_s16  ;;  %3091 = vmatmul.msk.f32.gmra.mxu1 %vm2289_vm9, %v2263_v49 }
 0x1d5   : > { %v4204_v16 = vpop.permute.xlu0 %1059  ;;  %1211 = vrot.lane.b32.xlu2 %v4197_v25, %s3275_s16  ;;  %1333 = vrot.lane.b32.xlu1 %v4202_v34, %s3277_s20 }
 0x1d7   : > { %v4210_v19 = vpop.permute.xlu2 %1063  ;;  %v4212_v41 = vpop.permute.xlu1 %1185 }
 0x1d8   : > { %5264 = vst [vmem:[#allocation26_spill] sm:$0xff] %v4210_v19 }
 0x1db   : > { %1435 = vrot.lane.b32.xlu0 %v3862_v12, %s3276_s19 }
 0x1dd   : > { %v4218_v49 = vpop.permute.xlu0 %1189  ;;  %1691 = vrot.lane.b32.xlu2 %v3921_v39, %s3280_s23  ;;  %1085 = vrot.lane.b32.xlu1 %v4214_v53, %s3274_s15 }
 0x1df   : > { %v4224_v36 = vpop.permute.xlu2 %1193  ;;  %v2362_v32 = vpop.f32.mrf.mxu1 }
 0x1e0   : > { %5265 = vst [vmem:[#allocation27_spill] sm:$0xff] %v4224_v36  ;;  %v2363_v42 = vadd.f32 %v4149_v20, %v2362_v32  ;;  %v4227_v1 = vpop.permute.xlu1 %1309  ;;  %v4247_v36 = vld [vmem:[#allocation2 + $0x13a] sm:$0xff] }
 0x1e2   : > { %vm2456_vm13 = vcmp.ge.f32.partialorder %v2363_v42, 1.0 }
 0x1e3   : > { %1819 = vrot.lane.b32.xlu0 %v3900_v33, %s3279_s22  ;;  %v3118_v12 = vsel %vm2456_vm13, 1.0, %v5261_v37 }
 0x1e4   : > { %3150 = vmatmul.msk.f32.gmra.mxu2 %vm625_vm1, %v3118_v12 }
 0x1e5   : > { %v4235_v61 = vpop.permute.xlu0 %1313  ;;  %1087 = vrot.lane.b32.xlu2 %v4229_v29, %s3274_s15  ;;  %1563 = vrot.lane.b32.xlu1 %v3859_v2, %s3278_s21 }
 0x1e7   : > { %v4241_v32 = vpop.permute.xlu2 %1317 }
 0x1e8   : > { %5266 = vst [vmem:[#allocation28_spill] sm:$0xff] %v4241_v32  ;;  %v4243_v42 = vpop.permute.xlu1 %1061 }
 0x1eb   : > { %1565 = vrot.lane.b32.xlu0 %v3909_v31, %s3278_s21 }
 0x1ed   : > { %v4249_v19 = vpop.permute.xlu0 %1065  ;;  %1437 = vrot.lane.b32.xlu2 %v3907_v35, %s3276_s19  ;;  %1215 = vrot.lane.b32.xlu1 %v4247_v36, %s3275_s16 }
 0x1ee   : > { %5267 = vst [vmem:[#allocation29_spill] sm:$0xff] %v4249_v19 }
 0x1ef   : > { %v4255_v12 = vpop.permute.xlu2 %1069 }
 0x1f0   : > { %5268 = vst [vmem:[#allocation30_spill] sm:$0xff] %v4255_v12  ;;  %v4257_v2 = vpop.permute.xlu1 %1315 }
 0x1f3   : > { %1949 = vrot.lane.b32.xlu0 %v3919_v38, %s3281_s26 }
 0x1f5   : > { %v4261_v32 = vpop.permute.xlu0 %1319  ;;  %1821 = vrot.lane.b32.xlu2 %v3935_v50, %s3279_s22  ;;  %1947 = vrot.lane.b32.xlu1 %v3939_v51, %s3281_s26 }
 0x1f6   : > { %5269 = vst [vmem:[#allocation31_spill] sm:$0xff] %v4261_v32 }
 0x1f7   : > { %v4267_v31 = vpop.permute.xlu2 %1323 }
 0x1f8   : > { %5270 = vst [vmem:[#allocation32_spill] sm:$0xff] %v4267_v31  ;;  %v4269_v35 = vpop.permute.xlu1 %1191 }
 0x1f9   : > { %5271 = vst [vmem:[#allocation33_spill] sm:$0xff] %v4269_v35 }
 0x1fb   : > { %1695 = vrot.lane.b32.xlu0 %v3955_v9, %s3280_s23 }
 0x1fd   : > { %v4273_v12 = vpop.permute.xlu0 %1195  ;;  %1567 = vrot.lane.b32.xlu2 %v3939_v51, %s3278_s21  ;;  %1693 = vrot.lane.b32.xlu1 %v3933_v47, %s3280_s23 }
 0x1fe   : > { %5272 = vst [vmem:[#allocation34_spill] sm:$0xff] %v4273_v12 }
 0x1ff   : > { %v4279_v19 = vpop.permute.xlu2 %1199 }
 0x200   : > { %5273 = vst [vmem:[#allocation35_spill] sm:$0xff] %v4279_v19  ;;  %v4281_v32 = vpop.permute.xlu1 %1067 }
 0x203   : > { %1441 = vrot.lane.b32.xlu0 %v3935_v50, %s3276_s19 }
 0x205   : > { %v4285_v31 = vpop.permute.xlu0 %1071  ;;  %1951 = vrot.lane.b32.xlu2 %v3985_v59, %s3281_s26  ;;  %1439 = vrot.lane.b32.xlu1 %v3900_v33, %s3276_s19 }
 0x206   : > { %5274 = vst [vmem:[#allocation36_spill] sm:$0xff] %v4285_v31  ;;  %v2365_v12 = vpop.f32.mrf.mxu1 }
 0x207   : > { %v2366_v51 = vadd.f32 %v4149_v20, %v2365_v12  ;;  %v1076_v35 = vpop.permute.xlu2 %1075 }
 0x208   : > { %v4292_v9 = vpop.permute.xlu1 %1197 }
 0x209   : > { %5275 = vst [vmem:[#allocation37_spill] sm:$0xff] %v4292_v9  ;;  %vm2457_vm14 = vcmp.ge.f32.partialorder %v2366_v51, 1.0 }
 0x20a   : > { %v3119_v19 = vsel %vm2457_vm14, 1.0, %v5261_v37 }
 0x20b   : > { %1825 = vrot.lane.b32.xlu0 %v3951_v10, %s3279_s22  ;;  %3151 = vmatmul.msk.f32.gmra.mxu2 %vm625_vm1, %v3119_v19 }
 0x20d   : > { %v4298_v50 = vpop.permute.xlu0 %1201  ;;  %1697 = vrot.lane.b32.xlu2 %v4015_v44, %s3280_s23  ;;  %1823 = vrot.lane.b32.xlu1 %v3953_v15, %s3279_s22 }
 0x20e   : > { %5276 = vst [vmem:[#allocation38_spill] sm:$0xff] %v4298_v50  ;;  %v2034_v50 = vsel %vm625_vm1, %v3699_v24, %v3972_v26 }
 0x20f   : > { %v1206_v33 = vpop.permute.xlu2 %1205 }
 0x210   : > { %v4304_v12 = vpop.permute.xlu1 %1321  ;;  %v2368_v31 = vpop.f32.mrf.mxu1 }
 0x211   : > { %v2369_v51 = vadd.f32 %v4149_v20, %v2368_v31 }
 0x213   : > { %vm2458_vm2 = vcmp.ge.f32.partialorder %v2369_v51, 1.0  ;;  %1571 = vrot.lane.b32.xlu0 %v3985_v59, %s3278_s21  ;;  %v2067_v59 = vsel %vm2059_vm15, %v2034_v50, %v3962_v0 }
 0x214   : > { %v3120_v19 = vsel %vm2458_vm2, 1.0, %v5261_v37  ;;  %v2100_v24 = vsel %vm2092_vm3, %v2067_v59, %v4041_v21 }
 0x215   : > { %v4313_v9 = vpop.permute.xlu0 %1325  ;;  %1443 = vrot.lane.b32.xlu2 %v3953_v15, %s3276_s19  ;;  %1569 = vrot.lane.b32.xlu1 %v3919_v38, %s3278_s21  ;;  %v2132_v26 = vsel %vm319_vm0, %v2100_v24, %v4142_v14 }
 0x216   : > { %3152 = vmatmul.msk.f32.gmra.mxu2 %vm625_vm1, %v3120_v19  ;;  %v2165_v38 = vsel %vm2157_vm4, %v2132_v26, %v4100_v28 }
 0x217   : > { %v4320_v31 = vpop.permute.xlu2 %1329 }
 0x218   : > { %5277 = vst [vmem:[#allocation39_spill] sm:$0xff] %v4320_v31  ;;  %v4324_v51 = vpop.permute.xlu1 %1073 }
 0x21b   : > { %1955 = vrot.lane.b32.xlu0 %v4004_v43, %s3281_s26 }
 0x21d   : > { %v1690_v15 = vpop.permute.xlu0 %1689  ;;  %1827 = vrot.lane.b32.xlu2 %v4009_v57, %s3279_s22  ;;  %1953 = vrot.lane.b32.xlu1 %v3980_v7, %s3281_s26 }
 0x21e   : > { %v2198_v0 = vsel %vm2190_vm5, %v2165_v38, %v1690_v15 }
 0x21f   : > { %v1946_v50 = vpop.permute.xlu2 %1945 }
 0x220   : > { %v1818_v21 = vpop.permute.xlu1 %1817 }
 0x221   : > { %v2231_v19 = vsel %vm2223_vm6, %v2198_v0, %v1818_v21 }
 0x222   : > { %v2264_v14 = vsel %vm2256_vm8, %v2231_v19, %v1946_v50 }
 0x223   : > { %3092 = vmatmul.msk.f32.gmra.mxu1 %vm2289_vm9, %v2264_v14  ;;  %1701 = vrot.lane.b32.xlu0 %v4049_v48, %s3280_s23 }
 0x225   : > { %v1078_v28 = vpop.permute.xlu0 %1077  ;;  %1573 = vrot.lane.b32.xlu2 %v3980_v7, %s3278_s21  ;;  %1699 = vrot.lane.b32.xlu1 %v3974_v30, %s3280_s23 }
 0x226   : > { %v2048_v59 = vsel %vm625_vm1, %v4130_v55, %v1078_v28 }
 0x227   : > { %v1082_v24 = vpop.permute.xlu2 %1081  ;;  %v2371_v26 = vpop.f32.mrf.mxu1  ;;  %v2081_v15 = vsel %vm2059_vm15, %v2048_v59, %v1206_v33  ;;  %v2047_v33 = vsel %vm625_vm1, %v4113_v40, %v1076_v35 }
 0x228   : > { %v4351_v38 = vpop.permute.xlu1 %1327  ;;  %v2372_v0 = vadd.f32 %v4149_v20, %v2371_v26  ;;  %v4379_v26 = vld [vmem:[#allocation2 + $0x120] sm:$0xff] }
 0x22a   : > { %vm2459_vm7 = vcmp.ge.f32.partialorder %v2372_v0, 1.0 }
 0x22b   : > { %1447 = vrot.lane.b32.xlu0 %v4009_v57, %s3276_s19  ;;  %v3121_v7 = vsel %vm2459_vm7, 1.0, %v5261_v37 }
 0x22c   : > { %3153 = vmatmul.msk.f32.gmra.mxu2 %vm625_vm1, %v3121_v7 }
 0x22d   : > { %v1332_v30 = vpop.permute.xlu0 %1331  ;;  %1957 = vrot.lane.b32.xlu2 %v4032_v4, %s3281_s26  ;;  %1445 = vrot.lane.b32.xlu1 %v3951_v10, %s3276_s19 }
 0x22f   : > { %v1212_v48 = vpop.permute.xlu2 %1211 }
 0x230   : > { %v1204_v50 = vpop.permute.xlu1 %1203 }
 0x231   : > { %v2080_v21 = vsel %vm2059_vm15, %v2047_v33, %v1204_v50 }
 0x232   : > { %v4366_v57 = vsel %vm2092_vm3, %v2080_v21, %v1332_v30  ;;  %v2050_v21 = vsel %vm625_vm1, %v4202_v34, %v1082_v24 }
 0x233   : > { %5278 = vst [vmem:[#allocation40_spill] sm:$0xff] %v4366_v57  ;;  %1831 = vrot.lane.b32.xlu0 %v4026_v3, %s3279_s22 }
 0x235   : > { %v1208_v19 = vpop.permute.xlu0 %1207  ;;  %1703 = vrot.lane.b32.xlu2 %v4045_v6, %s3280_s23  ;;  %1829 = vrot.lane.b32.xlu1 %v4030_v52, %s3279_s22 }
 0x236   : > { %v2374_v10 = vpop.f32.mrf.mxu1 }
 0x237   : > { %v2375_v14 = vadd.f32 %v4149_v20, %v2374_v10  ;;  %v4375_v35 = vpop.permute.xlu2 %1691 }
 0x238   : > { %v1080_v28 = vpop.permute.xlu1 %1079 }
 0x239   : > { %vm2460_vm10 = vcmp.ge.f32.partialorder %v2375_v14, 1.0  ;;  %v2049_v59 = vsel %vm625_vm1, %v4125_v58, %v1080_v28  ;;  %v4416_v14 = vld [vmem:[%s5224_s6] ss:$0 sm:$0xff] }
 0x23a   : > { %v3122_v0 = vsel %vm2460_vm10, 1.0, %v5261_v37  ;;  %v4383_v7 = vsel %vm2059_vm15, %v2049_v59, %v1208_v19 }
 0x23b   : > { %1335 = vrot.lane.b32.xlu0 %v4379_v26, %s3277_s20  ;;  %3154 = vmatmul.msk.f32.gmra.mxu2 %vm625_vm1, %v3122_v0 }
 0x23d   : > { %v1084_v6 = vpop.permute.xlu0 %1083  ;;  %1449 = vrot.lane.b32.xlu2 %v4030_v52, %s3276_s19  ;;  %1575 = vrot.lane.b32.xlu1 %v4004_v43, %s3278_s21 }
 0x23e   : > { %v2051_v30 = vsel %vm625_vm1, %v4379_v26, %v1084_v6 }
 0x23f   : > { %v1088_v33 = vpop.permute.xlu2 %1087  ;;  %v4395_v50 = vsel %vm2059_vm15, %v2051_v30, %v1212_v48 }
 0x240   : > { %v1210_v19 = vpop.permute.xlu1 %1209 }
 0x241   : > { %v4400_v10 = vsel %vm2059_vm15, %v2050_v21, %v1210_v19  ;;  %v4440_v21 = vld [vmem:[#allocation2 + $0x128] sm:$0xff] }
 0x243   : > { %1705 = vrot.lane.b32.xlu0 %v4060_v8, %s3280_s23  ;;  %v4418_v8 = vld [vmem:[#allocation2 + $0x138] sm:$0xff] }
 0x245   : > { %v1214_v52 = vpop.permute.xlu0 %1213  ;;  %1463 = vrot.lane.b32.xlu2 %v4170_v63, %s3276_s19  ;;  %1959 = vrot.lane.b32.xlu1 %v4070_v5, %s3281_s26  ;;  %v309_v63 = vld [vmem:[%s3350_s14 + $0xf0] sm:$0xff] }
 0x246   : > { %3051 = vmatmul.msk.f32.gmra.mxu3 %vm319_vm0, %v309_v63 }
 0x247   : > { %v4408_v43 = vpop.permute.xlu2 %1437 }
 0x248   : > { %v1334_v48 = vpop.permute.xlu1 %1333 }
 0x249   : > { %v4411_v24 = vsel %vm2092_vm3, %v2081_v15, %v1334_v48  ;;  %v2861_v15 = vld [vmem:[%s3350_s14] sm:$0xff] }
 0x24a   : > { %5279 = vst [vmem:[#allocation41_spill] sm:$0xff] %v4411_v24 }
 0x24b   : > { %1719 = vrot.lane.b32.xlu0 %v4418_v8, %s3280_s23 }
 0x24c   : > { %v2669_v28 = vpop.f32.mrf.mxu2 }
 0x24d   : > { %v2670_v59 = vadd.f32 %v4416_v14, %v2669_v28  ;;  %v1436_v0 = vpop.permute.xlu0 %1435  ;;  %1833 = vrot.lane.b32.xlu2 %v4062_v18, %s3279_s22  ;;  %1577 = vrot.lane.b32.xlu1 %v4032_v4, %s3278_s21 }
 0x24f   : > { %vm2765_vm11 = vcmp.ge.f32.partialorder %v2670_v59, 1.0  ;;  %v4430_v6 = vpop.permute.xlu2 %1821  ;;  %v310_v59 = vld [vmem:[%s3350_s14 + $0xf8] sm:$0xff] }
 0x250   : > { %v3181_v30 = vsel %vm2765_vm11, 1.0, %v5261_v37  ;;  %v1086_v19 = vpop.permute.xlu1 %1085  ;;  %v2377_v48 = vpop.f32.mrf.mxu1  ;;  %3052 = vmatmul.msk.f32.gmra.mxu3 %vm319_vm0, %v310_v59 }
 0x251   : > { %v2893_v63 = vadd.f32 %v3181_v30, %v2861_v15  ;;  %v2052_v4 = vsel %vm625_vm1, %v4440_v21, %v1086_v19  ;;  %v2378_v28 = vadd.f32 %v4149_v20, %v2377_v48  ;;  %v2035_v48 = vsel %vm625_vm1, %v3775_v62, %v3970_v13 }
 0x252   : > { %v4447_v24 = vsel %vm2059_vm15, %v2052_v4, %v1214_v52 }
 0x253   : > { %2925 = vst.msk [vmem:[%s4437_s9] sm:$0xff] %vm319_vm0, %v2893_v63  ;;  %vm2461_vm12 = vcmp.ge.f32.partialorder %v2378_v28, 1.0  ;;  %1975 = vrot.lane.b32.xlu0 %v4247_v36, %s3281_s26 }
 0x254   : > { %v3123_v57 = vsel %vm2461_vm12, 1.0, %v5261_v37 }
 0x255   : > { %v1820_v15 = vpop.permute.xlu0 %1819  ;;  %1847 = vrot.lane.b32.xlu2 %v4229_v29, %s3279_s22  ;;  %1591 = vrot.lane.b32.xlu1 %v4197_v25, %s3278_s21  ;;  %v2068_v25 = vsel %vm2059_vm15, %v2035_v48, %v4102_v54 }
 0x256   : > { %3155 = vmatmul.msk.f32.gmra.mxu2 %vm625_vm1, %v3123_v57  ;;  %v2101_v63 = vsel %vm2092_vm3, %v2068_v25, %v4134_v60 }
 0x257   : > { %v1568_v52 = vpop.permute.xlu2 %1567  ;;  %v2133_v28 = vsel %vm319_vm0, %v2101_v63, %v1436_v0 }
 0x258   : > { %v1564_v30 = vpop.permute.xlu1 %1563 }
 0x259   : > { %v2166_v31 = vsel %vm2157_vm4, %v2133_v28, %v1564_v30 }
 0x25a   : > { %v2199_v62 = vsel %vm2190_vm5, %v2166_v31, %v4375_v35  ;;  %v2036_v31 = vsel %vm625_vm1, %v3813_v27, %v4074_v17  ;;  %v4501_v35 = vld [vmem:[#allocation2 + $0x140] sm:$0xff] }
 0x25b   : > { %1579 = vrot.lane.b32.xlu0 %v4070_v5, %s3278_s21  ;;  %v2053_v5 = vsel %vm625_vm1, %v4418_v8, %v1088_v33  ;;  %v2232_v30 = vsel %vm2223_vm6, %v2199_v62, %v1820_v15  ;;  %v2069_v15 = vsel %vm2059_vm15, %v2036_v31, %v4021_v23 }
 0x25c   : > { %v2102_v17 = vsel %vm2092_vm3, %v2069_v15, %v4227_v1 }
 0x25d   : > { %v1566_v19 = vpop.permute.xlu0 %1565  ;;  %1337 = vrot.lane.b32.xlu2 %v4440_v21, %s3277_s20  ;;  %1961 = vrot.lane.b32.xlu1 %v4043_v22, %s3281_s26  ;;  %v2134_v27 = vsel %vm319_vm0, %v2102_v17, %v4408_v43  ;;  %v4528_v43 = vld [vmem:[#allocation2 + $0x142] sm:$0xff] }
 0x25f   : > { %v1952_v57 = vpop.permute.xlu2 %1951 }
 0x260   : > { %v1216_v4 = vpop.permute.xlu1 %1215 }
 0x261   : > { %v4477_v59 = vsel %vm2059_vm15, %v2053_v5, %v1216_v4  ;;  %v2167_v5 = vsel %vm2157_vm4, %v2134_v27, %v1566_v19 }
 0x263   : > { %1593 = vrot.lane.b32.xlu0 %v4193_v45, %s3278_s21  ;;  %v2862_v45 = vld [vmem:[%s3350_s14 + $0x8] sm:$0xff] }
 0x265   : > { %v1950_v13 = vpop.permute.xlu0 %1949  ;;  %1707 = vrot.lane.b32.xlu2 %v4113_v40, %s3280_s23  ;;  %1451 = vrot.lane.b32.xlu1 %v4026_v3, %s3276_s19 }
 0x267   : > { %v4488_v60 = vpop.permute.xlu2 %1697  ;;  %v2672_v54 = vpop.f32.mrf.mxu2 }
 0x268   : > { %v2673_v33 = vadd.f32 %v4416_v14, %v2672_v54  ;;  %v1948_v0 = vpop.permute.xlu1 %1947  ;;  %v5281_v54 = vld [vmem:[#allocation16_spill] sm:$0xff] }
 0x269   : > { %v2265_v48 = vsel %vm2256_vm8, %v2232_v30, %v1948_v0  ;;  %v5283_v30 = vld [vmem:[#allocation23_spill] sm:$0xff] }
 0x26a   : > { %vm2766_vm13 = vcmp.ge.f32.partialorder %v2673_v33, 1.0  ;;  %3093 = vmatmul.msk.f32.gmra.mxu1 %vm2289_vm9, %v2265_v48 }
 0x26b   : > { %v3182_v3 = vsel %vm2766_vm13, 1.0, %v5261_v37  ;;  %1963 = vrot.lane.b32.xlu0 %v4132_v11, %s3281_s26 }
 0x26c   : > { %v2894_v40 = vadd.f32 %v3182_v3, %v2862_v45  ;;  %v4541_v45 = vld [vmem:[#allocation2 + $0x141] sm:$0xff] }
 0x26d   : > { %v1696_v25 = vpop.permute.xlu0 %1695  ;;  %1721 = vrot.lane.b32.xlu2 %v4501_v35, %s3280_s23  ;;  %1465 = vrot.lane.b32.xlu1 %v4214_v53, %s3276_s19  ;;  %v5280_v53 = vld [vmem:[#allocation9_spill] sm:$0xff] }
 0x26e   : > { %2926 = vst.msk [vmem:[%s4437_s9 + $0x8] sm:$0xff] %vm319_vm0, %v2894_v40  ;;  %v2037_v62 = vsel %vm625_vm1, %v5280_v53, %v4167_v56 }
 0x26f   : > { %v4515_v63 = vpop.permute.xlu2 %1443 }
 0x270   : > { %v1694_v23 = vpop.permute.xlu1 %1693 }
 0x271   : > { %v2200_v4 = vsel %vm2190_vm5, %v2167_v5, %v1694_v23  ;;  %v5286_v5 = vld [vmem:[#allocation12_spill] sm:$0xff] }
 0x272   : > { %v2233_v28 = vsel %vm2223_vm6, %v2200_v4, %v4430_v6  ;;  %v5282_v6 = vld [vmem:[#allocation22_spill] sm:$0xff] }
 0x273   : > { %1453 = vrot.lane.b32.xlu0 %v4062_v18, %s3276_s19  ;;  %v2266_v1 = vsel %vm2256_vm8, %v2233_v28, %v1950_v13  ;;  %v2070_v33 = vsel %vm2059_vm15, %v2037_v62, %v5282_v6  ;;  %v4571_v62 = vld [vmem:[#allocation2 + $0x151] sm:$0xff] }
 0x274   : > { %3094 = vmatmul.msk.f32.gmra.mxu1 %vm2289_vm9, %v2266_v1  ;;  %v2103_v18 = vsel %vm2092_vm3, %v2070_v33, %v5283_v30  ;;  %v2863_v33 = vld [vmem:[%s3350_s14 + $0x10] sm:$0xff] }
 0x275   : > { %v1442_v19 = vpop.permute.xlu0 %1441  ;;  %1977 = vrot.lane.b32.xlu2 %v4528_v43, %s3281_s26  ;;  %1835 = vrot.lane.b32.xlu1 %v5281_v54, %s3279_s22 }
 0x277   : > { %v1828_v56 = vpop.permute.xlu2 %1827 }
 0x278   : > { %v1440_v0 = vpop.permute.xlu1 %1439 }
 0x279   : > { %v2135_v13 = vsel %vm319_vm0, %v2103_v18, %v1440_v0  ;;  %v2039_v18 = vsel %vm625_vm1, %v3921_v39, %v4204_v16 }
 0x27a   : > { %v2168_v48 = vsel %vm2157_vm4, %v2135_v13, %v1568_v52  ;;  %v5284_v52 = vld [vmem:[#allocation17_spill] sm:$0xff] }
 0x27b   : > { %1467 = vrot.lane.b32.xlu0 %v4229_v29, %s3276_s19  ;;  %v2201_v40 = vsel %vm2190_vm5, %v2168_v48, %v1696_v25  ;;  %v4594_v48 = vld [vmem:[#allocation2 + $0x150] sm:$0xff] }
 0x27d   : > { %v1826_v31 = vpop.permute.xlu0 %1825  ;;  %1581 = vrot.lane.b32.xlu2 %v4043_v22, %s3278_s21  ;;  %1849 = vrot.lane.b32.xlu1 %v4541_v45, %s3279_s22  ;;  %v5285_v22 = vld [vmem:[#allocation19_spill] sm:$0xff] }
 0x27e   : > { %v2038_v25 = vsel %vm625_vm1, %v5286_v5, %v5285_v22  ;;  %v2864_v5 = vld [vmem:[%s3350_s14 + $0x18] sm:$0xff] }
 0x27f   : > { %v4548_v3 = vpop.permute.xlu2 %1573 }
 0x280   : > { %v1824_v15 = vpop.permute.xlu1 %1823 }
 0x281   : > { %v2234_v17 = vsel %vm2223_vm6, %v2201_v40, %v1824_v15 }
 0x282   : > { %v2267_v29 = vsel %vm2256_vm8, %v2234_v17, %v1952_v57  ;;  %v2071_v57 = vsel %vm2059_vm15, %v2038_v25, %v4212_v41  ;;  %v5287_v41 = vld [vmem:[#allocation18_spill] sm:$0xff] }
 0x283   : > { %3095 = vmatmul.msk.f32.gmra.mxu1 %vm2289_vm9, %v2267_v29  ;;  %1837 = vrot.lane.b32.xlu0 %v5284_v52, %s3279_s22  ;;  %v2104_v4 = vsel %vm2092_vm3, %v2071_v57, %v4235_v61 }
 0x284   : > { %v2136_v53 = vsel %vm319_vm0, %v2104_v4, %v1442_v19 }
 0x285   : > { %v1572_v27 = vpop.permute.xlu0 %1571  ;;  %1595 = vrot.lane.b32.xlu2 %v4247_v36, %s3278_s21  ;;  %1339 = vrot.lane.b32.xlu1 %v4418_v8, %s3277_s20 }
 0x287   : > { %v4565_v23 = vpop.permute.xlu2 %1957 }
 0x288   : > { %v1570_v28 = vpop.permute.xlu1 %1569 }
 0x289   : > { %v2169_v36 = vsel %vm2157_vm4, %v2136_v53, %v1570_v28  ;;  %v5288_v28 = vld [vmem:[#allocation28_spill] sm:$0xff] }
 0x28a   : > { %v2202_v8 = vsel %vm2190_vm5, %v2169_v36, %v4488_v60 }
 0x28b   : > { %1851 = vrot.lane.b32.xlu0 %v4571_v62, %s3279_s22  ;;  %v2235_v30 = vsel %vm2223_vm6, %v2202_v8, %v1826_v31  ;;  %v2072_v31 = vsel %vm2059_vm15, %v2039_v18, %v4190_v46 }
 0x28c   : > { %v2105_v39 = vsel %vm2092_vm3, %v2072_v31, %v4257_v2  ;;  %v2040_v2 = vsel %vm625_vm1, %v3933_v47, %v4243_v42  ;;  %v4662_v31 = vld [vmem:[#allocation2 + $0x159] sm:$0xff] }
 0x28d   : > { %v1956_v1 = vpop.permute.xlu0 %1955  ;;  %1965 = vrot.lane.b32.xlu2 %v5287_v41, %s3281_s26  ;;  %1709 = vrot.lane.b32.xlu1 %v4130_v55, %s3280_s23  ;;  %v2137_v16 = vsel %vm319_vm0, %v2105_v39, %v4515_v63  ;;  %v2073_v47 = vsel %vm2059_vm15, %v2040_v2, %v4218_v49  ;;  %v2865_v2 = vld [vmem:[%s3350_s14 + $0x20] sm:$0xff] }
 0x28e   : > { %v2675_v61 = vpop.f32.mrf.mxu2  ;;  %v2170_v17 = vsel %vm2157_vm4, %v2137_v16, %v1572_v27  ;;  %v995_v27 = vld [vmem:[#allocation2 + $0x152] sm:$0xff]  ;;  %v2106_v53 = vsel %vm2092_vm3, %v2073_v47, %v5288_v28 }
 0x28f   : > { %v2676_v19 = vadd.f32 %v4416_v14, %v2675_v61  ;;  %v4582_v6 = vpop.permute.xlu2 %1703 }
 0x290   : > { %v1954_v0 = vpop.permute.xlu1 %1953 }
 0x291   : > { %vm2767_vm14 = vcmp.ge.f32.partialorder %v2676_v19, 1.0  ;;  %v2268_v60 = vsel %vm2256_vm8, %v2235_v30, %v1954_v0  ;;  %v5289_v19 = vld [vmem:[#allocation21_spill] sm:$0xff] }
 0x292   : > { %v3183_v13 = vsel %vm2767_vm14, 1.0, %v5261_v37  ;;  %3096 = vmatmul.msk.f32.gmra.mxu1 %vm2289_vm9, %v2268_v60 }
 0x293   : > { %v2895_v55 = vadd.f32 %v3183_v13, %v2863_v33  ;;  %1341 = vrot.lane.b32.xlu0 %v4501_v35, %s3277_s20  ;;  %v5290_v13 = vld [vmem:[#allocation26_spill] sm:$0xff] }
 0x295   : > { %2927 = vst.msk [vmem:[%s4437_s9 + $0x10] sm:$0xff] %vm319_vm0, %v2895_v55  ;;  %v1702_v40 = vpop.permute.xlu0 %1701  ;;  %1455 = vrot.lane.b32.xlu2 %v5281_v54, %s3276_s19  ;;  %1723 = vrot.lane.b32.xlu1 %v4594_v48, %s3280_s23 }
 0x297   : > { %v4608_v15 = vpop.permute.xlu2 %1449 }
 0x298   : > { %v1700_v46 = vpop.permute.xlu1 %1699 }
 0x299   : > { %v2203_v29 = vsel %vm2190_vm5, %v2170_v17, %v1700_v46  ;;  %v2678_v52 = vpop.f32.mrf.mxu2  ;;  %v5293_v46 = vld [vmem:[#allocation31_spill] sm:$0xff] }
 0x29a   : > { %v2679_v22 = vadd.f32 %v4416_v14, %v2678_v52  ;;  %v2236_v54 = vsel %vm2223_vm6, %v2203_v29, %v1828_v56 }
 0x29b   : > { %1711 = vrot.lane.b32.xlu0 %v4125_v58, %s3280_s23  ;;  %v2269_v63 = vsel %vm2256_vm8, %v2236_v54, %v1956_v1 }
 0x29c   : > { %vm2768_vm2 = vcmp.ge.f32.partialorder %v2679_v22, 1.0  ;;  %3097 = vmatmul.msk.f32.gmra.mxu1 %vm2289_vm9, %v2269_v63 }
 0x29d   : > { %v3184_v25 = vsel %vm2768_vm2, 1.0, %v5261_v37  ;;  %v1448_v57 = vpop.permute.xlu0 %1447  ;;  %1469 = vrot.lane.b32.xlu2 %v4541_v45, %s3276_s19  ;;  %1979 = vrot.lane.b32.xlu1 %v995_v27, %s3281_s26  ;;  %v4636_v45 = vld [vmem:[#allocation2 + $0x158] sm:$0xff] }
 0x29e   : > { %v2896_v42 = vadd.f32 %v3184_v25, %v2864_v5 }
 0x29f   : > { %v4628_v56 = vpop.permute.xlu2 %1463 }
 0x2a0   : > { %2928 = vst.msk [vmem:[%s4437_s9 + $0x18] sm:$0xff] %vm319_vm0, %v2896_v42  ;;  %v1446_v58 = vpop.permute.xlu1 %1445  ;;  %v2380_v4 = vpop.f32.mrf.mxu1 }
 0x2a1   : > { %v2381_v36 = vadd.f32 %v4149_v20, %v2380_v4  ;;  %v2138_v8 = vsel %vm319_vm0, %v2106_v53, %v1446_v58 }
 0x2a2   : > { %v2171_v1 = vsel %vm2157_vm4, %v2138_v8, %v4548_v3  ;;  %v4654_v3 = vld [vmem:[#allocation2 + $0x15a] sm:$0xff]  ;;  %v2866_v8 = vld [vmem:[%s3350_s14 + $0x28] sm:$0xff] }
 0x2a3   : > { %vm2462_vm7 = vcmp.ge.f32.partialorder %v2381_v36, 1.0  ;;  %1725 = vrot.lane.b32.xlu0 %v4636_v45, %s3280_s23  ;;  %v2204_v0 = vsel %vm2190_vm5, %v2171_v1, %v1702_v40  ;;  %v5292_v40 = vld [vmem:[#allocation33_spill] sm:$0xff] }
 0x2a4   : > { %v3124_v49 = vsel %vm2462_vm7, 1.0, %v5261_v37 }
 0x2a5   : > { %3156 = vmatmul.msk.f32.gmra.mxu2 %vm625_vm1, %v3124_v49  ;;  %v1832_v61 = vpop.permute.xlu0 %1831  ;;  %1839 = vrot.lane.b32.xlu2 %v5289_v19, %s3279_s22  ;;  %v5296_v19 = vld [vmem:[#allocation29_spill] sm:$0xff] }
 0x2a6   : > { %1583 = vrot.lane.b32.xlu1 %v4132_v11, %s3278_s21  ;;  %v5291_v11 = vld [vmem:[#allocation15_spill] sm:$0xff] }
 0x2a7   : > { %v4648_v33 = vpop.permute.xlu2 %1833  ;;  %v2041_v55 = vsel %vm625_vm1, %v5291_v11, %v5290_v13 }
 0x2a8   : > { %v1830_v30 = vpop.permute.xlu1 %1829  ;;  %v2074_v39 = vsel %vm2059_vm15, %v2041_v55, %v5292_v40 }
 0x2a9   : > { %v2237_v60 = vsel %vm2223_vm6, %v2204_v0, %v1830_v30  ;;  %v2107_v29 = vsel %vm2092_vm3, %v2074_v39, %v5293_v46  ;;  %v4706_v0 = vld [vmem:[#allocation2 + $0x168] sm:$0xff] }
 0x2aa   : > { %v2270_v18 = vsel %vm2256_vm8, %v2237_v60, %v4565_v23  ;;  %v2139_v54 = vsel %vm319_vm0, %v2107_v29, %v1448_v57  ;;  %v5294_v57 = vld [vmem:[#allocation20_spill] sm:$0xff]  ;;  %v4732_v29 = vld [vmem:[#allocation2 + $0x16a] sm:$0xff] }
 0x2ab   : > { %3098 = vmatmul.msk.f32.gmra.mxu1 %vm2289_vm9, %v2270_v18  ;;  %1981 = vrot.lane.b32.xlu0 %v4654_v3, %s3281_s26  ;;  %v5297_v18 = vld [vmem:[#allocation27_spill] sm:$0xff] }
 0x2ad   : > { %v1336_v16 = vpop.permute.xlu0 %1335  ;;  %1853 = vrot.lane.b32.xlu2 %v4662_v31, %s3279_s22 }
 0x2ae   : > { %1597 = vrot.lane.b32.xlu1 %v4528_v43, %s3278_s21  ;;  %v2115_v30 = vsel %vm2092_vm3, %v4383_v7, %v1336_v16 }
 0x2af   : > { %v1848_v23 = vpop.permute.xlu2 %1847  ;;  %v2681_v17 = vpop.f32.mrf.mxu2  ;;  %v2147_v7 = vsel %vm319_vm0, %v2115_v30, %v4628_v56 }
 0x2b0   : > { %v1576_v52 = vpop.permute.xlu1 %1575  ;;  %v2682_v22 = vadd.f32 %v4416_v14, %v2681_v17  ;;  %v862_v17 = vld [vmem:[#allocation2 + $0x109] sm:$0xff] }
 0x2b1   : > { %v2172_v5 = vsel %vm2157_vm4, %v2139_v54, %v1576_v52  ;;  %v5298_v52 = vld [vmem:[#allocation24_spill] sm:$0xff] }
 0x2b2   : > { %vm2769_vm10 = vcmp.ge.f32.partialorder %v2682_v22, 1.0  ;;  %v2205_v25 = vsel %vm2190_vm5, %v2172_v5, %v4582_v6  ;;  %v3258_v5 = vld [vmem:[%s5220_s2] ss:$0 sm:$0xff] }
 0x2b3   : > { %v3185_v63 = vsel %vm2769_vm10, 1.0, %v5261_v37  ;;  %1585 = vrot.lane.b32.xlu0 %v5287_v41, %s3278_s21  ;;  %v2238_v4 = vsel %vm2223_vm6, %v2205_v25, %v1832_v61 }
 0x2b4   : > { %v2897_v43 = vadd.f32 %v3185_v63, %v2865_v2 }
 0x2b5   : > { %v1706_v47 = vpop.permute.xlu0 %1705  ;;  %1343 = vrot.lane.b32.xlu2 %v4594_v48, %s3277_s20  ;;  %v861_v48 = vld [vmem:[#allocation2 + $0xf9] sm:$0xff] }
 0x2b6   : > { %2929 = vst.msk [vmem:[%s4437_s9 + $0x20] sm:$0xff] %vm319_vm0, %v2897_v43  ;;  %1967 = vrot.lane.b32.xlu1 %v5294_v57, %s3281_s26  ;;  %v4754_v57 = vld [vmem:[#allocation2 + $0x169] sm:$0xff] }
 0x2b7   : > { %v4687_v42 = vpop.permute.xlu2 %1337 }
 0x2b8   : > { %v1960_v58 = vpop.permute.xlu1 %1959 }
 0x2b9   : > { %v2271_v41 = vsel %vm2256_vm8, %v2238_v4, %v1960_v58 }
 0x2ba   : > { %3099 = vmatmul.msk.f32.gmra.mxu1 %vm2289_vm9, %v2271_v41 }
 0x2bb   : > { %1599 = vrot.lane.b32.xlu0 %v995_v27, %s3278_s21  ;;  %v5295_v27 = vld [vmem:[#allocation25_spill] sm:$0xff] }
 0x2bd   : > { %v1720_v6 = vpop.permute.xlu0 %1719  ;;  %1713 = vrot.lane.b32.xlu2 %v4202_v34, %s3280_s23  ;;  %v2042_v34 = vsel %vm625_vm1, %v4015_v44, %v5296_v19  ;;  %v5299_v19 = vld [vmem:[#allocation34_spill] sm:$0xff] }
 0x2be   : > { %1457 = vrot.lane.b32.xlu1 %v861_v48, %s3276_s19  ;;  %v2684_v28 = vpop.f32.mrf.mxu2  ;;  %v2075_v13 = vsel %vm2059_vm15, %v2042_v34, %v5297_v18  ;;  %v5300_v18 = vld [vmem:[#allocation32_spill] sm:$0xff] }
 0x2bf   : > { %v2685_v53 = vadd.f32 %v4416_v14, %v2684_v28  ;;  %v4697_v36 = vpop.permute.xlu2 %1707  ;;  %v2108_v44 = vsel %vm2092_vm3, %v2075_v13, %v4304_v12  ;;  %v959_v28 = vld [vmem:[#allocation2 + $0x121] sm:$0xff] }
 0x2c0   : > { %v1578_v49 = vpop.permute.xlu1 %1577  ;;  %v2140_v40 = vsel %vm319_vm0, %v2108_v44, %v4608_v15 }
 0x2c1   : > { %vm2770_vm11 = vcmp.ge.f32.partialorder %v2685_v53, 1.0  ;;  %v2173_v16 = vsel %vm2157_vm4, %v2140_v40, %v1578_v49  ;;  %v3259_v53 = vld [vmem:[#allocation2 + $0xc0] sm:$0xff]  ;;  %v2867_v49 = vld [vmem:[%s3350_s14 + $0x30] sm:$0xff] }
 0x2c2   : > { %v3186_v1 = vsel %vm2770_vm11, 1.0, %v5261_v37  ;;  %v2206_v56 = vsel %vm2190_vm5, %v2173_v16, %v1706_v47  ;;  %v894_v47 = vld [vmem:[#allocation2 + $0x10a] sm:$0xff] }
 0x2c3   : > { %v2898_v61 = vadd.f32 %v3186_v1, %v2866_v8  ;;  %1969 = vrot.lane.b32.xlu0 %v5295_v27, %s3281_s26  ;;  %v2043_v8 = vsel %vm625_vm1, %v3259_v53, %v4281_v32 }
 0x2c4   : > { %v2076_v34 = vsel %vm2059_vm15, %v2043_v8, %v5299_v19  ;;  %v895_v8 = vld [vmem:[#allocation2 + $0x112] sm:$0xff] }
 0x2c5   : > { %2930 = vst.msk [vmem:[%s4437_s9 + $0x28] sm:$0xff] %vm319_vm0, %v2898_v61  ;;  %v1976_v60 = vpop.permute.xlu0 %1975  ;;  %1727 = vrot.lane.b32.xlu2 %v4706_v0, %s3280_s23  ;;  %v2109_v13 = vsel %vm2092_vm3, %v2076_v34, %v5300_v18 }
 0x2c6   : > { %1471 = vrot.lane.b32.xlu1 %v4571_v62, %s3276_s19 }
 0x2c7   : > { %v4718_v11 = vpop.permute.xlu2 %1721 }
 0x2c8   : > { %v1592_v55 = vpop.permute.xlu1 %1591 }
 0x2c9   : > { %v2180_v39 = vsel %vm2157_vm4, %v2147_v7, %v1592_v55  ;;  %v523_v54 = vpop.f32.mrf.mxu3  ;;  %v4781_v7 = vld [vmem:[#allocation2 + $0x171] sm:$0xff] }
 0x2ca   : > { %v2213_v62 = vsel %vm2190_vm5, %v2180_v39, %v1720_v6  ;;  %v524_v63 = vadd.f32 %v3258_v5, %v523_v54 }
 0x2cb   : > { %1459 = vrot.lane.b32.xlu0 %v862_v17, %s3276_s19  ;;  %v2246_v46 = vsel %vm2223_vm6, %v2213_v62, %v1848_v23  ;;  %v2239_v23 = vsel %vm2223_vm6, %v2206_v56, %v4648_v33 }
 0x2cc   : > { %v2279_v12 = vsel %vm2256_vm8, %v2246_v46, %v1976_v60  ;;  %vm559_vm12 = vcmp.ge.f32.partialorder %v524_v63, 1.0  ;;  %v2116_v46 = vsel %vm2092_vm3, %v4400_v10, %v4687_v42  ;;  %v4805_v42 = vld [vmem:[#allocation2 + $0x170] sm:$0xff] }
 0x2cd   : > { %3107 = vmatmul.msk.f32.vlgmr.msrb.gmra.mxu3 %vm2289_vm9, %v2279_v12  ;;  %v1580_v15 = vpop.permute.xlu0 %1579  ;;  %1983 = vrot.lane.b32.xlu2 %v4732_v29, %s3281_s26  ;;  %v3083_v25 = vsel %vm559_vm12, 1.0, %v5261_v37 }
 0x2ce   : > { %1841 = vrot.lane.b32.xlu1 %v5298_v52, %s3279_s22  ;;  %712 = vst.msk [vmem:[#allocation2 + $0x181] sm:$0xff] %vm625_vm1, %v3083_v25 }
 0x2cf   : > { %v4740_v22 = vpop.permute.xlu2 %1977 }
 0x2d0   : > { %v1962_v2 = vpop.permute.xlu1 %1961 }
 0x2d1   : > { %v2272_v43 = vsel %vm2256_vm8, %v2239_v23, %v1962_v2 }
 0x2d2   : > { %3100 = vmatmul.msk.f32.gmra.mxu1 %vm2289_vm9, %v2272_v43 }
 0x2d3   : > { %1473 = vrot.lane.b32.xlu0 %v4662_v31, %s3276_s19  ;;  %v526_v4 = vpop.f32.mrf.mxu3 }
 0x2d4   : > { %v527_v6 = vadd.f32 %v3258_v5, %v526_v4  ;;  %v3260_v4 = vld [vmem:[#allocation2 + $0xc8] sm:$0xff] }
 0x2d5   : > { %v1594_v33 = vpop.permute.xlu0 %1593  ;;  %1587 = vrot.lane.b32.xlu2 %v894_v47, %s3278_s21  ;;  %v967_v18 = vld [vmem:[#allocation2 + $0x181] sm:$0xff] }
 0x2d6   : > { %1855 = vrot.lane.b32.xlu1 %v4754_v57, %s3279_s22  ;;  %vm560_vm13 = vcmp.ge.f32.partialorder %v527_v6, 1.0  ;;  %v5302_v6 = vld [vmem:[#allocation37_spill] sm:$0xff] }
 0x2d7   : > { %v4758_v58 = vpop.permute.xlu2 %1581  ;;  %v3084_v1 = vsel %vm560_vm13, 1.0, %v5261_v37 }
 0x2d8   : > { %v1452_v41 = vpop.permute.xlu1 %1451  ;;  %713 = vst.msk [vmem:[#allocation2 + $0x189] sm:$0xff] %vm625_vm1, %v3084_v1 }
 0x2d9   : > { %v2687_v31 = vpop.f32.mrf.mxu2  ;;  %v2141_v44 = vsel %vm319_vm0, %v2109_v13, %v1452_v41  ;;  %v5301_v41 = vld [vmem:[#allocation30_spill] sm:$0xff] }
 0x2da   : > { %v2688_v48 = vadd.f32 %v4416_v14, %v2687_v31  ;;  %v2174_v55 = vsel %vm2157_vm4, %v2141_v44, %v1580_v15 }
 0x2db   : > { %1843 = vrot.lane.b32.xlu0 %v959_v28, %s3279_s22  ;;  %v2207_v62 = vsel %vm2190_vm5, %v2174_v55, %v4697_v36  ;;  %v863_v36 = vld [vmem:[#allocation2 + $0x111] sm:$0xff] }
 0x2dc   : > { %vm2771_vm14 = vcmp.ge.f32.partialorder %v2688_v48, 1.0  ;;  %v960_v48 = vld [vmem:[#allocation2 + $0x129] sm:$0xff] }
 0x2dd   : > { %v3187_v61 = vsel %vm2771_vm14, 1.0, %v5261_v37  ;;  %v1964_v27 = vpop.permute.xlu0 %1963  ;;  %1601 = vrot.lane.b32.xlu2 %v4654_v3, %s3278_s21  ;;  %v991_v3 = vld [vmem:[#allocation2 + $0x122] sm:$0xff] }
 0x2de   : > { %v2899_v30 = vadd.f32 %v3187_v61, %v2867_v49  ;;  %1345 = vrot.lane.b32.xlu1 %v4636_v45, %s3277_s20 }
 0x2df   : > { %v4774_v32 = vpop.permute.xlu2 %1595  ;;  %v999_v19 = vld [vmem:[#allocation2 + $0x182] sm:$0xff] }
 0x2e0   : > { %2931 = vst.msk [vmem:[%s4437_s9 + $0x30] sm:$0xff] %vm319_vm0, %v2899_v30  ;;  %v1466_v60 = vpop.permute.xlu1 %1465 }
 0x2e1   : > { %v2148_v56 = vsel %vm319_vm0, %v2116_v46, %v1466_v60 }
 0x2e2   : > { %v2181_v52 = vsel %vm2157_vm4, %v2148_v56, %v1594_v33  ;;  %v4827_v33 = vld [vmem:[#allocation2 + $0x180] sm:$0xff] }
 0x2e3   : > { %1857 = vrot.lane.b32.xlu0 %v4781_v7, %s3279_s22 }
 0x2e5   : > { %v1454_v40 = vpop.permute.xlu0 %1453  ;;  %1971 = vrot.lane.b32.xlu2 %v991_v3, %s3281_s26 }
 0x2e6   : > { %1715 = vrot.lane.b32.xlu1 %v4379_v26, %s3280_s23 }
 0x2e7   : > { %v2383_v45 = vpop.f32.mrf.mxu1  ;;  %v1966_v39 = vpop.permute.xlu2 %1965 }
 0x2e8   : > { %v2384_v16 = vadd.f32 %v4149_v20, %v2383_v45  ;;  %v1836_v17 = vpop.permute.xlu1 %1835 }
 0x2e9   : > { %v2240_v12 = vsel %vm2223_vm6, %v2207_v62, %v1836_v17  ;;  %v992_v17 = vld [vmem:[#allocation2 + $0x12a] sm:$0xff] }
 0x2ea   : > { %vm2463_vm2 = vcmp.ge.f32.partialorder %v2384_v16, 1.0  ;;  %v2273_v15 = vsel %vm2256_vm8, %v2240_v12, %v1964_v27 }
 0x2eb   : > { %3101 = vmatmul.msk.f32.gmra.mxu1 %vm2289_vm9, %v2273_v15  ;;  %1347 = vrot.lane.b32.xlu0 %v4706_v0, %s3277_s20  ;;  %v3125_v26 = vsel %vm2463_vm2, 1.0, %v5261_v37  ;;  %v2214_v0 = vsel %vm2190_vm5, %v2181_v52, %v4718_v11  ;;  %v998_v11 = vld [vmem:[#allocation2 + $0x172] sm:$0xff] }
 0x2ec   : > { %3157 = vmatmul.msk.f32.gmra.mxu2 %vm625_vm1, %v3125_v26  ;;  %v968_v26 = vld [vmem:[#allocation2 + $0x189] sm:$0xff] }
 0x2ed   : > { %v1468_v10 = vpop.permute.xlu0 %1467  ;;  %1461 = vrot.lane.b32.xlu2 %v863_v36, %s3276_s19 }
 0x2ee   : > { %1729 = vrot.lane.b32.xlu1 %v4805_v42, %s3280_s23 }
 0x2ef   : > { %v4809_v54 = vpop.permute.xlu2 %1455 }
 0x2f0   : > { %v1850_v2 = vpop.permute.xlu1 %1849 }
 0x2f1   : > { %v2247_v23 = vsel %vm2223_vm6, %v2214_v0, %v1850_v2  ;;  %v2386_v5 = vpop.f32.mrf.mxu1 }
 0x2f2   : > { %v2387_v63 = vadd.f32 %v4149_v20, %v2386_v5  ;;  %v2280_v43 = vsel %vm2256_vm8, %v2247_v23, %v4740_v22  ;;  %v3262_v23 = vld [vmem:[#allocation2 + $0xd8] sm:$0xff] }
 0x2f3   : > { %3108 = vmatmul.msk.f32.gmra.mxu3 %vm2289_vm9, %v2280_v43  ;;  %1717 = vrot.lane.b32.xlu0 %v4440_v21, %s3280_s23  ;;  %v2044_v21 = vsel %vm625_vm1, %v3260_v4, %v5301_v41  ;;  %v5303_v5 = vld [vmem:[#allocation36_spill] sm:$0xff] }
 0x2f4   : > { %vm2464_vm7 = vcmp.ge.f32.partialorder %v2387_v63, 1.0  ;;  %v2077_v31 = vsel %vm2059_vm15, %v2044_v21, %v5302_v6  ;;  %v2045_v63 = vsel %vm625_vm1, %v3262_v23, %v5303_v5  ;;  %v1001_v21 = vld [vmem:[#allocation2 + $0x19a] sm:$0xff] }
 0x2f5   : > { %v1838_v25 = vpop.permute.xlu0 %1837  ;;  %1475 = vrot.lane.b32.xlu2 %v4754_v57, %s3276_s19  ;;  %v3126_v47 = vsel %vm2464_vm7, 1.0, %v5261_v37  ;;  %v2110_v57 = vsel %vm2092_vm3, %v2077_v31, %v4313_v9  ;;  %v4848_v9 = vld [vmem:[%s5222_s4] ss:$0 sm:$0xff] }
 0x2f6   : > { %1985 = vrot.lane.b32.xlu1 %v998_v11, %s3281_s26  ;;  %3158 = vmatmul.msk.f32.gmra.mxu2 %vm625_vm1, %v3126_v47  ;;  %v2142_v28 = vsel %vm319_vm0, %v2110_v57, %v1454_v40  ;;  %v5304_v47 = vld [vmem:[#allocation35_spill] sm:$0xff] }
 0x2f7   : > { %v4825_v20 = vpop.permute.xlu2 %1469  ;;  %v2175_v1 = vsel %vm2157_vm4, %v2142_v28, %v4758_v58  ;;  %v969_v28 = vld [vmem:[#allocation2 + $0x199] sm:$0xff] }
 0x2f8   : > { %v1340_v22 = vpop.permute.xlu1 %1339 }
 0x2f9   : > { %v2117_v3 = vsel %vm2092_vm3, %v4395_v50, %v1340_v22  ;;  %v2078_v22 = vsel %vm2059_vm15, %v2045_v63, %v5304_v47 }
 0x2fa   : > { %v2149_v45 = vsel %vm319_vm0, %v2117_v3, %v1468_v10  ;;  %v2111_v4 = vsel %vm2092_vm3, %v2078_v22, %v4351_v38 }
 0x2fb   : > { %1731 = vrot.lane.b32.xlu0 %v4827_v33, %s3280_s23  ;;  %v2143_v6 = vsel %vm319_vm0, %v2111_v4, %v4809_v54 }
 0x2fd   : > { %v1852_v53 = vpop.permute.xlu0 %1851  ;;  %1845 = vrot.lane.b32.xlu2 %v960_v48, %s3279_s22 }
 0x2fe   : > { %1589 = vrot.lane.b32.xlu1 %v895_v8, %s3278_s21 }
 0x2ff   : > { %v4840_v49 = vpop.permute.xlu2 %1839 }
 0x300   : > { %v1710_v61 = vpop.permute.xlu1 %1709  ;;  %v2389_v27 = vpop.f32.mrf.mxu1 }
 0x301   : > { %v2208_v34 = vsel %vm2190_vm5, %v2175_v1, %v1710_v61  ;;  %v2390_v30 = vadd.f32 %v4848_v9, %v2389_v27 }
 0x302   : > { %v2241_v60 = vsel %vm2223_vm6, %v2208_v34, %v1838_v25 }
 0x303   : > { %vm2465_vm10 = vcmp.ge.f32.partialorder %v2390_v30, 1.0  ;;  %1987 = vrot.lane.b32.xlu0 %v999_v19, %s3281_s26  ;;  %v2274_v58 = vsel %vm2256_vm8, %v2241_v60, %v1966_v39  ;;  %v2182_v39 = vsel %vm2157_vm4, %v2149_v45, %v4774_v32  ;;  %v1000_v32 = vld [vmem:[#allocation2 + $0x18a] sm:$0xff] }
 0x304   : > { %3102 = vmatmul.msk.f32.gmra.mxu1 %vm2289_vm9, %v2274_v58  ;;  %v3127_v13 = vsel %vm2465_vm10, 1.0, %v5261_v37 }
 0x305   : > { %3159 = vmatmul.msk.f32.gmra.mxu2 %vm625_vm1, %v3127_v13  ;;  %v1342_v44 = vpop.permute.xlu0 %1341  ;;  %1859 = vrot.lane.b32.xlu2 %v967_v18, %s3279_s22 }
 0x306   : > { %1603 = vrot.lane.b32.xlu1 %v4732_v29, %s3278_s21  ;;  %v2118_v43 = vsel %vm2092_vm3, %v4447_v24, %v1342_v44 }
 0x307   : > { %v1854_v55 = vpop.permute.xlu2 %1853  ;;  %v2150_v41 = vsel %vm319_vm0, %v2118_v43, %v4825_v20 }
 0x308   : > { %v1724_v40 = vpop.permute.xlu1 %1723 }
 0x309   : > { %v2215_v16 = vsel %vm2190_vm5, %v2182_v39, %v1724_v40  ;;  %v3263_v40 = vld [vmem:[#allocation2 + $0xe0] sm:$0xff] }
 0x30a   : > { %v2248_v56 = vsel %vm2223_vm6, %v2215_v16, %v1852_v53  ;;  %v2046_v45 = vsel %vm625_vm1, %v3263_v40, %v4324_v51  ;;  %v970_v16 = vld [vmem:[#allocation2 + $0x1a1] sm:$0xff] }
 0x30b   : > { %1605 = vrot.lane.b32.xlu0 %v998_v11, %s3278_s21 }
 0x30d   : > { %v1712_v62 = vpop.permute.xlu0 %1711  ;;  %1477 = vrot.lane.b32.xlu2 %v4781_v7, %s3276_s19 }
 0x30e   : > { %1973 = vrot.lane.b32.xlu1 %v992_v17, %s3281_s26 }
 0x30f   : > { %v2392_v50 = vpop.f32.mrf.mxu1  ;;  %v4870_v29 = vpop.permute.xlu2 %1343 }
 0x310   : > { %v2393_v46 = vadd.f32 %v4848_v9, %v2392_v50  ;;  %v1980_v12 = vpop.permute.xlu1 %1979  ;;  %v2119_v23 = vsel %vm2092_vm3, %v4477_v59, %v4870_v29 }
 0x311   : > { %v2281_v15 = vsel %vm2256_vm8, %v2248_v56, %v1980_v12 }
 0x312   : > { %vm2466_vm11 = vcmp.ge.f32.partialorder %v2393_v46, 1.0  ;;  %3109 = vmatmul.msk.f32.gmra.mxu3 %vm2289_vm9, %v2281_v15  ;;  %v5306_v15 = vld [vmem:[#allocation39_spill] sm:$0xff] }
 0x313   : > { %1989 = vrot.lane.b32.xlu0 %v1000_v32, %s3281_s26  ;;  %v3128_v7 = vsel %vm2466_vm11, 1.0, %v5261_v37 }
 0x314   : > { %3160 = vmatmul.msk.f32.gmra.mxu2 %vm625_vm1, %v3128_v7 }
 0x315   : > { %v1726_v36 = vpop.permute.xlu0 %1725  ;;  %1861 = vrot.lane.b32.xlu2 %v968_v26, %s3279_s22 }
 0x316   : > { %1349 = vrot.lane.b32.xlu1 %v4805_v42, %s3277_s20  ;;  %v936_v42 = vld [vmem:[#allocation2 + $0x188] sm:$0xff] }
 0x317   : > { %v4882_v10 = vpop.permute.xlu2 %1713 }
 0x318   : > { %v1584_v52 = vpop.permute.xlu1 %1583 }
 0x319   : > { %v2395_v0 = vpop.f32.mrf.mxu1  ;;  %v2176_v57 = vsel %vm2157_vm4, %v2143_v6, %v1584_v52 }
 0x31a   : > { %v2396_v2 = vadd.f32 %v4848_v9, %v2395_v0  ;;  %v2209_v8 = vsel %vm2190_vm5, %v2176_v57, %v1712_v62  ;;  %v5305_v62 = vld [vmem:[#allocation38_spill] sm:$0xff] }
 0x31b   : > { %1607 = vrot.lane.b32.xlu0 %v999_v19, %s3278_s21  ;;  %v2242_v27 = vsel %vm2223_vm6, %v2209_v8, %v4840_v49  ;;  %v2079_v17 = vsel %vm2059_vm15, %v2046_v45, %v5305_v62  ;;  %v5308_v8 = vld [vmem:[#allocation4_spill] sm:$0xff]  ;;  %v742_v62 = vld [vmem:[#allocation2 + $0x150] sm:$0xff] }
 0x31c   : > { %vm2467_vm12 = vcmp.ge.f32.partialorder %v2396_v2, 1.0 }
 0x31d   : > { %v1982_v25 = vpop.permute.xlu0 %1981  ;;  %1479 = vrot.lane.b32.xlu2 %v967_v18, %s3276_s19  ;;  %v3129_v11 = vsel %vm2467_vm12, 1.0, %v5261_v37  ;;  %v2868_v18 = vld [vmem:[%s3350_s14 + $0x38] sm:$0xff] }
 0x31e   : > { %1733 = vrot.lane.b32.xlu1 %v936_v42, %s3280_s23  ;;  %3161 = vmatmul.msk.f32.gmra.mxu2 %vm625_vm1, %v3129_v11 }
 0x31f   : > { %v4905_v53 = vpop.permute.xlu2 %1727 }
 0x320   : > { %v1598_v24 = vpop.permute.xlu1 %1597 }
 0x321   : > { %v2183_v31 = vsel %vm2157_vm4, %v2150_v41, %v1598_v24 }
 0x322   : > { %v2216_v48 = vsel %vm2190_vm5, %v2183_v31, %v1726_v36  ;;  %v5307_v31 = vld [vmem:[#allocation40_spill] sm:$0xff] }
 0x323   : > { %1991 = vrot.lane.b32.xlu0 %v1001_v21, %s3281_s26  ;;  %v2249_v38 = vsel %vm2223_vm6, %v2216_v48, %v1854_v55  ;;  %v1002_v55 = vld [vmem:[#allocation2 + $0x1a2] sm:$0xff] }
 0x324   : > { %v2282_v20 = vsel %vm2256_vm8, %v2249_v38, %v1982_v25 }
 0x325   : > { %3110 = vmatmul.msk.f32.gmra.mxu3 %vm2289_vm9, %v2282_v20  ;;  %v1586_v54 = vpop.permute.xlu0 %1585  ;;  %1863 = vrot.lane.b32.xlu2 %v969_v28, %s3279_s22 }
 0x326   : > { %1351 = vrot.lane.b32.xlu1 %v4827_v33, %s3277_s20  ;;  %v937_v33 = vld [vmem:[#allocation2 + $0x198] sm:$0xff] }
 0x327   : > { %v1984_v13 = vpop.permute.xlu2 %1983 }
 0x328   : > { %v1968_v1 = vpop.permute.xlu1 %1967  ;;  %v2398_v61 = vpop.f32.mrf.mxu1 }
 0x329   : > { %v2399_v19 = vadd.f32 %v4848_v9, %v2398_v61  ;;  %v2690_v34 = vpop.f32.mrf.mxu2  ;;  %v2275_v30 = vsel %vm2256_vm8, %v2242_v27, %v1968_v1  ;;  %v5309_v27 = vld [vmem:[#allocation3_spill] sm:$0xff] }
 0x32a   : > { %v2691_v60 = vadd.f32 %v4416_v14, %v2690_v34  ;;  %3103 = vmatmul.msk.f32.gmra.mxu1 %vm2289_vm9, %v2275_v30 }
 0x32b   : > { %vm2468_vm13 = vcmp.ge.f32.partialorder %v2399_v19, 1.0  ;;  %1609 = vrot.lane.b32.xlu0 %v1000_v32, %s3278_s21  ;;  %v2112_v32 = vsel %vm2092_vm3, %v2079_v17, %v5306_v15  ;;  %v4988_v17 = vld [vmem:[%s5224_s6] ss:$0 sm:$0xff] }
 0x32c   : > { %vm2772_vm14 = vcmp.ge.f32.partialorder %v2691_v60, 1.0  ;;  %v3130_v58 = vsel %vm2468_vm13, 1.0, %v5261_v37  ;;  %v2869_v15 = vld [vmem:[%s3350_s14 + $0x40] sm:$0xff] }
 0x32d   : > { %v3188_v49 = vsel %vm2772_vm14, 1.0, %v5261_v37  ;;  %3162 = vmatmul.msk.f32.gmra.mxu2 %vm625_vm1, %v3130_v58  ;;  %v1600_v44 = vpop.permute.xlu0 %1599  ;;  %1481 = vrot.lane.b32.xlu2 %v968_v26, %s3276_s19  ;;  %v938_v26 = vld [vmem:[#allocation2 + $0x1a0] sm:$0xff] }
 0x32e   : > { %v2900_v3 = vadd.f32 %v3188_v49, %v2868_v18  ;;  %1735 = vrot.lane.b32.xlu1 %v937_v33, %s3280_s23 }
 0x32f   : > { %v1588_v50 = vpop.permute.xlu2 %1587 }
 0x330   : > { %2932 = vst.msk [vmem:[%s4437_s9 + $0x38] sm:$0xff] %vm319_vm0, %v2900_v3  ;;  %v1458_v14 = vpop.permute.xlu1 %1457 }
 0x331   : > { %v2144_v51 = vsel %vm319_vm0, %v2112_v32, %v1458_v14 }
 0x332   : > { %v2177_v36 = vsel %vm2157_vm4, %v2144_v51, %v1586_v54  ;;  %v2054_v54 = vsel %vm625_vm1, %v4501_v35, %v5308_v8  ;;  %v5313_v8 = vld [vmem:[#allocation5_spill] sm:$0xff] }
 0x333   : > { %1993 = vrot.lane.b32.xlu0 %v1002_v55, %s3281_s26  ;;  %v2210_v0 = vsel %vm2190_vm5, %v2177_v36, %v4882_v10  ;;  %v2087_v19 = vsel %vm2059_vm15, %v2054_v54, %v5309_v27  ;;  %v5314_v27 = vld [vmem:[#allocation8_spill] sm:$0xff] }
 0x335   : > { %v1970_v39 = vpop.permute.xlu0 %1969  ;;  %1865 = vrot.lane.b32.xlu2 %v970_v16, %s3279_s22 }
 0x336   : > { %1353 = vrot.lane.b32.xlu1 %v936_v42, %s3277_s20 }
 0x337   : > { %v2401_v46 = vpop.f32.mrf.mxu1  ;;  %v1602_v5 = vpop.permute.xlu2 %1601 }
 0x338   : > { %v2402_v12 = vadd.f32 %v4848_v9, %v2401_v46  ;;  %v1472_v56 = vpop.permute.xlu1 %1471 }
 0x339   : > { %v2151_v43 = vsel %vm319_vm0, %v2119_v23, %v1472_v56 }
 0x33a   : > { %vm2469_vm2 = vcmp.ge.f32.partialorder %v2402_v12, 1.0  ;;  %v2184_v42 = vsel %vm2157_vm4, %v2151_v43, %v1600_v44  ;;  %v5310_v12 = vld [vmem:[#allocation7_spill] sm:$0xff] }
 0x33b   : > { %v3131_v7 = vsel %vm2469_vm2, 1.0, %v5261_v37  ;;  %v2217_v10 = vsel %vm2190_vm5, %v2184_v42, %v4905_v53  ;;  %v2055_v56 = vsel %vm625_vm1, %v742_v62, %v5310_v12  ;;  %v5316_v12 = vld [vmem:[#allocation11_spill] sm:$0xff] }
 0x33c   : > { %3163 = vmatmul.msk.f32.gmra.mxu2 %vm625_vm1, %v3131_v7  ;;  %v5311_v7 = vld [vmem:[#allocation6_spill] sm:$0xff] }
 0x33d   : > { %v1460_v52 = vpop.permute.xlu0 %1459 }
 0x33e   : > { %1737 = vrot.lane.b32.xlu1 %v938_v26, %s3280_s23  ;;  %v2145_v57 = vsel %vm319_vm0, %v5307_v31, %v1460_v52  ;;  %v2088_v26 = vsel %vm2059_vm15, %v2055_v56, %v5311_v7 }
 0x33f   : > { %v1972_v29 = vpop.permute.xlu2 %1971  ;;  %v2178_v53 = vsel %vm2157_vm4, %v2145_v57, %v1588_v50 }
 0x340   : > { %v1842_v2 = vpop.permute.xlu1 %1841 }
 0x341   : > { %v2243_v63 = vsel %vm2223_vm6, %v2210_v0, %v1842_v2 }
 0x342   : > { %v2276_v25 = vsel %vm2256_vm8, %v2243_v63, %v1970_v39 }
 0x343   : > { %3104 = vmatmul.msk.f32.gmra.mxu1 %vm2289_vm9, %v2276_v25 }
 0x345   : > { %v1474_v11 = vpop.permute.xlu0 %1473 }
 0x347   : > { %v1462_v48 = vpop.permute.xlu2 %1461 }
 0x348   : > { %v1856_v47 = vpop.permute.xlu1 %1855 }
 0x349   : > { %v2250_v22 = vsel %vm2223_vm6, %v2217_v10, %v1856_v47  ;;  %v2870_v47 = vld [vmem:[%s3350_s14 + $0x48] sm:$0xff] }
 0x34a   : > { %v2283_v59 = vsel %vm2256_vm8, %v2250_v22, %v1984_v13 }
 0x34b   : > { %3111 = vmatmul.msk.f32.gmra.mxu3 %vm2289_vm9, %v2283_v59 }
 0x34d   : > { %v1844_v4 = vpop.permute.xlu0 %1843 }
 0x34f   : > { %v2404_v41 = vpop.f32.mrf.mxu1  ;;  %v1476_v60 = vpop.permute.xlu2 %1475 }
 0x350   : > { %v2405_v24 = vadd.f32 %v4848_v9, %v2404_v41  ;;  %v1346_v21 = vpop.permute.xlu1 %1345 }
 0x351   : > { %v2120_v30 = vsel %vm2092_vm3, %v2087_v19, %v1346_v21 }
 0x352   : > { %vm2470_vm7 = vcmp.ge.f32.partialorder %v2405_v24, 1.0  ;;  %v2152_v33 = vsel %vm319_vm0, %v2120_v30, %v1474_v11 }
 0x353   : > { %v3132_v6 = vsel %vm2470_vm7, 1.0, %v5261_v37  ;;  %v2185_v58 = vsel %vm2157_vm4, %v2152_v33, %v1602_v5  ;;  %v5312_v5 = vld [vmem:[#allocation41_spill] sm:$0xff] }
 0x354   : > { %3164 = vmatmul.msk.f32.gmra.mxu2 %vm625_vm1, %v3132_v6  ;;  %v2146_v63 = vsel %vm319_vm0, %v5312_v5, %v1462_v48 }
 0x355   : > { %v1858_v28 = vpop.permute.xlu0 %1857 }
 0x357   : > { %v1846_v14 = vpop.permute.xlu2 %1845 }
 0x358   : > { %v1716_v38 = vpop.permute.xlu1 %1715 }
 0x359   : > { %v2211_v20 = vsel %vm2190_vm5, %v2178_v53, %v1716_v38  ;;  %v743_v38 = vld [vmem:[#allocation2 + $0x158] sm:$0xff] }
 0x35a   : > { %v2244_v1 = vsel %vm2223_vm6, %v2211_v20, %v1844_v4  ;;  %v2056_v54 = vsel %vm625_vm1, %v743_v38, %v5313_v8 }
 0x35b   : > { %v2277_v61 = vsel %vm2256_vm8, %v2244_v1, %v1972_v29  ;;  %v2089_v19 = vsel %vm2059_vm15, %v2056_v54, %v5314_v27 }
 0x35c   : > { %3105 = vmatmul.msk.f32.gmra.mxu1 %vm2289_vm9, %v2277_v61 }
 0x35d   : > { %v1348_v34 = vpop.permute.xlu0 %1347 }
 0x35e   : > { %v2121_v52 = vsel %vm2092_vm3, %v2088_v26, %v1348_v34 }
 0x35f   : > { %v1860_v32 = vpop.permute.xlu2 %1859  ;;  %v2153_v2 = vsel %vm319_vm0, %v2121_v52, %v1476_v60 }
 0x360   : > { %v1730_v18 = vpop.permute.xlu1 %1729 }
 0x361   : > { %v2218_v35 = vsel %vm2190_vm5, %v2185_v58, %v1730_v18  ;;  %v2871_v18 = vld [vmem:[%s3350_s14 + $0x50] sm:$0xff] }
 0x362   : > { %v2251_v3 = vsel %vm2223_vm6, %v2218_v35, %v1858_v28 }
 0x365   : > { %v1718_v13 = vpop.permute.xlu0 %1717 }
 0x367   : > { %v1478_v29 = vpop.permute.xlu2 %1477 }
 0x368   : > { %v1986_v49 = vpop.permute.xlu1 %1985  ;;  %v2407_v44 = vpop.f32.mrf.mxu1 }
 0x369   : > { %v2408_v55 = vadd.f32 %v4848_v9, %v2407_v44  ;;  %v2284_v40 = vsel %vm2256_vm8, %v2251_v3, %v1986_v49 }
 0x36a   : > { %3112 = vmatmul.msk.f32.gmra.mxu3 %vm2289_vm9, %v2284_v40 }
 0x36b   : > { %vm2471_vm10 = vcmp.ge.f32.partialorder %v2408_v55, 1.0 }
 0x36c   : > { %v3133_v45 = vsel %vm2471_vm10, 1.0, %v5261_v37 }
 0x36d   : > { %3165 = vmatmul.msk.f32.gmra.mxu2 %vm625_vm1, %v3133_v45  ;;  %v1732_v39 = vpop.permute.xlu0 %1731  ;;  %v744_v45 = vld [vmem:[#allocation2 + $0x168] sm:$0xff] }
 0x36f   : > { %v2693_v16 = vpop.f32.mrf.mxu2  ;;  %v1862_v20 = vpop.permute.xlu2 %1861 }
 0x370   : > { %v2694_v50 = vadd.f32 %v4988_v17, %v2693_v16  ;;  %v1590_v46 = vpop.permute.xlu1 %1589 }
 0x371   : > { %v2179_v42 = vsel %vm2157_vm4, %v2146_v63, %v1590_v46 }
 0x372   : > { %vm2773_vm11 = vcmp.ge.f32.partialorder %v2694_v50, 1.0  ;;  %v2212_v4 = vsel %vm2190_vm5, %v2179_v42, %v1718_v13 }
 0x373   : > { %v3189_v51 = vsel %vm2773_vm11, 1.0, %v5261_v37  ;;  %v2245_v31 = vsel %vm2223_vm6, %v2212_v4, %v1846_v14 }
 0x374   : > { %v2901_v36 = vadd.f32 %v3189_v51, %v2869_v15  ;;  %v2872_v15 = vld [vmem:[%s3350_s14 + $0x58] sm:$0xff] }
 0x375   : > { %v1988_v0 = vpop.permute.xlu0 %1987 }
 0x376   : > { %2933 = vst.msk [vmem:[%s4437_s9 + $0x40] sm:$0xff] %vm319_vm0, %v2901_v36 }
 0x377   : > { %v1480_v3 = vpop.permute.xlu2 %1479 }
 0x378   : > { %v1604_v23 = vpop.permute.xlu1 %1603 }
 0x379   : > { %v2186_v43 = vsel %vm2157_vm4, %v2153_v2, %v1604_v23  ;;  %v2696_v25 = vpop.f32.mrf.mxu2 }
 0x37a   : > { %v2219_v11 = vsel %vm2190_vm5, %v2186_v43, %v1732_v39  ;;  %v2697_v10 = vadd.f32 %v4988_v17, %v2696_v25  ;;  %v5315_v39 = vld [vmem:[#allocation10_spill] sm:$0xff]  ;;  %v2873_v25 = vld [vmem:[%s3350_s14 + $0x60] sm:$0xff] }
 0x37b   : > { %v2252_v22 = vsel %vm2223_vm6, %v2219_v11, %v1860_v32  ;;  %v2057_v16 = vsel %vm625_vm1, %v744_v45, %v5315_v39  ;;  %v745_v11 = vld [vmem:[#allocation2 + $0x170] sm:$0xff] }
 0x37c   : > { %vm2774_vm12 = vcmp.ge.f32.partialorder %v2697_v10, 1.0  ;;  %v2285_v59 = vsel %vm2256_vm8, %v2252_v22, %v1988_v0  ;;  %v2090_v56 = vsel %vm2059_vm15, %v2057_v16, %v5316_v12  ;;  %v2876_v12 = vld [vmem:[%s3350_s14 + $0x78] sm:$0xff] }
 0x37d   : > { %v3190_v41 = vsel %vm2774_vm12, 1.0, %v5261_v37  ;;  %3113 = vmatmul.msk.f32.gmra.mxu3 %vm2289_vm9, %v2285_v59  ;;  %v1606_v21 = vpop.permute.xlu0 %1605 }
 0x37e   : > { %v2902_v24 = vadd.f32 %v3190_v41, %v2870_v47  ;;  %v5317_v47 = vld [vmem:[#allocation14_spill] sm:$0xff] }
 0x37f   : > { %v1864_v7 = vpop.permute.xlu2 %1863  ;;  %v2058_v22 = vsel %vm625_vm1, %v745_v11, %v5317_v47 }
 0x380   : > { %2934 = vst.msk [vmem:[%s4437_s9 + $0x48] sm:$0xff] %vm319_vm0, %v2902_v24  ;;  %v1974_v6 = vpop.permute.xlu1 %1973 }
 0x381   : > { %v2410_v57 = vpop.f32.mrf.mxu1  ;;  %v2278_v48 = vsel %vm2256_vm8, %v2245_v31, %v1974_v6  ;;  %v5318_v6 = vld [vmem:[#allocation13_spill] sm:$0xff] }
 0x382   : > { %v2411_v28 = vadd.f32 %v4848_v9, %v2410_v57  ;;  %3106 = vmatmul.msk.f32.gmra.mxu1 %vm2289_vm9, %v2278_v48  ;;  %v2091_v31 = vsel %vm2059_vm15, %v2058_v22, %v5318_v6 }
 0x384   : > { %vm2472_vm13 = vcmp.ge.f32.partialorder %v2411_v28, 1.0 }
 0x385   : > { %v3134_v53 = vsel %vm2472_vm13, 1.0, %v5261_v37  ;;  %v1990_v34 = vpop.permute.xlu0 %1989 }
 0x386   : > { %3166 = vmatmul.msk.f32.gmra.mxu2 %vm625_vm1, %v3134_v53  ;;  %v5067_v53 = vpop.f32.mrf.mxu3 }
 0x387   : > { %v1482_v59 = vpop.permute.xlu2 %1481  ;;  %v2426_v47 = vadd.f32 %v4848_v9, %v5067_v53 }
 0x388   : > { %v1350_v1 = vpop.permute.xlu1 %1349  ;;  %v2699_v61 = vpop.f32.mrf.mxu2 }
 0x389   : > { %v2700_v30 = vadd.f32 %v4988_v17, %v2699_v61  ;;  %v2122_v60 = vsel %vm2092_vm3, %v2089_v19, %v1350_v1  ;;  %v2874_v19 = vld [vmem:[%s3350_s14 + $0x68] sm:$0xff] }
 0x38a   : > { %v2154_v58 = vsel %vm319_vm0, %v2122_v60, %v1478_v29 }
 0x38b   : > { %vm2775_vm14 = vcmp.ge.f32.partialorder %v2700_v30, 1.0  ;;  %v2187_v13 = vsel %vm2157_vm4, %v2154_v58, %v1606_v21 }
 0x38c   : > { %v3191_v33 = vsel %vm2775_vm14, 1.0, %v5261_v37  ;;  %vm2477_vm14 = vcmp.ge.f32.partialorder %v2426_v47, 1.0 }
 0x38d   : > { %v2903_v35 = vadd.f32 %v3191_v33, %v2871_v18  ;;  %v1608_v55 = vpop.permute.xlu0 %1607 }
 0x38e   : > { %v2428_v33 = vpop.f32.mrf.mxu3 }
 0x38f   : > { %2935 = vst.msk [vmem:[%s4437_s9 + $0x50] sm:$0xff] %vm319_vm0, %v2903_v35  ;;  %v1866_v38 = vpop.permute.xlu2 %1865 }
 0x390   : > { %v1734_v49 = vpop.permute.xlu1 %1733 }
 0x391   : > { %v2220_v44 = vsel %vm2190_vm5, %v2187_v13, %v1734_v49 }
 0x392   : > { %v2253_v14 = vsel %vm2223_vm6, %v2220_v44, %v1862_v20  ;;  %v2875_v44 = vld [vmem:[%s3350_s14 + $0x70] sm:$0xff] }
 0x393   : > { %v2286_v40 = vsel %vm2256_vm8, %v2253_v14, %v1990_v34 }
 0x394   : > { %3114 = vmatmul.msk.f32.gmra.mxu3 %vm2289_vm9, %v2286_v40 }
 0x395   : > { %v1992_v36 = vpop.permute.xlu0 %1991 }
 0x396   : > { %v5079_v58 = vpop.f32.mrf.mxu3 }
 0x397   : > { %v2702_v62 = vpop.f32.mrf.mxu2 }
 0x398   : > { %v2703_v50 = vadd.f32 %v4988_v17, %v2702_v62  ;;  %v1352_v46 = vpop.permute.xlu1 %1351 }
 0x399   : > { %v2123_v32 = vsel %vm2092_vm3, %v2090_v56, %v1352_v46 }
 0x39a   : > { %vm2776_vm2 = vcmp.ge.f32.partialorder %v2703_v50, 1.0  ;;  %v2155_v52 = vsel %vm319_vm0, %v2123_v32, %v1480_v3 }
 0x39b   : > { %v3192_v51 = vsel %vm2776_vm2, 1.0, %v5261_v37  ;;  %v2188_v0 = vsel %vm2157_vm4, %v2155_v52, %v1608_v55 }
 0x39c   : > { %v2904_v26 = vadd.f32 %v3192_v51, %v2872_v15 }
 0x39d   : > { %v1610_v4 = vpop.permute.xlu0 %1609 }
 0x39e   : > { %2936 = vst.msk [vmem:[%s4437_s9 + $0x58] sm:$0xff] %vm319_vm0, %v2904_v26 }
 0x3a0   : > { %v1736_v2 = vpop.permute.xlu1 %1735 }
 0x3a1   : > { %v2221_v23 = vsel %vm2190_vm5, %v2188_v0, %v1736_v2  ;;  %v2705_v5 = vpop.f32.mrf.mxu2 }
 0x3a2   : > { %v2706_v63 = vadd.f32 %v4988_v17, %v2705_v5  ;;  %v2254_v43 = vsel %vm2223_vm6, %v2221_v23, %v1864_v7  ;;  %v2877_v23 = vld [vmem:[%s3350_s14 + $0x80] sm:$0xff] }
 0x3a3   : > { %v2287_v42 = vsel %vm2256_vm8, %v2254_v43, %v1992_v36 }
 0x3a4   : > { %vm2777_vm7 = vcmp.ge.f32.partialorder %v2706_v63, 1.0  ;;  %3115 = vmatmul.msk.f32.gmra.mxu3 %vm2289_vm9, %v2287_v42 }
 0x3a5   : > { %v3193_v10 = vsel %vm2777_vm7, 1.0, %v5261_v37  ;;  %v1994_v20 = vpop.permute.xlu0 %1993 }
 0x3a6   : > { %v2905_v29 = vadd.f32 %v3193_v10, %v2873_v25 }
 0x3a7   : > { %v2413_v41 = vpop.f32.mrf.mxu1 }
 0x3a8   : > { %2937 = vst.msk [vmem:[%s4437_s9 + $0x60] sm:$0xff] %vm319_vm0, %v2905_v29  ;;  %v2414_v24 = vadd.f32 %v4848_v9, %v2413_v41  ;;  %v1354_v21 = vpop.permute.xlu1 %1353  ;;  %v5087_v45 = vpop.f32.mrf.mxu3  ;;  %v3139_v41 = vsel %vm2477_vm14, 1.0, %v5261_v37 }
 0x3a9   : > { %v2124_v57 = vsel %vm2092_vm3, %v2091_v31, %v1354_v21 }
 0x3aa   : > { %vm2473_vm10 = vcmp.ge.f32.partialorder %v2414_v24, 1.0  ;;  %v2156_v28 = vsel %vm319_vm0, %v2124_v57, %v1482_v59  ;;  %v2429_v24 = vadd.f32 %v4848_v9, %v2428_v33  ;;  %v2432_v57 = vadd.f32 %v4848_v9, %v5079_v58 }
 0x3ab   : > { %v3135_v48 = vsel %vm2473_vm10, 1.0, %v5261_v37  ;;  %v2189_v8 = vsel %vm2157_vm4, %v2156_v28, %v1610_v4  ;;  %v2878_v4 = vld [vmem:[%s3350_s14 + $0x88] sm:$0xff] }
 0x3ac   : > { %3167 = vmatmul.msk.f32.gmra.mxu2 %vm625_vm1, %v3135_v48  ;;  %vm2478_vm7 = vcmp.ge.f32.partialorder %v2429_v24, 1.0  ;;  %vm2479_vm10 = vcmp.ge.f32.partialorder %v2432_v57, 1.0  ;;  %v2885_v57 = vld [vmem:[%s3350_s14 + $0xc0] sm:$0xff] }
 0x3ad   : > { %v3140_v31 = vsel %vm2478_vm7, 1.0, %v5261_v37  ;;  %v3141_v53 = vsel %vm2479_vm10, 1.0, %v5261_v37 }
 0x3b0   : > { %v1738_v54 = vpop.permute.xlu1 %1737  ;;  %v2708_v1 = vpop.f32.mrf.mxu2 }
 0x3b1   : > { %v2222_v61 = vsel %vm2190_vm5, %v2189_v8, %v1738_v54  ;;  %v2709_v27 = vadd.f32 %v4988_v17, %v2708_v1 }
 0x3b2   : > { %v2255_v34 = vsel %vm2223_vm6, %v2222_v61, %v1866_v38 }
 0x3b3   : > { %vm2778_vm15 = vcmp.ge.f32.partialorder %v2709_v27, 1.0  ;;  %v2288_v30 = vsel %vm2256_vm8, %v2255_v34, %v1994_v20  ;;  %v2435_v20 = vadd.f32 %v4848_v9, %v5087_v45  ;;  %v2879_v34 = vld [vmem:[%s3350_s14 + $0x90] sm:$0xff] }
 0x3b4   : > { %v3194_v60 = vsel %vm2778_vm15, 1.0, %v5261_v37  ;;  %3116 = vmatmul.msk.f32.gmra.mxu3 %vm2289_vm9, %v2288_v30 }
 0x3b5   : > { %v2906_v18 = vadd.f32 %v3194_v60, %v2874_v19 }
 0x3b7   : > { %2938 = vst.msk [vmem:[%s4437_s9 + $0x68] sm:$0xff] %vm319_vm0, %v2906_v18 }
 0x3bf   : > { %v2711_v35 = vpop.f32.mrf.mxu2 }
 0x3c0   : > { %v2712_v13 = vadd.f32 %v4988_v17, %v2711_v35  ;;  %v2416_v49 = vpop.f32.mrf.mxu1 }
 0x3c1   : > { %v2417_v3 = vadd.f32 %v4848_v9, %v2416_v49  ;;  %v2880_v49 = vld [vmem:[%s3350_s14 + $0x98] sm:$0xff] }
 0x3c2   : > { %vm2779_vm3 = vcmp.ge.f32.partialorder %v2712_v13, 1.0 }
 0x3c3   : > { %v3195_v14 = vsel %vm2779_vm3, 1.0, %v5261_v37  ;;  %vm2474_vm4 = vcmp.ge.f32.partialorder %v2417_v3, 1.0  ;;  %vm2480_vm3 = vcmp.ge.f32.partialorder %v2435_v20, 1.0 }
 0x3c4   : > { %v2907_v55 = vadd.f32 %v3195_v14, %v2875_v44  ;;  %v3136_v40 = vsel %vm2474_vm4, 1.0, %v5261_v37  ;;  %v3142_v8 = vsel %vm2480_vm3, 1.0, %v5261_v37 }
 0x3c5   : > { %3168 = vmatmul.msk.f32.gmra.mxu2 %vm625_vm1, %v3136_v40 }
 0x3c6   : > { %2939 = vst.msk [vmem:[%s4437_s9 + $0x70] sm:$0xff] %vm319_vm0, %v2907_v55  ;;  %v2887_v55 = vld [vmem:[%s3350_s14 + $0xd0] sm:$0xff] }
 0x3ce   : > { %v2437_v39 = vpop.f32.mrf.mxu3 }
 0x3cf   : > { %v2438_v16 = vadd.f32 %v4848_v9, %v2437_v39 }
 0x3d1   : > { %vm2481_vm5 = vcmp.ge.f32.partialorder %v2438_v16, 1.0 }
 0x3d2   : > { %v3143_v62 = vsel %vm2481_vm5, 1.0, %v5261_v37 }
 0x3d3   : > { %3175 = vmatmul.msk.f32.vlgmr.msra.gmra.mxu3 %vm625_vm1, %v3143_v62  ;;  %v2881_v62 = vld [vmem:[%s3350_s14 + $0xa0] sm:$0xff] }
 0x3d7   : > { %v2714_v50 = vpop.f32.mrf.mxu2 }
 0x3d8   : > { %v2715_v46 = vadd.f32 %v4988_v17, %v2714_v50 }
 0x3d9   : > { %v2419_v56 = vpop.f32.mrf.mxu1 }
 0x3da   : > { %vm2780_vm6 = vcmp.ge.f32.partialorder %v2715_v46, 1.0  ;;  %v2420_v15 = vadd.f32 %v4848_v9, %v2419_v56 }
 0x3db   : > { %v3196_v32 = vsel %vm2780_vm6, 1.0, %v5261_v37 }
 0x3dc   : > { %v2908_v51 = vadd.f32 %v3196_v32, %v2876_v12  ;;  %vm2475_vm8 = vcmp.ge.f32.partialorder %v2420_v15, 1.0  ;;  %v2888_v15 = vld [vmem:[%s3350_s14 + $0xd8] sm:$0xff] }
 0x3dd   : > { %v3137_v7 = vsel %vm2475_vm8, 1.0, %v5261_v37 }
 0x3de   : > { %2940 = vst.msk [vmem:[%s4437_s9 + $0x78] sm:$0xff] %vm319_vm0, %v2908_v51  ;;  %3169 = vmatmul.msk.f32.gmra.mxu2 %vm625_vm1, %v3137_v7 }
 0x3ed   : > { %v2440_v26 = vpop.f32.mrf.mxu3 }
 0x3ee   : > { %v2441_v36 = vadd.f32 %v4848_v9, %v2440_v26 }
 0x3f0   : > { %vm2482_vm9 = vcmp.ge.f32.partialorder %v2441_v36, 1.0  ;;  %v2717_v52 = vpop.f32.mrf.mxu2 }
 0x3f1   : > { %v2718_v0 = vadd.f32 %v4988_v17, %v2717_v52  ;;  %v3144_v2 = vsel %vm2482_vm9, 1.0, %v5261_v37  ;;  %v2882_v52 = vld [vmem:[%s3350_s14 + $0xa8] sm:$0xff] }
 0x3f2   : > { %3176 = vmatmul.msk.f32.gmra.mxu3 %vm625_vm1, %v3144_v2  ;;  %v2889_v2 = vld [vmem:[%s3350_s14 + $0xe0] sm:$0xff] }
 0x3f3   : > { %vm2781_vm11 = vcmp.ge.f32.partialorder %v2718_v0, 1.0 }
 0x3f4   : > { %v3197_v5 = vsel %vm2781_vm11, 1.0, %v5261_v37 }
 0x3f5   : > { %v2909_v63 = vadd.f32 %v3197_v5, %v2877_v23 }
 0x3f7   : > { %2941 = vst.msk [vmem:[%s4437_s9 + $0x80] sm:$0xff] %vm319_vm0, %v2909_v63 }
 0x3ff   : > { %v2422_v43 = vpop.f32.mrf.mxu1 }
 0x400   : > { %v2423_v25 = vadd.f32 %v4848_v9, %v2422_v43  ;;  %v2443_v42 = vpop.f32.mrf.mxu3 }
 0x401   : > { %v2444_v11 = vadd.f32 %v4848_v9, %v2443_v42 }
 0x402   : > { %vm2476_vm12 = vcmp.ge.f32.partialorder %v2423_v25, 1.0 }
 0x403   : > { %vm2483_vm13 = vcmp.ge.f32.partialorder %v2444_v11, 1.0  ;;  %v3138_v10 = vsel %vm2476_vm12, 1.0, %v5261_v37  ;;  %v2883_v11 = vld [vmem:[%s3350_s14 + $0xb0] sm:$0xff] }
 0x404   : > { %3170 = vmatmul.msk.f32.gmra.mxu2 %vm625_vm1, %v3138_v10  ;;  %v3145_v22 = vsel %vm2483_vm13, 1.0, %v5261_v37 }
 0x405   : > { %3177 = vmatmul.msk.f32.gmra.mxu3 %vm625_vm1, %v3145_v22 }
 0x409   : > { %v2720_v59 = vpop.f32.mrf.mxu2 }
 0x40a   : > { %v2721_v29 = vadd.f32 %v4988_v17, %v2720_v59 }
 0x40c   : > { %vm2782_vm2 = vcmp.ge.f32.partialorder %v2721_v29, 1.0  ;;  %3171 = vmatmul.msk.f32.gmra.mxu2 %vm625_vm1, %v3139_v41  ;;  %v2884_v29 = vld [vmem:[%s3350_s14 + $0xb8] sm:$0xff] }
 0x40d   : > { %v3198_v21 = vsel %vm2782_vm2, 1.0, %v5261_v37 }
 0x40e   : > { %v2910_v6 = vadd.f32 %v3198_v21, %v2878_v4 }
 0x410   : > { %2942 = vst.msk [vmem:[%s4437_s9 + $0x88] sm:$0xff] %vm319_vm0, %v2910_v6 }
 0x414   : > { %3172 = vmatmul.msk.f32.gmra.mxu2 %vm625_vm1, %v3140_v31 }
 0x417   : > { %v2446_v48 = vpop.f32.mrf.mxu3 }
 0x418   : > { %v2447_v28 = vadd.f32 %v4848_v9, %v2446_v48  ;;  %v2890_v48 = vld [vmem:[%s3350_s14 + $0xe8] sm:$0xff] }
 0x41a   : > { %vm2484_vm15 = vcmp.ge.f32.partialorder %v2447_v28, 1.0 }
 0x41b   : > { %v3146_v38 = vsel %vm2484_vm15, 1.0, %v5261_v37 }
 0x41c   : > { %3173 = vmatmul.msk.f32.gmra.mxu2 %vm625_vm1, %v3141_v53  ;;  %3178 = vmatmul.msk.f32.gmra.mxu3 %vm625_vm1, %v3146_v38 }
 0x424   : > { %3174 = vmatmul.msk.f32.gmra.mxu2 %vm625_vm1, %v3142_v8 }
 0x427   : > { %v2449_v54 = vpop.f32.mrf.mxu3 }
 0x428   : > { %v2450_v1 = vadd.f32 %v4848_v9, %v2449_v54 }
 0x42a   : > { %vm2485_vm4 = vcmp.ge.f32.partialorder %v2450_v1, 1.0  ;;  %v2886_v1 = vld [vmem:[%s3350_s14 + $0xc8] sm:$0xff] }
 0x42b   : > { %v3147_v61 = vsel %vm2485_vm4, 1.0, %v5261_v37 }
 0x42c   : > { %3179 = vmatmul.msk.f32.gmra.mxu3 %vm625_vm1, %v3147_v61 }
 0x42f   : > { %v2723_v27 = vpop.f32.mrf.mxu2 }
 0x430   : > { %v2724_v19 = vadd.f32 %v4988_v17, %v2723_v27 }
 0x432   : > { %vm2783_vm5 = vcmp.ge.f32.partialorder %v2724_v19, 1.0 }
 0x433   : > { %v3199_v30 = vsel %vm2783_vm5, 1.0, %v5261_v37 }
 0x434   : > { %v2911_v60 = vadd.f32 %v3199_v30, %v2879_v34  ;;  %v2891_v30 = vld [vmem:[%s3350_s14 + $0xf0] sm:$0xff] }
 0x436   : > { %2943 = vst.msk [vmem:[%s4437_s9 + $0x90] sm:$0xff] %vm319_vm0, %v2911_v60 }
 0x437   : > { %v2452_v18 = vpop.f32.mrf.mxu3 }
 0x438   : > { %v2453_v33 = vadd.f32 %v4848_v9, %v2452_v18 }
 0x43a   : > { %vm2486_vm6 = vcmp.ge.f32.partialorder %v2453_v33, 1.0 }
 0x43b   : > { %v3148_v58 = vsel %vm2486_vm6, 1.0, %v5261_v37 }
 0x43c   : > { %3180 = vmatmul.msk.f32.gmra.mxu3 %vm625_vm1, %v3148_v58 }
 0x448   : > { %v2726_v35 = vpop.f32.mrf.mxu2 }
 0x449   : > { %v2727_v13 = vadd.f32 %v4988_v17, %v2726_v35  ;;  %v2892_v35 = vld [vmem:[%s3350_s14 + $0xf8] sm:$0xff] }
 0x44b   : > { %vm2784_vm8 = vcmp.ge.f32.partialorder %v2727_v13, 1.0 }
 0x44c   : > { %v3200_v44 = vsel %vm2784_vm8, 1.0, %v5261_v37 }
 0x44d   : > { %v2912_v3 = vadd.f32 %v3200_v44, %v2880_v49 }
 0x44f   : > { %2944 = vst.msk [vmem:[%s4437_s9 + $0x98] sm:$0xff] %vm319_vm0, %v2912_v3 }
 0x456   : > { %v2747_v14 = vpop.f32.mrf.mxu3 }
 0x457   : > { %v2748_v9 = vadd.f32 %v4988_v17, %v2747_v14 }
 0x459   : > { %vm2791_vm9 = vcmp.ge.f32.partialorder %v2748_v9, 1.0 }
 0x45a   : > { %v3207_v40 = vsel %vm2791_vm9, 1.0, %v5261_v37 }
 0x45b   : > { %v2919_v45 = vadd.f32 %v3207_v40, %v2887_v55 }
 0x45d   : > { %2951 = vst.msk [vmem:[%s4437_s9 + $0xd0] sm:$0xff] %vm319_vm0, %v2919_v45 }
 0x461   : > { %v2729_v39 = vpop.f32.mrf.mxu2 }
 0x462   : > { %v2730_v16 = vadd.f32 %v4988_v17, %v2729_v39 }
 0x464   : > { %vm2785_vm1 = vcmp.ge.f32.partialorder %v2730_v16, 1.0 }
 0x465   : > { %v3201_v50 = vsel %vm2785_vm1, 1.0, %v5261_v37 }
 0x466   : > { %v2913_v46 = vadd.f32 %v3201_v50, %v2881_v62 }
 0x468   : > { %2945 = vst.msk [vmem:[%s4437_s9 + $0xa0] sm:$0xff] %vm319_vm0, %v2913_v46 }
 0x475   : > { %v2750_v12 = vpop.f32.mrf.mxu3 }
 0x476   : > { %v2751_v56 = vadd.f32 %v4988_v17, %v2750_v12 }
 0x478   : > { %vm2792_vm11 = vcmp.ge.f32.partialorder %v2751_v56, 1.0 }
 0x479   : > { %v3208_v32 = vsel %vm2792_vm11, 1.0, %v5261_v37 }
 0x47a   : > { %v2920_v51 = vadd.f32 %v3208_v32, %v2888_v15 }
 0x47c   : > { %2952 = vst.msk [vmem:[%s4437_s9 + $0xd8] sm:$0xff] %vm319_vm0, %v2920_v51 }
 0x487   : > { %v2732_v7 = vpop.f32.mrf.mxu2 }
 0x488   : > { %v2733_v26 = vadd.f32 %v4988_v17, %v2732_v7  ;;  %v2753_v36 = vpop.f32.mrf.mxu3 }
 0x489   : > { %v2754_v0 = vadd.f32 %v4988_v17, %v2753_v36 }
 0x48a   : > { %vm2786_vm12 = vcmp.ge.f32.partialorder %v2733_v26, 1.0 }
 0x48b   : > { %v3202_v23 = vsel %vm2786_vm12, 1.0, %v5261_v37  ;;  %vm2793_vm13 = vcmp.ge.f32.partialorder %v2754_v0, 1.0 }
 0x48c   : > { %v2914_v5 = vadd.f32 %v3202_v23, %v2882_v52  ;;  %v3209_v63 = vsel %vm2793_vm13, 1.0, %v5261_v37 }
 0x48d   : > { %v2921_v43 = vadd.f32 %v3209_v63, %v2889_v2 }
 0x48e   : > { %2946 = vst.msk [vmem:[%s4437_s9 + $0xa8] sm:$0xff] %vm319_vm0, %v2914_v5 }
 0x48f   : > { %2953 = vst.msk [vmem:[%s4437_s9 + $0xe0] sm:$0xff] %vm319_vm0, %v2921_v43  ;;  %v2735_v25 = vpop.f32.mrf.mxu2 }
 0x490   : > { %v2736_v42 = vadd.f32 %v4988_v17, %v2735_v25 }
 0x492   : > { %vm2787_vm14 = vcmp.ge.f32.partialorder %v2736_v42, 1.0 }
 0x493   : > { %v3203_v10 = vsel %vm2787_vm14, 1.0, %v5261_v37 }
 0x494   : > { %v2915_v47 = vadd.f32 %v3203_v10, %v2883_v11 }
 0x496   : > { %2947 = vst.msk [vmem:[%s4437_s9 + $0xb0] sm:$0xff] %vm319_vm0, %v2915_v47 }
 0x497   : > { %v2738_v22 = vpop.f32.mrf.mxu2 }
 0x498   : > { %v2739_v59 = vadd.f32 %v4988_v17, %v2738_v22 }
 0x49a   : > { %vm2788_vm2 = vcmp.ge.f32.partialorder %v2739_v59, 1.0 }
 0x49b   : > { %v3204_v4 = vsel %vm2788_vm2, 1.0, %v5261_v37 }
 0x49c   : > { %v2916_v41 = vadd.f32 %v3204_v4, %v2884_v29 }
 0x49e   : > { %2948 = vst.msk [vmem:[%s4437_s9 + $0xb8] sm:$0xff] %vm319_vm0, %v2916_v41 }
 0x49f   : > { %v2741_v24 = vpop.f32.mrf.mxu2  ;;  %v2756_v21 = vpop.f32.mrf.mxu3 }
 0x4a0   : > { %v2742_v6 = vadd.f32 %v4988_v17, %v2741_v24  ;;  %v2757_v31 = vadd.f32 %v4988_v17, %v2756_v21 }
 0x4a2   : > { %vm2789_vm7 = vcmp.ge.f32.partialorder %v2742_v6, 1.0  ;;  %vm2794_vm10 = vcmp.ge.f32.partialorder %v2757_v31, 1.0 }
 0x4a3   : > { %v3205_v28 = vsel %vm2789_vm7, 1.0, %v5261_v37  ;;  %v3210_v53 = vsel %vm2794_vm10, 1.0, %v5261_v37 }
 0x4a4   : > { %v2917_v38 = vadd.f32 %v3205_v28, %v2885_v57  ;;  %v2922_v20 = vadd.f32 %v3210_v53, %v2890_v48 }
 0x4a6   : > { %2949 = vst.msk [vmem:[%s4437_s9 + $0xc0] sm:$0xff] %vm319_vm0, %v2917_v38 }
 0x4a7   : > { %2954 = vst.msk [vmem:[%s4437_s9 + $0xe8] sm:$0xff] %vm319_vm0, %v2922_v20  ;;  %v2744_v8 = vpop.f32.mrf.mxu2 }
 0x4a8   : > { %v2745_v54 = vadd.f32 %v4988_v17, %v2744_v8 }
 0x4aa   : > { %vm2790_vm15 = vcmp.ge.f32.partialorder %v2745_v54, 1.0 }
 0x4ab   : > { %v3206_v61 = vsel %vm2790_vm15, 1.0, %v5261_v37 }
 0x4ac   : > { %v2918_v27 = vadd.f32 %v3206_v61, %v2886_v1 }
 0x4ae   : > { %2950 = vst.msk [vmem:[%s4437_s9 + $0xc8] sm:$0xff] %vm319_vm0, %v2918_v27 }
 0x4af   : > { %v2759_v19 = vpop.f32.mrf.mxu3 }
 0x4b0   : > { %v2760_v34 = vadd.f32 %v4988_v17, %v2759_v19 }
 0x4b2   : > { %vm2795_vm3 = vcmp.ge.f32.partialorder %v2760_v34, 1.0 }
 0x4b3   : > { %v3211_v60 = vsel %vm2795_vm3, 1.0, %v5261_v37 }
 0x4b4   : > { %v2923_v18 = vadd.f32 %v3211_v60, %v2891_v30 }
 0x4b6   : > { %2955 = vst.msk [vmem:[%s4437_s9 + $0xf0] sm:$0xff] %vm319_vm0, %v2923_v18 }
 0x4bf   : > { %v2762_v33 = vpop.f32.mrf.mxu3 }
 0x4c0   : > { %v2763_v58 = vadd.f32 %v4988_v17, %v2762_v33 }
 0x4c2   : > { %vm2796_vm4 = vcmp.ge.f32.partialorder %v2763_v58, 1.0 }
 0x4c3   : > { %v3212_v13 = vsel %vm2796_vm4, 1.0, %v5261_v37 }
 0x4c4   : > { %v2924_v49 = vadd.f32 %v3212_v13, %v2892_v35 }
 0x4c6   : > { %2956 = vst.msk [vmem:[%s4437_s9 + $0xf8] sm:$0xff] %vm319_vm0, %v2924_v49 }
 0x4c7 PF: > { %s17_s24 = sadd.s32 1, %s3271_s24  }
 0x4c8   : > { %p14_p4 = scmp.ge.s32.totalorder %s17_s24, 4  }
 0x4ca   :  { %16 = sbr.rel (!%p14_p4) target bundleno = 1 (0x1), region = 80 }

</bundles_post_ra>
